<compile_context>
chip_gen: v7x
topology: tpu7x:2x2x1
jax: 0.10.0
libtpu: 0.0.40
codegen_flags: <defaults>
</compile_context>

<pallas_src>
import jax
import jax.numpy as jnp
from jax.experimental import pallas as pl
from jax.experimental.pallas import tpu as pltpu

IN_DIM = 4096
HID_DIM = 1024
BITS = 12            # first entry of `bits = [12, 24, 32, 48]`
TK = 2048            # K-tile of the 4096-wide first matmul (n_k = 2)


def mlp_kernel(x_ref, w1_ref, b1_ref, w2_ref, b2_ref, out_ref, h_acc):
    """grid = (n_k,): walk the 4096-wide reduction with a resident f32
    accumulator; at the last K step add b1, apply ReLU, run the tiny second
    matmul in f32 and add b2 -- the whole forward pass fused in one kernel."""
    k = pl.program_id(0)

    @pl.when(k == 0)
    def _():
        h_acc[...] = jnp.zeros_like(h_acc)

    # bf16 x bf16 -> f32 accumulate (MXU fast path on v5e / v6e / v7x).
    # x arrives f32; the in-kernel cast is free VPU filler under the W1 DMA.
    h_acc[...] += jnp.dot(x_ref[...].astype(jnp.bfloat16), w1_ref[...],
                          preferred_element_type=jnp.float32)

    @pl.when(k == pl.num_programs(0) - 1)
    def _():
        h = jnp.maximum(h_acc[...] + b1_ref[...], 0.0)
        # Keep h in f32 (no bf16 round-trip); W2 is tiny, cast it up instead.
        out = jnp.dot(h, w2_ref[...].astype(jnp.float32),
                      preferred_element_type=jnp.float32) + b2_ref[...]
        out_ref[...] = out.astype(out_ref.dtype)


def custom_nn_forward(x, w1, b1, w2, b2):
    """x:(B,4096) f32, w1:(4096,1024) bf16, b1:(1,1024) f32,
    w2:(1024,BITS) bf16, b2:(1,BITS) f32 -> (B,BITS) f32."""
    B = x.shape[0]
    n_k = IN_DIM // TK

    cost = pl.CostEstimate(
        flops=2 * B * IN_DIM * HID_DIM + 2 * B * HID_DIM * BITS,
        transcendentals=0,
        bytes_accessed=(x.size * 4 + w1.size * 2 + b1.size * 4
                        + w2.size * 2 + b2.size * 4 + B * BITS * 4),
    )

    return pl.pallas_call(
        mlp_kernel,
        out_shape=jax.ShapeDtypeStruct((B, BITS), jnp.float32),
        grid_spec=pltpu.PrefetchScalarGridSpec(
            num_scalar_prefetch=0,
            grid=(n_k,),
            in_specs=[
                pl.BlockSpec((B, TK), lambda k: (0, k)),          # x K-slab (f32)
                pl.BlockSpec((TK, HID_DIM), lambda k: (k, 0)),    # W1 tile (bf16)
                pl.BlockSpec((1, HID_DIM), lambda k: (0, 0)),     # b1
                pl.BlockSpec((HID_DIM, BITS), lambda k: (0, 0)),  # W2 (bf16)
                pl.BlockSpec((1, BITS), lambda k: (0, 0)),        # b2
            ],
            out_specs=pl.BlockSpec((B, BITS), lambda k: (0, 0)),
            scratch_shapes=[pltpu.VMEM((B, HID_DIM), jnp.float32)],
        ),
        compiler_params=pltpu.CompilerParams(
            dimension_semantics=("arbitrary",),
            vmem_limit_bytes=32 << 20,  # footprint ~9 MiB; headroom on v7x (64 MiB phys)
        ),
        cost_estimate=cost,
    )(x, w1, b1, w2, b2)


if __name__ == "__main__":
    key = jax.random.PRNGKey(0)
    kx, k1, k2, k3, k4 = jax.random.split(key, 5)

    B = 8
    x = jax.random.normal(kx, (B, IN_DIM), dtype=jnp.float32)

    # Deterministic init matching nn.init.normal_(mean=0, std=0.01).
    # PyTorch Linear.weight is (out, in); we store the transpose (in, out).
    # Weights are *stored* in bf16 (cast once here, not per call) so the
    # dominant 8 MiB W1 HBM stream is halved vs f32.
    w1 = (0.01 * jax.random.normal(k1, (IN_DIM, HID_DIM), jnp.float32)).astype(jnp.bfloat16)
    b1 = 0.01 * jax.random.normal(k2, (1, HID_DIM), jnp.float32)
    w2 = (0.01 * jax.random.normal(k3, (HID_DIM, BITS), jnp.float32)).astype(jnp.bfloat16)
    b2 = 0.01 * jax.random.normal(k4, (1, BITS), jnp.float32)

    out = custom_nn_forward(x, w1, b1, w2, b2)
    out = jax.block_until_ready(out)

    # Pure-JAX reference on the same bf16-cast operands (f32 math, highest
    # precision).  The hidden activations stay f32 in both paths now, so the
    # only residual difference is f32 accumulation order.
    xf = x.astype(jnp.bfloat16).astype(jnp.float32)
    w1f = w1.astype(jnp.float32)
    w2f = w2.astype(jnp.float32)
    h_ref = jnp.maximum(
        jnp.dot(xf, w1f, precision=jax.lax.Precision.HIGHEST) + b1, 0.0)
    ref = jnp.dot(h_ref, w2f, precision=jax.lax.Precision.HIGHEST) + b2

    assert out.shape == (B, BITS)
    assert jnp.allclose(out, ref, atol=5e-3, rtol=5e-3), \
        float(jnp.max(jnp.abs(out - ref)))

    print("KERNEL_OK")
</pallas_src>

<mosaic_0001>
module attributes {stable_mosaic.version = 11 : i64} {
  func.func @mlp_kernel(%arg0: i32, %arg1: memref<8x2048xf32, #tpu.memory_space<vmem>>, %arg2: memref<2048x1024xbf16, #tpu.memory_space<vmem>>, %arg3: memref<1x1024xf32, #tpu.memory_space<vmem>>, %arg4: memref<1024x12xbf16, #tpu.memory_space<vmem>>, %arg5: memref<1x12xf32, #tpu.memory_space<vmem>>, %arg6: memref<8x12xf32, #tpu.memory_space<vmem>>, %arg7: memref<8x1024xf32, #tpu.memory_space<vmem>>) attributes {dimension_semantics = [#tpu.dimension_semantics<arbitrary>], iteration_bounds = array<i64: 2>, scalar_prefetch = 0 : i64, scratch_operands = 1 : i64, tpu.core_type = #tpu.core_type<tc>, window_params = [{transform_indices = @transform_0, window_bounds = array<i64: 8, 2048>}, {transform_indices = @transform_1, window_bounds = array<i64: 2048, 1024>}, {pipeline_mode = #tpu.pipeline_mode<synchronous>, transform_indices = @transform_2, window_bounds = array<i64: 1, 1024>}, {pipeline_mode = #tpu.pipeline_mode<synchronous>, transform_indices = @transform_3, window_bounds = array<i64: 1024, 12>}, {pipeline_mode = #tpu.pipeline_mode<synchronous>, transform_indices = @transform_4, window_bounds = array<i64: 1, 12>}, {pipeline_mode = #tpu.pipeline_mode<synchronous>, transform_indices = @transform_5, window_bounds = array<i64: 8, 12>}]} {
    %c0_i32 = arith.constant 0 : i32
    %0 = arith.cmpi eq, %arg0, %c0_i32 : i32
    %1 = arith.extui %0 : i1 to i32
    %c0_i32_0 = arith.constant 0 : i32
    %2 = arith.cmpi ne, %1, %c0_i32_0 : i32
    scf.if %2 {
      %cst_9 = arith.constant 0.000000e+00 : f32
      %13 = vector.broadcast %cst_9 : f32 to vector<8x1024xf32>
      %c0_10 = arith.constant 0 : index
      %c0_11 = arith.constant 0 : index
      %14 = vector.load %arg7[%c0_10, %c0_11] : memref<8x1024xf32, #tpu.memory_space<vmem>>, vector<8x1024xf32>
      tpu.vector_store %arg7[%c0_10, %c0_11], %13 {strides = array<i32>} : memref<8x1024xf32, #tpu.memory_space<vmem>>, vector<8x1024xf32>,
    } else {
    }
    %c0 = arith.constant 0 : index
    %c0_1 = arith.constant 0 : index
    %3 = vector.load %arg7[%c0, %c0_1] : memref<8x1024xf32, #tpu.memory_space<vmem>>, vector<8x1024xf32>
    %c0_2 = arith.constant 0 : index
    %c0_3 = arith.constant 0 : index
    %4 = vector.load %arg1[%c0_2, %c0_3] : memref<8x2048xf32, #tpu.memory_space<vmem>>, vector<8x2048xf32>
    %5 = arith.truncf %4 : vector<8x2048xf32> to vector<8x2048xbf16>
    %c0_4 = arith.constant 0 : index
    %c0_5 = arith.constant 0 : index
    %6 = vector.load %arg2[%c0_4, %c0_5] : memref<2048x1024xbf16, #tpu.memory_space<vmem>>, vector<2048x1024xbf16>
    %cst = arith.constant dense<0.000000e+00> : vector<8x1024xf32>
    %7 = tpu.matmul %5, %6, %cst {dimension_numbers = #tpu.dot_dimension_numbers<[1], [0], [0], [1], [0, 0, 1, 1], [], []>} : vector<8x2048xbf16>, vector<2048x1024xbf16>, vector<8x1024xf32> -> vector<8x1024xf32>
    %8 = arith.addf %3, %7 : vector<8x1024xf32>
    %c0_6 = arith.constant 0 : index
    %c0_7 = arith.constant 0 : index
    %9 = vector.load %arg7[%c0_6, %c0_7] : memref<8x1024xf32, #tpu.memory_space<vmem>>, vector<8x1024xf32>
    tpu.vector_store %arg7[%c0_6, %c0_7], %8 {strides = array<i32>} : memref<8x1024xf32, #tpu.memory_space<vmem>>, vector<8x1024xf32>,
    %c1_i32 = arith.constant 1 : i32
    %10 = arith.cmpi eq, %arg0, %c1_i32 : i32
    %11 = arith.extui %10 : i1 to i32
    %c0_i32_8 = arith.constant 0 : i32
    %12 = arith.cmpi ne, %11, %c0_i32_8 : i32
    scf.if %12 {
      %c0_9 = arith.constant 0 : index
      %c0_10 = arith.constant 0 : index
      %13 = vector.load %arg7[%c0_9, %c0_10] : memref<8x1024xf32, #tpu.memory_space<vmem>>, vector<8x1024xf32>
      %c0_11 = arith.constant 0 : index
      %c0_12 = arith.constant 0 : index
      %14 = vector.load %arg3[%c0_11, %c0_12] : memref<1x1024xf32, #tpu.memory_space<vmem>>, vector<1x1024xf32>
      %15 = vector.broadcast %14 : vector<1x1024xf32> to vector<8x1024xf32>
      %16 = arith.addf %13, %15 : vector<8x1024xf32>
      %cst_13 = arith.constant 0.000000e+00 : f32
      %17 = vector.broadcast %cst_13 : f32 to vector<8x1024xf32>
      %18 = arith.maximumf %16, %17 : vector<8x1024xf32>
      %c0_14 = arith.constant 0 : index
      %c0_15 = arith.constant 0 : index
      %19 = vector.load %arg4[%c0_14, %c0_15] : memref<1024x12xbf16, #tpu.memory_space<vmem>>, vector<1024x12xbf16>
      %20 = arith.extf %19 : vector<1024x12xbf16> to vector<1024x12xf32>
      %cst_16 = arith.constant dense<0.000000e+00> : vector<8x12xf32>
      %21 = tpu.matmul %18, %20, %cst_16 {dimension_numbers = #tpu.dot_dimension_numbers<[1], [0], [0], [1], [0, 0, 1, 1], [], []>} : vector<8x1024xf32>, vector<1024x12xf32>, vector<8x12xf32> -> vector<8x12xf32>
      %c0_17 = arith.constant 0 : index
      %c0_18 = arith.constant 0 : index
      %22 = vector.load %arg5[%c0_17, %c0_18] : memref<1x12xf32, #tpu.memory_space<vmem>>, vector<1x12xf32>
      %23 = vector.broadcast %22 : vector<1x12xf32> to vector<8x12xf32>
      %24 = arith.addf %21, %23 : vector<8x12xf32>
      %c0_19 = arith.constant 0 : index
      %c0_20 = arith.constant 0 : index
      %25 = vector.load %arg6[%c0_19, %c0_20] : memref<8x12xf32, #tpu.memory_space<vmem>>, vector<8x12xf32>
      tpu.vector_store %arg6[%c0_19, %c0_20], %24 {strides = array<i32>} : memref<8x12xf32, #tpu.memory_space<vmem>>, vector<8x12xf32>,
    } else {
    }
    return
  }
  func.func @transform_0(%arg0: i32) -> (i32, i32) {
    %c0_i32 = arith.constant 0 : i32
    %c0_i32_0 = arith.constant 0 : i32
    return %c0_i32, %arg0 : i32, i32
  }
  func.func @transform_1(%arg0: i32) -> (i32, i32) {
    %c0_i32 = arith.constant 0 : i32
    %c0_i32_0 = arith.constant 0 : i32
    return %arg0, %c0_i32 : i32, i32
  }
  func.func @transform_2(%arg0: i32) -> (i32, i32) {
    %c0_i32 = arith.constant 0 : i32
    %c0_i32_0 = arith.constant 0 : i32
    %c0_i32_1 = arith.constant 0 : i32
    return %c0_i32, %c0_i32_0 : i32, i32
  }
  func.func @transform_3(%arg0: i32) -> (i32, i32) {
    %c0_i32 = arith.constant 0 : i32
    %c0_i32_0 = arith.constant 0 : i32
    %c0_i32_1 = arith.constant 0 : i32
    return %c0_i32, %c0_i32_0 : i32, i32
  }
  func.func @transform_4(%arg0: i32) -> (i32, i32) {
    %c0_i32 = arith.constant 0 : i32
    %c0_i32_0 = arith.constant 0 : i32
    %c0_i32_1 = arith.constant 0 : i32
    return %c0_i32, %c0_i32_0 : i32, i32
  }
  func.func @transform_5(%arg0: i32) -> (i32, i32) {
    %c0_i32 = arith.constant 0 : i32
    %c0_i32_0 = arith.constant 0 : i32
    %c0_i32_1 = arith.constant 0 : i32
    return %c0_i32, %c0_i32_0 : i32, i32
  }
}

</mosaic_0001>

<bundles_post_ra>
// kernel: tpu_custom_call.1
= control target key start
LH: loop header
LB: loop body
LE: loop exit
PB: predicated region body
PF: predicated region fallthrough
CT: control target
= control target key end

     0   :  { %10 = vsyncpa [#allocation4], 0  ;;  %s12135_s0 = inlined_call_operand.hbm [shape: f32[8,4096], index: 0, kind: input, shape index: {}]   ;;  %s12136_s1 = inlined_call_operand.hbm [shape: bf16[4096,1024], index: 1, kind: input, shape index: {}]   ;;  %s12137_s2 = inlined_call_operand.hbm [shape: f32[1,1024], index: 2, kind: input, shape index: {}]   ;;  %s12138_s3 = inlined_call_operand.vmem [shape: bf16[1024,12], index: 3, kind: input, shape index: {}]   ;;  %s12139_s4 = inlined_call_operand.hbm [shape: f32[1,12], index: 4, kind: input, shape index: {}]   ;;  %s12140_s5 = inlined_call_operand.hbm [shape: f32[8,12], index: 5, kind: output, shape index: {}]  }
   0x1   :  { %12 = vsyncpa [#allocation4 + $0x1], 0 }
   0x2   :  { %13 = vsyncpa [#allocation7], 0 }
   0x3   :  { %15 = vsyncpa [#allocation7 + $0x1], 0 }
   0x4   :  { %16 = vsyncpa [#allocation10], 0 }
   0x5   :  { %17 = vsyncpa [#allocation5], 0  ;;  %s10480_s18 = smov 0   ;;  %s10482_s19 = smov 0  }
   0x6   :  { %s10484_s20 = smov 0   ;;  %s10486_s21 = smov 0  }
   0x7 LB: > { %s10499_s22 = sadd.s32 4294967295, %s10440_s21   ;;  %p43_p0 = scmp.ne.s32.totalorder %s10432_s19, %s10428_s18  ;;  %s10440_s21 = sphi %s10486_s21, %s12158_s21   ;;  %s10436_s20 = sphi %s10484_s20, %s12157_s20   ;;  %s10432_s19 = sphi %s10482_s19, %s12156_s19   ;;  %s10428_s18 = sphi %s10480_s18, %s12155_s18  }
   0x8   : > { %p12141_p1 = scmp.eq.s32.totalorder %s10499_s22, 0  ;;  %p8536_p2 = scmp.ge.s32.totalorder %s10440_s21, 1 }
   0x9   : > { %p164_p3 = scmp.lt.s32.totalorder %s10440_s21, 3  ;;  %s10442_s25 = smov [#allocation8]  }
   0xa   : > { %p10508_p5 = por %p12141_p1, %p43_p0  ;;  %s177_s26 = sshll.u32 %s10442_s25, 4  ;;  %s178_s26 = int_to_ptr.vmem [resolvable:$true] %s177_s26 }
   0xb   : > { %p10512_p6 = pnand %p8536_p2, %p164_p3  ;;  %s10443_s27 = smov [#allocation9]  }
   0xc   : > { %s12144_s23 = scalar_select %p10508_p5, 1, 0 }
   0xd   : > { %s12145_s24 = scalar_select %p10512_p6, 1, 0 }
   0xe   : > { %p10189_p7 = pneg %p10512_p6  ;;  %s191_s28 = sshll.u32 %s10443_s27, 4  ;;  %s10524_s28 = int_to_ptr.vmem [resolvable:$true] %s191_s28 }
   0xf   : > { %s10527_s30 = sadd.s32 1, %s10440_s21   ;;  %s10248_s9 = scalar_lea.hbm %s12137_s2, 128 }
  0x10   : > { %p10520_p8 = pnand %p10189_p7, %p12141_p1  ;;  %s27_s6 = ssub.s32 %s10440_s21, %s10527_s30 }
  0x11   : > { %p10249_p9 = scmp.ne.s32.totalorder %s12137_s2, %s10248_s9  ;;  %p10255_p13 = scmp.lt.u32.totalorder %s10248_s9, %s12137_s2 }
  0x12   : > { %p10250_p10 = pneg %p10520_p8 }
  0x14   : > { %p10251_p11 = pnand %p10250_p10, %p10249_p9 }
  0x16   : > { %p10252_p12 = pneg %p10251_p11 }
  0x18   : > { %p10257_p0 = pnand %p10255_p13, %p10252_p12 }
  0x1a   : > { %10260 = shalt.err (!%p10257_p0)
}
  0x1b   : > { %s10261_s14 = scalar_lea.vmem %s178_s26, 128  ;;  %p10269_p4 = scmp.lt.s32.totalorder %s178_s26, %s178_s26 }
  0x1c   : > { %p10262_p2 = scmp.ne.s32.totalorder %s178_s26, %s10261_s14  ;;  %p10270_p1 = scmp.lt.s32.totalorder %s10261_s14, %s10261_s14 }
  0x1e   : > { %p10264_p3 = pnand %p10262_p2, %p10250_p10  ;;  %p10271_p5 = por %p10270_p1, %p10269_p4 }
  0x20   : > { %p10265_p7 = pneg %p10264_p3 }
  0x22   : > { %p10272_p6 = pnand %p10271_p5, %p10265_p7 }
  0x24   : > { %10275 = shalt.err (!%p10272_p6)
}
  0x25   : > { %10192 = dma.hbm_to_vmem [thread:$0]  (!%p10520_p8), %s12137_s2, 128, %s178_s26, [#allocation7]  }
  0x26   : > { %s10276_s25 = scalar_lea.hbm %s12139_s4, 16 }
  0x27   : > { %p10277_p9 = scmp.ne.s32.totalorder %s12139_s4, %s10276_s25  ;;  %p10283_p5 = scmp.lt.u32.totalorder %s10276_s25, %s12139_s4 }
  0x29   : > { %p10279_p1 = pnand %p10277_p9, %p10250_p10 }
  0x2b   : > { %p10280_p4 = pneg %p10279_p1 }
  0x2d   : > { %p10285_p6 = pnand %p10283_p5, %p10280_p4 }
  0x2f   : > { %10288 = shalt.err (!%p10285_p6)
}
  0x30   : > { %s10289_s26 = scalar_lea.vmem %s10524_s28, 16  ;;  %s10296_s10 = scalar_lea.vmem %s10524_s28, 32 }
  0x31   : > { %p10290_p11 = scmp.ne.s32.totalorder %s10524_s28, %s10289_s26  ;;  %p10297_p0 = scmp.lt.s32.totalorder %s10524_s28, %s10524_s28 }
  0x32   : > { %p10298_p2 = scmp.lt.s32.totalorder %s10296_s10, %s10289_s26 }
  0x33   : > { %p10292_p12 = pnand %p10290_p11, %p10250_p10 }
  0x34   : > { %p10299_p3 = por %p10298_p2, %p10297_p0 }
  0x35   : > { %p10293_p13 = pneg %p10292_p12 }
  0x37   : > { %p10300_p7 = pnand %p10299_p3, %p10293_p13 }
  0x39   : > { %10303 = shalt.err (!%p10300_p7)
}
  0x3a   : > { %10195 = dma.hbm_to_vmem [thread:$0]  (!%p10520_p8), %s12139_s4, 16, %s10524_s28, [#allocation10]  }
  0x3b   : > { %p28_p10 = scmp.eq.s32.totalorder %s27_s6, 0  ;;  %s30_s13 = sadd.s32 1, %s10436_s20 }
  0x3c   : > { %p37_p9 = scmp.ne.s32.totalorder %s10436_s20, %s10432_s19  ;;  %p38_p1 = scmp.eq.s32.totalorder %s10440_s21, 0 }
  0x3d   : > { %s10587_s29 = scalar_select %p28_p10, %s10436_s20, %s30_s13  }
  0x3e   : > { %p39_p4 = por %p38_p1, %p37_p9  ;;  %p10205_p5 = scmp.lt.s32.totalorder %s10440_s21, 2 }
  0x3f   : > { %s10591_s14 = sand.u32 1, %s10436_s20   ;;  %s9583_s15 = sshll.u32 %s10440_s21, 11 }
  0x40   : > { %s8540_s16 = sshll.u32 %s10591_s14, 7  ;;  %s10598_s28 = scalar_lea.hbm %s12135_s0, %s9583_s15 }
  0x41   : > { %s206_s6 = scalar_lea.vmem [#allocation3], %s8540_s16  ;;  %p10600_p8 = pnand %p10205_p5, %p39_p4 }
  0x42   : > { %s214_s25 = sshll.u32 %s206_s6, 4  ;;  %s8543_s7 = sshll.u32 %s10591_s14, 13  ;;  %s10604_s25 = int_to_ptr.vmem [resolvable:$true] %s214_s25 }
  0x43   : > { %s203_s8 = scalar_lea.sflag [#allocation4], %s10591_s14  ;;  %s10304_s9 = scalar_lea.hbm %s10598_s28, 2048 }
  0x44   : > { %p10305_p6 = scmp.ne.s32.totalorder %s10598_s28, %s10304_s9  ;;  %p10306_p11 = pneg %p10600_p8 }
  0x45   : > { %s10309_s11 = scalar_lea.hbm %s12135_s0, 4096  ;;  %p10310_p0 = scmp.lt.u32.totalorder %s10598_s28, %s12135_s0 }
  0x46   : > { %p10307_p12 = pnand %p10306_p11, %p10305_p6  ;;  %p10311_p2 = scmp.lt.u32.totalorder %s10309_s11, %s10304_s9 }
  0x47   : > { %p10313_p7 = scmp.lt.u32.totalorder %s10304_s9, %s10598_s28 }
  0x48   : > { %p10308_p13 = pneg %p10307_p12  ;;  %p10312_p3 = por %p10311_p2, %p10310_p0 }
  0x4a   : > { %p10314_p10 = por %p10313_p7, %p10312_p3 }
  0x4c   : > { %p10315_p9 = pnand %p10314_p10, %p10308_p13 }
  0x4e   : > { %10318 = shalt.err (!%p10315_p9)
}
  0x4f   : > { %s10319_s15 = scalar_lea.vmem %s10604_s25, 2048  ;;  %s10444_s16 = smov [#allocation3]  }
  0x50   : > { %p10320_p1 = scmp.ne.s32.totalorder %s10604_s25, %s10319_s15  ;;  %s10324_s17 = sshll.u32 %s10444_s16, 4  ;;  %s10325_s17 = int_to_ptr.vmem [resolvable:$false] %s10324_s17 }
  0x51   : > { %s10326_s18 = scalar_lea.vmem %s10325_s17, 4096  ;;  %p10327_p6 = scmp.lt.s32.totalorder %s10604_s25, %s10325_s17 }
  0x52   : > { %p10322_p4 = pnand %p10320_p1, %p10306_p11  ;;  %p10328_p12 = scmp.lt.s32.totalorder %s10326_s18, %s10319_s15 }
  0x54   : > { %p10323_p5 = pneg %p10322_p4  ;;  %p10329_p0 = por %p10328_p12, %p10327_p6 }
  0x56   : > { %p10330_p2 = pnand %p10329_p0, %p10323_p5 }
  0x58   : > { %10333 = shalt.err (!%p10330_p2)
}
  0x59   : > { %10199 = dma.hbm_to_vmem [thread:$0]  (!%p10600_p8), %s10598_s28, 2048, %s10604_s25, %s203_s8  }
  0x5a   : > { %s225_s6 = scalar_lea.vmem [#allocation6], %s8543_s7  ;;  %s221_s26 = sand.u32 1, %s10440_s21  }
  0x5b   : > { %s233_s9 = sshll.u32 %s225_s6, 4  ;;  %s9585_s10 = sshll.u32 %s10440_s21, 17  ;;  %s10636_s9 = int_to_ptr.vmem [resolvable:$true] %s233_s9 }
  0x5c   : > { %s10642_s13 = scalar_lea.hbm %s12136_s1, %s9585_s10  ;;  %s10644_s15 = scalar_lea.sflag [#allocation7], %s221_s26 }
  0x5d   : > { %s10334_s16 = scalar_lea.hbm %s10642_s13, 131072  ;;  %s10339_s21 = scalar_lea.hbm %s12136_s1, 262144 }
  0x5e   : > { %p10335_p13 = scmp.ne.s32.totalorder %s10642_s13, %s10334_s16  ;;  %p10340_p10 = scmp.lt.u32.totalorder %s10642_s13, %s12136_s1 }
  0x5f   : > { %p10341_p9 = scmp.lt.u32.totalorder %s10339_s21, %s10334_s16  ;;  %p10343_p4 = scmp.lt.u32.totalorder %s10334_s16, %s10642_s13 }
  0x60   : > { %p10337_p3 = pnand %p10335_p13, %p10306_p11 }
  0x61   : > { %p10342_p1 = por %p10341_p9, %p10340_p10 }
  0x62   : > { %p10338_p7 = pneg %p10337_p3 }
  0x63   : > { %p10344_p5 = por %p10343_p4, %p10342_p1 }
  0x65   : > { %p10345_p6 = pnand %p10344_p5, %p10338_p7 }
  0x67   : > { %10348 = shalt.err (!%p10345_p6)
}
  0x68   : > { %s10349_s8 = scalar_lea.vmem %s10636_s9, 131072  ;;  %s10445_s17 = smov [#allocation6]  }
  0x69   : > { %p10350_p12 = scmp.ne.s32.totalorder %s10636_s9, %s10349_s8  ;;  %s10354_s18 = sshll.u32 %s10445_s17, 4  ;;  %s10355_s18 = int_to_ptr.vmem [resolvable:$false] %s10354_s18 }
  0x6a   : > { %s10356_s6 = scalar_lea.vmem %s10355_s18, 262144  ;;  %p10357_p13 = scmp.lt.s32.totalorder %s10636_s9, %s10355_s18 }
  0x6b   : > { %p10352_p0 = pnand %p10350_p12, %p10306_p11  ;;  %p10358_p3 = scmp.lt.s32.totalorder %s10356_s6, %s10349_s8 }
  0x6d   : > { %p10353_p2 = pneg %p10352_p0  ;;  %p10359_p10 = por %p10358_p3, %p10357_p13 }
  0x6f   : > { %p10360_p9 = pnand %p10359_p10, %p10353_p2 }
  0x71   : > { %10363 = shalt.err (!%p10360_p9)
}
  0x72   : > { %s10446_s26 = smov 512   ;;  %s10447_s10 = smov 32  }
  0x73   : > { %10202 = dma.hbm_to_vmem [thread:$0]  (!%p10600_p8), %s10642_s13, 131072, %s10636_s9, %s10644_s15, %s10446_s26, %s10446_s26, %s10447_s10  }
  0x74   : > { %p12148_p11 = scmp.ne.s32.totalorder %s12145_s24, 0 }
  0x75   : > { %s247_s11 = sand.u32 (!%p12148_p11), 1, %s10432_s19   ;;  %p12149_p7 = scmp.ne.s32.totalorder (!%p12148_p11), %s12144_s23, 0 }
  0x76   : > { %245 = sbr.rel (%p12148_p11) target bundleno = 1676 (0x68c), region = 40  ;;  %s8548_s12 = sshll.u32 (!%p12148_p11), %s247_s11, 7 }
  0x77   : > { %s248_s16 = scalar_lea.sflag (!%p12148_p11), [#allocation4], %s247_s11  ;;  %s10673_s14 = scalar_lea.vmem (!%p12148_p11), [#allocation3], %s8548_s12 }
  0x7d   : > { %10407 = dma.done.wait (%p12149_p7), %s248_s16, 2048  }
  0x7e   : > { %10409 = vsyncadd (%p12149_p7), %s248_s16, 4294965248  ;;  %s256_s28 = sand.u32 1, %s10499_s22   ;;  %s8549_s27 = sshll.u32 %s247_s11, 13 }
  0x7f   : > { %s257_s9 = scalar_lea.sflag [#allocation7], %s256_s28  ;;  %s10680_s13 = scalar_lea.vmem [#allocation6], %s8549_s27 }
  0x80   : > { %10411 = dma.done.wait (%p12149_p7), %s257_s9, 131072  }
  0x81   : > { %10413 = vsyncadd (%p12149_p7), %s257_s9, 4294836224  ;;  %p12150_p8 = scmp.eq.s32.totalorder %s10499_s22, 0 }
  0x83   : > { %10415 = dma.done.wait (%p12150_p8), [#allocation7], 128   ;;  %p12151_p1 = pmov %p12150_p8 }
  0x85   : > { %10417 = vsyncadd (%p12151_p1), [#allocation7], 4294967168  ;;  %p12152_p4 = pmov %p12151_p1 }
  0x86   : > { %p12153_p5 = pmov %p12151_p1 }
  0x87   : > { %10419 = dma.done.wait (%p12152_p4), [#allocation10], 16  }
  0x88   : > { %10421 = vsyncadd (%p12153_p5), [#allocation10], 4294967280  ;;  %p12154_p6 = scmp.ne.s32.totalorder %s10499_s22, 0 }
  0x89   : > { %v10448_v0 = vmov (!%p12154_p6), 0.0  }
  0x8a   : > { %300 = sbr.rel (%p12154_p6) target bundleno = 145 (0x91), region = 60  ;;  %301 = vst [vmem:[#allocation2] sm:$0xff] (!%p12154_p6), %v10448_v0  ;;  %302 = vst [vmem:[#allocation2 + $0x8] sm:$0xff] (!%p12154_p6), %v10448_v0 }
  0x8b   : > { %303 = vst [vmem:[#allocation2 + $0x10] sm:$0xff] (!%p12154_p6), %v10448_v0  ;;  %304 = vst [vmem:[#allocation2 + $0x18] sm:$0xff] (!%p12154_p6), %v10448_v0 }
  0x8c   : > { %305 = vst [vmem:[#allocation2 + $0x20] sm:$0xff] (!%p12154_p6), %v10448_v0  ;;  %306 = vst [vmem:[#allocation2 + $0x28] sm:$0xff] (!%p12154_p6), %v10448_v0 }
  0x8d   : > { %307 = vst [vmem:[#allocation2 + $0x30] sm:$0xff] (!%p12154_p6), %v10448_v0  ;;  %308 = vst [vmem:[#allocation2 + $0x38] sm:$0xff] (!%p12154_p6), %v10448_v0 }
  0x91 PF: > { %v349_v1 = vld [vmem:[%s10680_s13] sm:$0xff]  ;;  %v318_v54 = vld [vmem:[%s10673_s14 + $0x8] sm:$0xff]  ;;  %v320_v55 = vld [vmem:[%s10673_s14 + $0x18] sm:$0xff]  ;;  %p9577_p12 = scmp.ne.s32.totalorder %s10499_s22, 1 }
  0x92   : > { %v353_v2 = vld [vmem:[%s10680_s13 + $0x20] sm:$0xff]  ;;  %v10728_v59 = vpack.c.bf16 %v318_v54, %v318_v54  ;;  %v10730_v60 = vpack.c.bf16 %v320_v55, %v320_v55  ;;  %vm8434_vm0 = vcmask (!%p9577_p12), 97280  }
  0x93   : > { %v477_v3 = vld [vmem:[%s10680_s13 + $0x400] sm:$0xff]  ;;  %v8554_v4 = vcombine.high %v349_v1, %v353_v2  ;;  %v8553_v6 = vcombine.low %v349_v1, %v353_v2 }
  0x94   : > { %v481_v5 = vld [vmem:[%s10680_s13 + $0x420] sm:$0xff]  ;;  %6525 = vmatprep.mubr.bf16.mxu0 %v10728_v59  ;;  %6566 = vmatprep.mubr.bf16.mxu1 %v10730_v60 }
  0x95   : > { %v357_v7 = vld [vmem:[%s10680_s13 + $0x40] sm:$0xff]  ;;  %v8682_v9 = vcombine.high %v477_v3, %v481_v5  ;;  %v8681_v10 = vcombine.low %v477_v3, %v481_v5  ;;  %6493 = vmatprep.subr.bf16.mxu0 %v8554_v4 }
  0x96   : > { %v361_v8 = vld [vmem:[%s10680_s13 + $0x60] sm:$0xff]  ;;  %6494 = vmatpush1.bf16.msra.mxu0 %v8553_v6 }
  0x97   : > { %v8562_v11 = vcombine.high %v357_v7, %v361_v8  ;;  %v485_v12 = vld [vmem:[%s10680_s13 + $0x440] sm:$0xff]  ;;  %6534 = vmatprep.subr.bf16.mxu1 %v8682_v9  ;;  %v8561_v19 = vcombine.low %v357_v7, %v361_v8 }
  0x98   : > { %v489_v13 = vld [vmem:[%s10680_s13 + $0x460] sm:$0xff]  ;;  %6535 = vmatpush1.bf16.msra.mxu1 %v8681_v10 }
  0x99   : > { %v365_v14 = vld [vmem:[%s10680_s13 + $0x80] sm:$0xff]  ;;  %v8690_v15 = vcombine.high %v485_v12, %v489_v13  ;;  %6495 = vmatprep.subr.bf16.mxu0 %v8562_v11  ;;  %v8689_v20 = vcombine.low %v485_v12, %v489_v13 }
  0x9a   : > { %v369_v16 = vld [vmem:[%s10680_s13 + $0xa0] sm:$0xff]  ;;  %6496 = vmatpush1.bf16.msra.mxu0 %v8561_v19 }
  0x9b   : > { %v493_v17 = vld [vmem:[%s10680_s13 + $0x480] sm:$0xff]  ;;  %v8570_v21 = vcombine.high %v365_v14, %v369_v16  ;;  %6536 = vmatprep.subr.bf16.mxu1 %v8690_v15  ;;  %v8569_v27 = vcombine.low %v365_v14, %v369_v16 }
  0x9c   : > { %v497_v18 = vld [vmem:[%s10680_s13 + $0x4a0] sm:$0xff]  ;;  %6537 = vmatpush1.bf16.msra.mxu1 %v8689_v20 }
  0x9d   : > { %v8698_v22 = vcombine.high %v493_v17, %v497_v18  ;;  %v373_v23 = vld [vmem:[%s10680_s13 + $0xc0] sm:$0xff]  ;;  %6497 = vmatprep.subr.bf16.mxu0 %v8570_v21  ;;  %v8697_v28 = vcombine.low %v493_v17, %v497_v18 }
  0x9e   : > { %v377_v24 = vld [vmem:[%s10680_s13 + $0xe0] sm:$0xff]  ;;  %6498 = vmatpush1.bf16.msra.mxu0 %v8569_v27 }
  0x9f   : > { %v501_v25 = vld [vmem:[%s10680_s13 + $0x4c0] sm:$0xff]  ;;  %v8578_v29 = vcombine.high %v373_v23, %v377_v24  ;;  %6538 = vmatprep.subr.bf16.mxu1 %v8698_v22  ;;  %v8577_v35 = vcombine.low %v373_v23, %v377_v24 }
  0xa0   : > { %v505_v26 = vld [vmem:[%s10680_s13 + $0x4e0] sm:$0xff]  ;;  %6539 = vmatpush1.bf16.msra.mxu1 %v8697_v28 }
  0xa1   : > { %v8706_v30 = vcombine.high %v501_v25, %v505_v26  ;;  %v381_v31 = vld [vmem:[%s10680_s13 + $0x100] sm:$0xff]  ;;  %6499 = vmatprep.subr.bf16.mxu0 %v8578_v29  ;;  %v8705_v36 = vcombine.low %v501_v25, %v505_v26 }
  0xa2   : > { %v385_v32 = vld [vmem:[%s10680_s13 + $0x120] sm:$0xff]  ;;  %6500 = vmatpush1.bf16.msra.mxu0 %v8577_v35 }
  0xa3   : > { %v509_v33 = vld [vmem:[%s10680_s13 + $0x500] sm:$0xff]  ;;  %v8586_v37 = vcombine.high %v381_v31, %v385_v32  ;;  %6540 = vmatprep.subr.bf16.mxu1 %v8706_v30  ;;  %v8585_v43 = vcombine.low %v381_v31, %v385_v32 }
  0xa4   : > { %v513_v34 = vld [vmem:[%s10680_s13 + $0x520] sm:$0xff]  ;;  %6541 = vmatpush1.bf16.msra.mxu1 %v8705_v36 }
  0xa5   : > { %v8714_v38 = vcombine.high %v509_v33, %v513_v34  ;;  %v389_v39 = vld [vmem:[%s10680_s13 + $0x140] sm:$0xff]  ;;  %6501 = vmatprep.subr.bf16.mxu0 %v8586_v37  ;;  %v8713_v44 = vcombine.low %v509_v33, %v513_v34 }
  0xa6   : > { %v393_v40 = vld [vmem:[%s10680_s13 + $0x160] sm:$0xff]  ;;  %6502 = vmatpush1.bf16.msra.mxu0 %v8585_v43 }
  0xa7   : > { %v517_v41 = vld [vmem:[%s10680_s13 + $0x540] sm:$0xff]  ;;  %v8594_v45 = vcombine.high %v389_v39, %v393_v40  ;;  %6542 = vmatprep.subr.bf16.mxu1 %v8714_v38  ;;  %v8593_v51 = vcombine.low %v389_v39, %v393_v40 }
  0xa8   : > { %v521_v42 = vld [vmem:[%s10680_s13 + $0x560] sm:$0xff]  ;;  %6543 = vmatpush1.bf16.msra.mxu1 %v8713_v44 }
  0xa9   : > { %v8722_v46 = vcombine.high %v517_v41, %v521_v42  ;;  %v397_v47 = vld [vmem:[%s10680_s13 + $0x180] sm:$0xff]  ;;  %6503 = vmatprep.subr.bf16.mxu0 %v8594_v45  ;;  %v8721_v52 = vcombine.low %v517_v41, %v521_v42 }
  0xaa   : > { %v401_v48 = vld [vmem:[%s10680_s13 + $0x1a0] sm:$0xff]  ;;  %6504 = vmatpush1.bf16.msra.mxu0 %v8593_v51 }
  0xab   : > { %v525_v49 = vld [vmem:[%s10680_s13 + $0x580] sm:$0xff]  ;;  %v8602_v53 = vcombine.high %v397_v47, %v401_v48  ;;  %6544 = vmatprep.subr.bf16.mxu1 %v8722_v46  ;;  %v8601_v63 = vcombine.low %v397_v47, %v401_v48 }
  0xac   : > { %v529_v50 = vld [vmem:[%s10680_s13 + $0x5a0] sm:$0xff]  ;;  %6545 = vmatpush1.bf16.msra.mxu1 %v8721_v52 }
  0xad   : > { %v8730_v56 = vcombine.high %v525_v49, %v529_v50  ;;  %v405_v57 = vld [vmem:[%s10680_s13 + $0x1c0] sm:$0xff]  ;;  %6505 = vmatprep.subr.bf16.mxu0 %v8602_v53  ;;  %v8729_v0 = vcombine.low %v525_v49, %v529_v50 }
  0xae   : > { %v409_v58 = vld [vmem:[%s10680_s13 + $0x1e0] sm:$0xff]  ;;  %6506 = vmatpush1.bf16.msra.mxu0 %v8601_v63 }
  0xaf   : > { %v533_v61 = vld [vmem:[%s10680_s13 + $0x5c0] sm:$0xff]  ;;  %v8610_v1 = vcombine.high %v405_v57, %v409_v58  ;;  %6546 = vmatprep.subr.bf16.mxu1 %v8730_v56  ;;  %v8609_v7 = vcombine.low %v405_v57, %v409_v58 }
  0xb0   : > { %v537_v62 = vld [vmem:[%s10680_s13 + $0x5e0] sm:$0xff]  ;;  %6547 = vmatpush1.bf16.msra.mxu1 %v8729_v0 }
  0xb1   : > { %v8738_v2 = vcombine.high %v533_v61, %v537_v62  ;;  %v413_v3 = vld [vmem:[%s10680_s13 + $0x200] sm:$0xff]  ;;  %6507 = vmatprep.subr.bf16.mxu0 %v8610_v1  ;;  %v8737_v8 = vcombine.low %v533_v61, %v537_v62 }
  0xb2   : > { %v417_v4 = vld [vmem:[%s10680_s13 + $0x220] sm:$0xff]  ;;  %6508 = vmatpush1.bf16.msra.mxu0 %v8609_v7 }
  0xb3   : > { %v541_v5 = vld [vmem:[%s10680_s13 + $0x600] sm:$0xff]  ;;  %v8618_v9 = vcombine.high %v413_v3, %v417_v4  ;;  %6548 = vmatprep.subr.bf16.mxu1 %v8738_v2  ;;  %v8617_v15 = vcombine.low %v413_v3, %v417_v4 }
  0xb4   : > { %v545_v6 = vld [vmem:[%s10680_s13 + $0x620] sm:$0xff]  ;;  %6549 = vmatpush1.bf16.msra.mxu1 %v8737_v8 }
  0xb5   : > { %v8746_v10 = vcombine.high %v541_v5, %v545_v6  ;;  %v421_v11 = vld [vmem:[%s10680_s13 + $0x240] sm:$0xff]  ;;  %6509 = vmatprep.subr.bf16.mxu0 %v8618_v9  ;;  %v8745_v16 = vcombine.low %v541_v5, %v545_v6 }
  0xb6   : > { %v425_v12 = vld [vmem:[%s10680_s13 + $0x260] sm:$0xff]  ;;  %6510 = vmatpush1.bf16.msra.mxu0 %v8617_v15 }
  0xb7   : > { %v549_v13 = vld [vmem:[%s10680_s13 + $0x640] sm:$0xff]  ;;  %v8626_v17 = vcombine.high %v421_v11, %v425_v12  ;;  %6550 = vmatprep.subr.bf16.mxu1 %v8746_v10  ;;  %v8625_v23 = vcombine.low %v421_v11, %v425_v12  ;;  %v319_v12 = vld [vmem:[%s10673_s14 + $0x10] sm:$0xff] }
  0xb8   : > { %v553_v14 = vld [vmem:[%s10680_s13 + $0x660] sm:$0xff]  ;;  %6551 = vmatpush1.bf16.msra.mxu1 %v8745_v16 }
  0xb9   : > { %v8754_v18 = vcombine.high %v549_v13, %v553_v14  ;;  %v429_v19 = vld [vmem:[%s10680_s13 + $0x280] sm:$0xff]  ;;  %6511 = vmatprep.subr.bf16.mxu0 %v8626_v17  ;;  %v8753_v24 = vcombine.low %v549_v13, %v553_v14 }
  0xba   : > { %v433_v20 = vld [vmem:[%s10680_s13 + $0x2a0] sm:$0xff]  ;;  %6512 = vmatpush1.bf16.msra.mxu0 %v8625_v23  ;;  %v324_v23 = vld [vmem:[%s10673_s14 + $0x38] sm:$0xff] }
  0xbb   : > { %v557_v21 = vld [vmem:[%s10680_s13 + $0x680] sm:$0xff]  ;;  %v8634_v25 = vcombine.high %v429_v19, %v433_v20  ;;  %6552 = vmatprep.subr.bf16.mxu1 %v8754_v18  ;;  %v8633_v31 = vcombine.low %v429_v19, %v433_v20  ;;  %v322_v20 = vld [vmem:[%s10673_s14 + $0x28] sm:$0xff] }
  0xbc   : > { %v561_v22 = vld [vmem:[%s10680_s13 + $0x6a0] sm:$0xff]  ;;  %6553 = vmatpush1.bf16.msra.mxu1 %v8753_v24 }
  0xbd   : > { %v8762_v26 = vcombine.high %v557_v21, %v561_v22  ;;  %v437_v27 = vld [vmem:[%s10680_s13 + $0x2c0] sm:$0xff]  ;;  %6513 = vmatprep.subr.bf16.mxu0 %v8634_v25  ;;  %v8761_v32 = vcombine.low %v557_v21, %v561_v22  ;;  %v10781_v21 = vpack.c.bf16 %v319_v12, %v319_v12 }
  0xbe   : > { %v441_v28 = vld [vmem:[%s10680_s13 + $0x2e0] sm:$0xff]  ;;  %6514 = vmatpush1.bf16.msra.mxu0 %v8633_v31 }
  0xbf   : > { %v565_v29 = vld [vmem:[%s10680_s13 + $0x6c0] sm:$0xff]  ;;  %v8642_v33 = vcombine.high %v437_v27, %v441_v28  ;;  %6554 = vmatprep.subr.bf16.mxu1 %v8762_v26  ;;  %v8641_v39 = vcombine.low %v437_v27, %v441_v28 }
  0xc0   : > { %v569_v30 = vld [vmem:[%s10680_s13 + $0x6e0] sm:$0xff]  ;;  %6555 = vmatpush1.bf16.msra.mxu1 %v8761_v32  ;;  %v10791_v32 = vpack.c.bf16 %v324_v23, %v324_v23 }
  0xc1   : > { %v8770_v34 = vcombine.high %v565_v29, %v569_v30  ;;  %v445_v35 = vld [vmem:[%s10680_s13 + $0x300] sm:$0xff]  ;;  %6515 = vmatprep.subr.bf16.mxu0 %v8642_v33  ;;  %v8769_v40 = vcombine.low %v565_v29, %v569_v30  ;;  %v10786_v29 = vpack.c.bf16 %v322_v20, %v322_v20 }
  0xc2   : > { %v449_v36 = vld [vmem:[%s10680_s13 + $0x320] sm:$0xff]  ;;  %6516 = vmatpush1.bf16.msra.mxu0 %v8641_v39 }
  0xc3   : > { %v573_v37 = vld [vmem:[%s10680_s13 + $0x700] sm:$0xff]  ;;  %v8650_v41 = vcombine.high %v445_v35, %v449_v36  ;;  %6556 = vmatprep.subr.bf16.mxu1 %v8770_v34  ;;  %v8649_v47 = vcombine.low %v445_v35, %v449_v36 }
  0xc4   : > { %v577_v38 = vld [vmem:[%s10680_s13 + $0x720] sm:$0xff]  ;;  %6557 = vmatpush1.bf16.msra.mxu1 %v8769_v40 }
  0xc5   : > { %v8778_v42 = vcombine.high %v573_v37, %v577_v38  ;;  %v453_v43 = vld [vmem:[%s10680_s13 + $0x340] sm:$0xff]  ;;  %6517 = vmatprep.subr.bf16.mxu0 %v8650_v41  ;;  %v8777_v48 = vcombine.low %v573_v37, %v577_v38 }
  0xc6   : > { %v457_v44 = vld [vmem:[%s10680_s13 + $0x360] sm:$0xff]  ;;  %6518 = vmatpush1.bf16.msra.mxu0 %v8649_v47 }
  0xc7   : > { %v581_v45 = vld [vmem:[%s10680_s13 + $0x740] sm:$0xff]  ;;  %v8658_v49 = vcombine.high %v453_v43, %v457_v44  ;;  %6558 = vmatprep.subr.bf16.mxu1 %v8778_v42  ;;  %v8657_v55 = vcombine.low %v453_v43, %v457_v44 }
  0xc8   : > { %v585_v46 = vld [vmem:[%s10680_s13 + $0x760] sm:$0xff]  ;;  %6559 = vmatpush1.bf16.msra.mxu1 %v8777_v48 }
  0xc9   : > { %v8786_v50 = vcombine.high %v581_v45, %v585_v46  ;;  %v461_v51 = vld [vmem:[%s10680_s13 + $0x380] sm:$0xff]  ;;  %6519 = vmatprep.subr.bf16.mxu0 %v8658_v49  ;;  %v8785_v56 = vcombine.low %v581_v45, %v585_v46 }
  0xca   : > { %v465_v52 = vld [vmem:[%s10680_s13 + $0x3a0] sm:$0xff]  ;;  %6520 = vmatpush1.bf16.msra.mxu0 %v8657_v55 }
  0xcb   : > { %v589_v53 = vld [vmem:[%s10680_s13 + $0x780] sm:$0xff]  ;;  %v8666_v57 = vcombine.high %v461_v51, %v465_v52  ;;  %6560 = vmatprep.subr.bf16.mxu1 %v8786_v50  ;;  %v8665_v1 = vcombine.low %v461_v51, %v465_v52 }
  0xcc   : > { %v593_v54 = vld [vmem:[%s10680_s13 + $0x7a0] sm:$0xff]  ;;  %6561 = vmatpush1.bf16.msra.mxu1 %v8785_v56 }
  0xcd   : > { %v8794_v58 = vcombine.high %v589_v53, %v593_v54  ;;  %v469_v61 = vld [vmem:[%s10680_s13 + $0x3c0] sm:$0xff]  ;;  %6521 = vmatprep.subr.bf16.mxu0 %v8666_v57  ;;  %v8793_v2 = vcombine.low %v589_v53, %v593_v54 }
  0xce   : > { %v473_v62 = vld [vmem:[%s10680_s13 + $0x3e0] sm:$0xff]  ;;  %6522 = vmatpush1.bf16.msra.mxu0 %v8665_v1 }
  0xcf   : > { %v597_v63 = vld [vmem:[%s10680_s13 + $0x7c0] sm:$0xff]  ;;  %v8674_v3 = vcombine.high %v469_v61, %v473_v62  ;;  %6562 = vmatprep.subr.bf16.mxu1 %v8794_v58  ;;  %v8673_v9 = vcombine.low %v469_v61, %v473_v62 }
  0xd0   : > { %v601_v0 = vld [vmem:[%s10680_s13 + $0x7e0] sm:$0xff]  ;;  %6563 = vmatpush1.bf16.msra.mxu1 %v8793_v2 }
  0xd1   : > { %v8802_v4 = vcombine.high %v597_v63, %v601_v0  ;;  %v605_v5 = vld [vmem:[%s10680_s13 + $0x800] sm:$0xff]  ;;  %6523 = vmatprep.subr.bf16.mxu0 %v8674_v3  ;;  %v8801_v11 = vcombine.low %v597_v63, %v601_v0 }
  0xd2   : > { %v609_v6 = vld [vmem:[%s10680_s13 + $0x820] sm:$0xff]  ;;  %6524 = vmatpush1.bf16.msra.mxu0 %v8673_v9 }
  0xd3   : > { %v733_v7 = vld [vmem:[%s10680_s13 + $0xc00] sm:$0xff]  ;;  %v8810_v13 = vcombine.high %v605_v5, %v609_v6  ;;  %6564 = vmatprep.subr.bf16.mxu1 %v8802_v4  ;;  %v8809_v22 = vcombine.low %v605_v5, %v609_v6 }
  0xd4   : > { %v737_v8 = vld [vmem:[%s10680_s13 + $0xc20] sm:$0xff]  ;;  %6565 = vmatpush1.bf16.msra.mxu1 %v8801_v11 }
  0xd5   : > { %v317_v10 = vld [vmem:[%s10673_s14] sm:$0xff]  ;;  %v8938_v14 = vcombine.high %v733_v7, %v737_v8  ;;  %6575 = vmatprep.subr.bf16.mxu0 %v8810_v13  ;;  %v8937_v24 = vcombine.low %v733_v7, %v737_v8 }
  0xd6   : > { %v613_v15 = vld [vmem:[%s10680_s13 + $0x840] sm:$0xff]  ;;  %v10776_v17 = vpack.c.bf16 %v317_v10, %v317_v10 }
  0xd7   : > { %v617_v16 = vld [vmem:[%s10680_s13 + $0x860] sm:$0xff]  ;;  %6616 = vmatprep.subr.bf16.mxu1 %v8938_v14  ;;  %6567 = vmatmul.mubr.bf16.vlgmr.msra.gmra.mrb[0].mxu1 %v10781_v21 }
  0xd8   : > { %v741_v18 = vld [vmem:[%s10680_s13 + $0xc40] sm:$0xff]  ;;  %v8818_v25 = vcombine.high %v613_v15, %v617_v16  ;;  %6526 = vmatmul.mubr.bf16.vlgmr.msra.gmra.mrb[0].mxu0 %v10776_v17  ;;  %v8817_v33 = vcombine.low %v613_v15, %v617_v16  ;;  %6617 = vmatpush1.bf16.msra.mxu1 %v8937_v24 }
  0xd9   : > { %v745_v19 = vld [vmem:[%s10680_s13 + $0xc60] sm:$0xff]  ;;  %6576 = vmatpush1.bf16.msra.mxu0 %v8809_v22  ;;  %6607 = vmatprep.mubr.bf16.mxu0 %v10786_v29 }
  0xda   : > { %v8946_v26 = vcombine.high %v741_v18, %v745_v19  ;;  %v621_v27 = vld [vmem:[%s10680_s13 + $0x880] sm:$0xff]  ;;  %6577 = vmatprep.subr.bf16.mxu0 %v8818_v25  ;;  %v8945_v34 = vcombine.low %v741_v18, %v745_v19  ;;  %6648 = vmatprep.mubr.bf16.mxu1 %v10791_v32 }
  0xdb   : > { %v625_v28 = vld [vmem:[%s10680_s13 + $0x8a0] sm:$0xff] }
  0xdc   : > { %v749_v30 = vld [vmem:[%s10680_s13 + $0xc80] sm:$0xff]  ;;  %v8826_v35 = vcombine.high %v621_v27, %v625_v28  ;;  %6618 = vmatprep.subr.bf16.mxu1 %v8946_v26  ;;  %v8825_v41 = vcombine.low %v621_v27, %v625_v28 }
  0xdd   : > { %v753_v31 = vld [vmem:[%s10680_s13 + $0xca0] sm:$0xff]  ;;  %6578 = vmatpush1.bf16.msra.mxu0 %v8817_v33  ;;  %6619 = vmatpush1.bf16.msra.mxu1 %v8945_v34 }
  0xde   : > { %v8954_v36 = vcombine.high %v749_v30, %v753_v31  ;;  %v629_v37 = vld [vmem:[%s10680_s13 + $0x8c0] sm:$0xff]  ;;  %6579 = vmatprep.subr.bf16.mxu0 %v8826_v35  ;;  %v8953_v42 = vcombine.low %v749_v30, %v753_v31 }
  0xdf   : > { %v633_v38 = vld [vmem:[%s10680_s13 + $0x8e0] sm:$0xff] }
  0xe0   : > { %v757_v39 = vld [vmem:[%s10680_s13 + $0xcc0] sm:$0xff]  ;;  %v8834_v43 = vcombine.high %v629_v37, %v633_v38  ;;  %6620 = vmatprep.subr.bf16.mxu1 %v8954_v36  ;;  %v8833_v49 = vcombine.low %v629_v37, %v633_v38 }
  0xe1   : > { %v761_v40 = vld [vmem:[%s10680_s13 + $0xce0] sm:$0xff]  ;;  %6580 = vmatpush1.bf16.msra.mxu0 %v8825_v41  ;;  %6621 = vmatpush1.bf16.msra.mxu1 %v8953_v42 }
  0xe2   : > { %v8962_v44 = vcombine.high %v757_v39, %v761_v40  ;;  %v637_v45 = vld [vmem:[%s10680_s13 + $0x900] sm:$0xff]  ;;  %6581 = vmatprep.subr.bf16.mxu0 %v8834_v43  ;;  %v8961_v50 = vcombine.low %v757_v39, %v761_v40 }
  0xe3   : > { %v641_v46 = vld [vmem:[%s10680_s13 + $0x920] sm:$0xff] }
  0xe4   : > { %v765_v47 = vld [vmem:[%s10680_s13 + $0xd00] sm:$0xff]  ;;  %v8842_v51 = vcombine.high %v637_v45, %v641_v46  ;;  %6622 = vmatprep.subr.bf16.mxu1 %v8962_v44  ;;  %v8841_v57 = vcombine.low %v637_v45, %v641_v46 }
  0xe5   : > { %v769_v48 = vld [vmem:[%s10680_s13 + $0xd20] sm:$0xff]  ;;  %6582 = vmatpush1.bf16.msra.mxu0 %v8833_v49  ;;  %6623 = vmatpush1.bf16.msra.mxu1 %v8961_v50 }
  0xe6   : > { %v8970_v52 = vcombine.high %v765_v47, %v769_v48  ;;  %v645_v53 = vld [vmem:[%s10680_s13 + $0x940] sm:$0xff]  ;;  %6583 = vmatprep.subr.bf16.mxu0 %v8842_v51  ;;  %v8969_v58 = vcombine.low %v765_v47, %v769_v48 }
  0xe7   : > { %v649_v54 = vld [vmem:[%s10680_s13 + $0x960] sm:$0xff] }
  0xe8   : > { %v773_v55 = vld [vmem:[%s10680_s13 + $0xd40] sm:$0xff]  ;;  %v8850_v61 = vcombine.high %v645_v53, %v649_v54  ;;  %6624 = vmatprep.subr.bf16.mxu1 %v8970_v52  ;;  %v8849_v3 = vcombine.low %v645_v53, %v649_v54 }
  0xe9   : > { %v777_v56 = vld [vmem:[%s10680_s13 + $0xd60] sm:$0xff]  ;;  %6584 = vmatpush1.bf16.msra.mxu0 %v8841_v57  ;;  %6625 = vmatpush1.bf16.msra.mxu1 %v8969_v58 }
  0xea   : > { %v8978_v62 = vcombine.high %v773_v55, %v777_v56  ;;  %v653_v63 = vld [vmem:[%s10680_s13 + $0x980] sm:$0xff]  ;;  %6585 = vmatprep.subr.bf16.mxu0 %v8850_v61  ;;  %v8977_v4 = vcombine.low %v773_v55, %v777_v56 }
  0xeb   : > { %v657_v0 = vld [vmem:[%s10680_s13 + $0x9a0] sm:$0xff] }
  0xec   : > { %v781_v1 = vld [vmem:[%s10680_s13 + $0xd80] sm:$0xff]  ;;  %v8858_v5 = vcombine.high %v653_v63, %v657_v0  ;;  %6626 = vmatprep.subr.bf16.mxu1 %v8978_v62  ;;  %v8857_v11 = vcombine.low %v653_v63, %v657_v0 }
  0xed   : > { %v785_v2 = vld [vmem:[%s10680_s13 + $0xda0] sm:$0xff]  ;;  %6586 = vmatpush1.bf16.msra.mxu0 %v8849_v3  ;;  %6627 = vmatpush1.bf16.msra.mxu1 %v8977_v4 }
  0xee   : > { %v8986_v6 = vcombine.high %v781_v1, %v785_v2  ;;  %v661_v7 = vld [vmem:[%s10680_s13 + $0x9c0] sm:$0xff]  ;;  %6587 = vmatprep.subr.bf16.mxu0 %v8858_v5  ;;  %v8985_v12 = vcombine.low %v781_v1, %v785_v2 }
  0xef   : > { %v665_v8 = vld [vmem:[%s10680_s13 + $0x9e0] sm:$0xff] }
  0xf0   : > { %v789_v9 = vld [vmem:[%s10680_s13 + $0xdc0] sm:$0xff]  ;;  %v8866_v13 = vcombine.high %v661_v7, %v665_v8  ;;  %6628 = vmatprep.subr.bf16.mxu1 %v8986_v6  ;;  %v8865_v20 = vcombine.low %v661_v7, %v665_v8 }
  0xf1   : > { %v793_v10 = vld [vmem:[%s10680_s13 + $0xde0] sm:$0xff]  ;;  %6588 = vmatpush1.bf16.msra.mxu0 %v8857_v11  ;;  %6629 = vmatpush1.bf16.msra.mxu1 %v8985_v12 }
  0xf2   : > { %v8994_v14 = vcombine.high %v789_v9, %v793_v10  ;;  %v669_v15 = vld [vmem:[%s10680_s13 + $0xa00] sm:$0xff]  ;;  %6589 = vmatprep.subr.bf16.mxu0 %v8866_v13  ;;  %v8993_v22 = vcombine.low %v789_v9, %v793_v10 }
  0xf3   : > { %v673_v16 = vld [vmem:[%s10680_s13 + $0xa20] sm:$0xff] }
  0xf4   : > { %v797_v18 = vld [vmem:[%s10680_s13 + $0xe00] sm:$0xff]  ;;  %v8874_v23 = vcombine.high %v669_v15, %v673_v16  ;;  %6630 = vmatprep.subr.bf16.mxu1 %v8994_v14  ;;  %v8873_v30 = vcombine.low %v669_v15, %v673_v16 }
  0xf5   : > { %v801_v19 = vld [vmem:[%s10680_s13 + $0xe20] sm:$0xff]  ;;  %6590 = vmatpush1.bf16.msra.mxu0 %v8865_v20  ;;  %6631 = vmatpush1.bf16.msra.mxu1 %v8993_v22 }
  0xf6   : > { %v9002_v24 = vcombine.high %v797_v18, %v801_v19  ;;  %v677_v25 = vld [vmem:[%s10680_s13 + $0xa40] sm:$0xff]  ;;  %6591 = vmatprep.subr.bf16.mxu0 %v8874_v23  ;;  %v9001_v31 = vcombine.low %v797_v18, %v801_v19 }
  0xf7   : > { %v681_v26 = vld [vmem:[%s10680_s13 + $0xa60] sm:$0xff] }
  0xf8   : > { %v805_v27 = vld [vmem:[%s10680_s13 + $0xe40] sm:$0xff]  ;;  %v8882_v33 = vcombine.high %v677_v25, %v681_v26  ;;  %6632 = vmatprep.subr.bf16.mxu1 %v9002_v24  ;;  %v8881_v39 = vcombine.low %v677_v25, %v681_v26 }
  0xf9   : > { %v809_v28 = vld [vmem:[%s10680_s13 + $0xe60] sm:$0xff]  ;;  %6592 = vmatpush1.bf16.msra.mxu0 %v8873_v30  ;;  %6633 = vmatpush1.bf16.msra.mxu1 %v9001_v31  ;;  %v323_v31 = vld [vmem:[%s10673_s14 + $0x30] sm:$0xff] }
  0xfa   : > { %v9010_v34 = vcombine.high %v805_v27, %v809_v28  ;;  %v685_v35 = vld [vmem:[%s10680_s13 + $0xa80] sm:$0xff]  ;;  %6593 = vmatprep.subr.bf16.mxu0 %v8882_v33  ;;  %v9009_v40 = vcombine.low %v805_v27, %v809_v28 }
  0xfb   : > { %v689_v36 = vld [vmem:[%s10680_s13 + $0xaa0] sm:$0xff] }
  0xfc   : > { %v813_v37 = vld [vmem:[%s10680_s13 + $0xe80] sm:$0xff]  ;;  %v8890_v41 = vcombine.high %v685_v35, %v689_v36  ;;  %6634 = vmatprep.subr.bf16.mxu1 %v9010_v34  ;;  %v8889_v47 = vcombine.low %v685_v35, %v689_v36 }
  0xfd   : > { %v817_v38 = vld [vmem:[%s10680_s13 + $0xea0] sm:$0xff]  ;;  %6594 = vmatpush1.bf16.msra.mxu0 %v8881_v39  ;;  %6635 = vmatpush1.bf16.msra.mxu1 %v9009_v40  ;;  %v326_v40 = vld [vmem:[%s10673_s14 + $0x48] sm:$0xff] }
  0xfe   : > { %v9018_v42 = vcombine.high %v813_v37, %v817_v38  ;;  %v693_v43 = vld [vmem:[%s10680_s13 + $0xac0] sm:$0xff]  ;;  %6595 = vmatprep.subr.bf16.mxu0 %v8890_v41  ;;  %v9017_v48 = vcombine.low %v813_v37, %v817_v38  ;;  %v10861_v41 = vpack.c.bf16 %v323_v31, %v323_v31 }
  0xff   : > { %v697_v44 = vld [vmem:[%s10680_s13 + $0xae0] sm:$0xff] }
 0x100   : > { %v821_v45 = vld [vmem:[%s10680_s13 + $0xec0] sm:$0xff]  ;;  %v8898_v49 = vcombine.high %v693_v43, %v697_v44  ;;  %6636 = vmatprep.subr.bf16.mxu1 %v9018_v42  ;;  %v8897_v55 = vcombine.low %v693_v43, %v697_v44  ;;  %v328_v43 = vld [vmem:[%s10673_s14 + $0x58] sm:$0xff] }
 0x101   : > { %v825_v46 = vld [vmem:[%s10680_s13 + $0xee0] sm:$0xff]  ;;  %6596 = vmatpush1.bf16.msra.mxu0 %v8889_v47  ;;  %6637 = vmatpush1.bf16.msra.mxu1 %v9017_v48 }
 0x102   : > { %v9026_v50 = vcombine.high %v821_v45, %v825_v46  ;;  %v701_v51 = vld [vmem:[%s10680_s13 + $0xb00] sm:$0xff]  ;;  %6597 = vmatprep.subr.bf16.mxu0 %v8898_v49  ;;  %v9025_v56 = vcombine.low %v821_v45, %v825_v46  ;;  %v10866_v49 = vpack.c.bf16 %v326_v40, %v326_v40 }
 0x103   : > { %v705_v52 = vld [vmem:[%s10680_s13 + $0xb20] sm:$0xff] }
 0x104   : > { %v829_v53 = vld [vmem:[%s10680_s13 + $0xf00] sm:$0xff]  ;;  %v8906_v57 = vcombine.high %v701_v51, %v705_v52  ;;  %6638 = vmatprep.subr.bf16.mxu1 %v9026_v50  ;;  %v8905_v1 = vcombine.low %v701_v51, %v705_v52  ;;  %v10871_v52 = vpack.c.bf16 %v328_v43, %v328_v43 }
 0x105   : > { %v833_v54 = vld [vmem:[%s10680_s13 + $0xf20] sm:$0xff]  ;;  %6598 = vmatpush1.bf16.msra.mxu0 %v8897_v55  ;;  %6639 = vmatpush1.bf16.msra.mxu1 %v9025_v56 }
 0x106   : > { %v9034_v58 = vcombine.high %v829_v53, %v833_v54  ;;  %v709_v61 = vld [vmem:[%s10680_s13 + $0xb40] sm:$0xff]  ;;  %6599 = vmatprep.subr.bf16.mxu0 %v8906_v57  ;;  %v9033_v2 = vcombine.low %v829_v53, %v833_v54 }
 0x107   : > { %v713_v62 = vld [vmem:[%s10680_s13 + $0xb60] sm:$0xff] }
 0x108   : > { %v837_v63 = vld [vmem:[%s10680_s13 + $0xf40] sm:$0xff]  ;;  %v8914_v3 = vcombine.high %v709_v61, %v713_v62  ;;  %6640 = vmatprep.subr.bf16.mxu1 %v9034_v58  ;;  %v8913_v9 = vcombine.low %v709_v61, %v713_v62 }
 0x109   : > { %v841_v0 = vld [vmem:[%s10680_s13 + $0xf60] sm:$0xff]  ;;  %6600 = vmatpush1.bf16.msra.mxu0 %v8905_v1  ;;  %6641 = vmatpush1.bf16.msra.mxu1 %v9033_v2 }
 0x10a   : > { %v9042_v4 = vcombine.high %v837_v63, %v841_v0  ;;  %v717_v5 = vld [vmem:[%s10680_s13 + $0xb80] sm:$0xff]  ;;  %6601 = vmatprep.subr.bf16.mxu0 %v8914_v3  ;;  %v9041_v10 = vcombine.low %v837_v63, %v841_v0 }
 0x10b   : > { %v721_v6 = vld [vmem:[%s10680_s13 + $0xba0] sm:$0xff] }
 0x10c   : > { %v845_v7 = vld [vmem:[%s10680_s13 + $0xf80] sm:$0xff]  ;;  %v8922_v11 = vcombine.high %v717_v5, %v721_v6  ;;  %6642 = vmatprep.subr.bf16.mxu1 %v9042_v4  ;;  %v8921_v18 = vcombine.low %v717_v5, %v721_v6 }
 0x10d   : > { %v849_v8 = vld [vmem:[%s10680_s13 + $0xfa0] sm:$0xff]  ;;  %6602 = vmatpush1.bf16.msra.mxu0 %v8913_v9  ;;  %6643 = vmatpush1.bf16.msra.mxu1 %v9041_v10 }
 0x10e   : > { %v9050_v12 = vcombine.high %v845_v7, %v849_v8  ;;  %v725_v13 = vld [vmem:[%s10680_s13 + $0xbc0] sm:$0xff]  ;;  %6603 = vmatprep.subr.bf16.mxu0 %v8922_v11  ;;  %v9049_v19 = vcombine.low %v845_v7, %v849_v8 }
 0x10f   : > { %v729_v14 = vld [vmem:[%s10680_s13 + $0xbe0] sm:$0xff] }
 0x110   : > { %v853_v15 = vld [vmem:[%s10680_s13 + $0xfc0] sm:$0xff]  ;;  %v8930_v20 = vcombine.high %v725_v13, %v729_v14  ;;  %6644 = vmatprep.subr.bf16.mxu1 %v9050_v12  ;;  %v8929_v27 = vcombine.low %v725_v13, %v729_v14 }
 0x111   : > { %v857_v16 = vld [vmem:[%s10680_s13 + $0xfe0] sm:$0xff]  ;;  %6604 = vmatpush1.bf16.msra.mxu0 %v8921_v18  ;;  %6645 = vmatpush1.bf16.msra.mxu1 %v9049_v19 }
 0x112   : > { %v9058_v22 = vcombine.high %v853_v15, %v857_v16  ;;  %v861_v23 = vld [vmem:[%s10680_s13 + $0x1000] sm:$0xff]  ;;  %6605 = vmatprep.subr.bf16.mxu0 %v8930_v20  ;;  %v9057_v30 = vcombine.low %v853_v15, %v857_v16 }
 0x113   : > { %v865_v24 = vld [vmem:[%s10680_s13 + $0x1020] sm:$0xff] }
 0x114   : > { %v989_v25 = vld [vmem:[%s10680_s13 + $0x1400] sm:$0xff]  ;;  %v9066_v33 = vcombine.high %v861_v23, %v865_v24  ;;  %6646 = vmatprep.subr.bf16.mxu1 %v9058_v22  ;;  %v9065_v42 = vcombine.low %v861_v23, %v865_v24 }
 0x115   : > { %v993_v26 = vld [vmem:[%s10680_s13 + $0x1420] sm:$0xff]  ;;  %6606 = vmatpush1.bf16.msra.mxu0 %v8929_v27  ;;  %6647 = vmatpush1.bf16.msra.mxu1 %v9057_v30 }
 0x116   : > { %v321_v28 = vld [vmem:[%s10673_s14 + $0x20] sm:$0xff]  ;;  %v9194_v34 = vcombine.high %v989_v25, %v993_v26  ;;  %6657 = vmatprep.subr.bf16.mxu0 %v9066_v33  ;;  %v9193_v44 = vcombine.low %v989_v25, %v993_v26 }
 0x117   : > { %v869_v35 = vld [vmem:[%s10680_s13 + $0x1040] sm:$0xff]  ;;  %v10856_v37 = vpack.c.bf16 %v321_v28, %v321_v28 }
 0x118   : > { %v873_v36 = vld [vmem:[%s10680_s13 + $0x1060] sm:$0xff]  ;;  %6698 = vmatprep.subr.bf16.mxu1 %v9194_v34  ;;  %6649 = vmatmul.mubr.bf16.vlgmr.msra.gmra.mrb[4].mxu1 %v10861_v41 }
 0x119   : > { %v997_v38 = vld [vmem:[%s10680_s13 + $0x1440] sm:$0xff]  ;;  %v9074_v45 = vcombine.high %v869_v35, %v873_v36  ;;  %6608 = vmatmul.mubr.bf16.vlgmr.msra.gmra.mrb[4].mxu0 %v10856_v37  ;;  %v9073_v53 = vcombine.low %v869_v35, %v873_v36  ;;  %6699 = vmatpush1.bf16.msra.mxu1 %v9193_v44 }
 0x11a   : > { %v1001_v39 = vld [vmem:[%s10680_s13 + $0x1460] sm:$0xff]  ;;  %6658 = vmatpush1.bf16.msra.mxu0 %v9065_v42  ;;  %6689 = vmatprep.mubr.bf16.mxu0 %v10866_v49 }
 0x11b   : > { %v9202_v46 = vcombine.high %v997_v38, %v1001_v39  ;;  %v877_v47 = vld [vmem:[%s10680_s13 + $0x1080] sm:$0xff]  ;;  %6659 = vmatprep.subr.bf16.mxu0 %v9074_v45  ;;  %v9201_v54 = vcombine.low %v997_v38, %v1001_v39  ;;  %6730 = vmatprep.mubr.bf16.mxu1 %v10871_v52 }
 0x11c   : > { %v881_v48 = vld [vmem:[%s10680_s13 + $0x10a0] sm:$0xff] }
 0x11d   : > { %v1005_v50 = vld [vmem:[%s10680_s13 + $0x1480] sm:$0xff]  ;;  %v9082_v55 = vcombine.high %v877_v47, %v881_v48  ;;  %6700 = vmatprep.subr.bf16.mxu1 %v9202_v46  ;;  %v9081_v63 = vcombine.low %v877_v47, %v881_v48 }
 0x11e   : > { %v1009_v51 = vld [vmem:[%s10680_s13 + $0x14a0] sm:$0xff]  ;;  %6660 = vmatpush1.bf16.msra.mxu0 %v9073_v53  ;;  %6701 = vmatpush1.bf16.msra.mxu1 %v9201_v54 }
 0x11f   : > { %v9210_v56 = vcombine.high %v1005_v50, %v1009_v51  ;;  %v885_v57 = vld [vmem:[%s10680_s13 + $0x10c0] sm:$0xff]  ;;  %6661 = vmatprep.subr.bf16.mxu0 %v9082_v55  ;;  %v9209_v0 = vcombine.low %v1005_v50, %v1009_v51 }
 0x120   : > { %v889_v58 = vld [vmem:[%s10680_s13 + $0x10e0] sm:$0xff] }
 0x121   : > { %v1013_v61 = vld [vmem:[%s10680_s13 + $0x14c0] sm:$0xff]  ;;  %v9090_v1 = vcombine.high %v885_v57, %v889_v58  ;;  %6702 = vmatprep.subr.bf16.mxu1 %v9210_v56  ;;  %v9089_v7 = vcombine.low %v885_v57, %v889_v58 }
 0x122   : > { %v1017_v62 = vld [vmem:[%s10680_s13 + $0x14e0] sm:$0xff]  ;;  %6662 = vmatpush1.bf16.msra.mxu0 %v9081_v63  ;;  %6703 = vmatpush1.bf16.msra.mxu1 %v9209_v0 }
 0x123   : > { %v9218_v2 = vcombine.high %v1013_v61, %v1017_v62  ;;  %v893_v3 = vld [vmem:[%s10680_s13 + $0x1100] sm:$0xff]  ;;  %6663 = vmatprep.subr.bf16.mxu0 %v9090_v1  ;;  %v9217_v8 = vcombine.low %v1013_v61, %v1017_v62 }
 0x124   : > { %v897_v4 = vld [vmem:[%s10680_s13 + $0x1120] sm:$0xff] }
 0x125   : > { %v1021_v5 = vld [vmem:[%s10680_s13 + $0x1500] sm:$0xff]  ;;  %v9098_v9 = vcombine.high %v893_v3, %v897_v4  ;;  %6704 = vmatprep.subr.bf16.mxu1 %v9218_v2  ;;  %v9097_v15 = vcombine.low %v893_v3, %v897_v4 }
 0x126   : > { %v1025_v6 = vld [vmem:[%s10680_s13 + $0x1520] sm:$0xff]  ;;  %6664 = vmatpush1.bf16.msra.mxu0 %v9089_v7  ;;  %6705 = vmatpush1.bf16.msra.mxu1 %v9217_v8 }
 0x127   : > { %v9226_v10 = vcombine.high %v1021_v5, %v1025_v6  ;;  %v901_v11 = vld [vmem:[%s10680_s13 + $0x1140] sm:$0xff]  ;;  %6665 = vmatprep.subr.bf16.mxu0 %v9098_v9  ;;  %v9225_v16 = vcombine.low %v1021_v5, %v1025_v6 }
 0x128   : > { %v905_v12 = vld [vmem:[%s10680_s13 + $0x1160] sm:$0xff] }
 0x129   : > { %v1029_v13 = vld [vmem:[%s10680_s13 + $0x1540] sm:$0xff]  ;;  %v9106_v18 = vcombine.high %v901_v11, %v905_v12  ;;  %6706 = vmatprep.subr.bf16.mxu1 %v9226_v10  ;;  %v9105_v25 = vcombine.low %v901_v11, %v905_v12 }
 0x12a   : > { %v1033_v14 = vld [vmem:[%s10680_s13 + $0x1560] sm:$0xff]  ;;  %6666 = vmatpush1.bf16.msra.mxu0 %v9097_v15  ;;  %6707 = vmatpush1.bf16.msra.mxu1 %v9225_v16 }
 0x12b   : > { %v9234_v19 = vcombine.high %v1029_v13, %v1033_v14  ;;  %v909_v20 = vld [vmem:[%s10680_s13 + $0x1180] sm:$0xff]  ;;  %6667 = vmatprep.subr.bf16.mxu0 %v9106_v18  ;;  %v9233_v26 = vcombine.low %v1029_v13, %v1033_v14 }
 0x12c   : > { %v913_v22 = vld [vmem:[%s10680_s13 + $0x11a0] sm:$0xff] }
 0x12d   : > { %v1037_v23 = vld [vmem:[%s10680_s13 + $0x1580] sm:$0xff]  ;;  %v9114_v27 = vcombine.high %v909_v20, %v913_v22  ;;  %6708 = vmatprep.subr.bf16.mxu1 %v9234_v19  ;;  %v9113_v35 = vcombine.low %v909_v20, %v913_v22 }
 0x12e   : > { %v1041_v24 = vld [vmem:[%s10680_s13 + $0x15a0] sm:$0xff]  ;;  %6668 = vmatpush1.bf16.msra.mxu0 %v9105_v25  ;;  %6709 = vmatpush1.bf16.msra.mxu1 %v9233_v26 }
 0x12f   : > { %v9242_v28 = vcombine.high %v1037_v23, %v1041_v24  ;;  %v917_v30 = vld [vmem:[%s10680_s13 + $0x11c0] sm:$0xff]  ;;  %6669 = vmatprep.subr.bf16.mxu0 %v9114_v27  ;;  %v9241_v36 = vcombine.low %v1037_v23, %v1041_v24 }
 0x130   : > { %v921_v31 = vld [vmem:[%s10680_s13 + $0x11e0] sm:$0xff] }
 0x131   : > { %v1045_v33 = vld [vmem:[%s10680_s13 + $0x15c0] sm:$0xff]  ;;  %v9122_v38 = vcombine.high %v917_v30, %v921_v31  ;;  %6710 = vmatprep.subr.bf16.mxu1 %v9242_v28  ;;  %v9121_v45 = vcombine.low %v917_v30, %v921_v31 }
 0x132   : > { %v1049_v34 = vld [vmem:[%s10680_s13 + $0x15e0] sm:$0xff]  ;;  %6670 = vmatpush1.bf16.msra.mxu0 %v9113_v35  ;;  %6711 = vmatpush1.bf16.msra.mxu1 %v9241_v36 }
 0x133   : > { %v9250_v39 = vcombine.high %v1045_v33, %v1049_v34  ;;  %v925_v40 = vld [vmem:[%s10680_s13 + $0x1200] sm:$0xff]  ;;  %6671 = vmatprep.subr.bf16.mxu0 %v9122_v38  ;;  %v9249_v46 = vcombine.low %v1045_v33, %v1049_v34 }
 0x134   : > { %v929_v42 = vld [vmem:[%s10680_s13 + $0x1220] sm:$0xff] }
 0x135   : > { %v1053_v43 = vld [vmem:[%s10680_s13 + $0x1600] sm:$0xff]  ;;  %v9130_v47 = vcombine.high %v925_v40, %v929_v42  ;;  %6712 = vmatprep.subr.bf16.mxu1 %v9250_v39  ;;  %v9129_v55 = vcombine.low %v925_v40, %v929_v42 }
 0x136   : > { %v1057_v44 = vld [vmem:[%s10680_s13 + $0x1620] sm:$0xff]  ;;  %6672 = vmatpush1.bf16.msra.mxu0 %v9121_v45  ;;  %6713 = vmatpush1.bf16.msra.mxu1 %v9249_v46 }
 0x137   : > { %v9258_v48 = vcombine.high %v1053_v43, %v1057_v44  ;;  %v933_v50 = vld [vmem:[%s10680_s13 + $0x1240] sm:$0xff]  ;;  %6673 = vmatprep.subr.bf16.mxu0 %v9130_v47  ;;  %v9257_v56 = vcombine.low %v1053_v43, %v1057_v44 }
 0x138   : > { %v937_v51 = vld [vmem:[%s10680_s13 + $0x1260] sm:$0xff] }
 0x139   : > { %v1061_v53 = vld [vmem:[%s10680_s13 + $0x1640] sm:$0xff]  ;;  %v9138_v57 = vcombine.high %v933_v50, %v937_v51  ;;  %6714 = vmatprep.subr.bf16.mxu1 %v9258_v48  ;;  %v9137_v1 = vcombine.low %v933_v50, %v937_v51 }
 0x13a   : > { %v1065_v54 = vld [vmem:[%s10680_s13 + $0x1660] sm:$0xff]  ;;  %6674 = vmatpush1.bf16.msra.mxu0 %v9129_v55  ;;  %6715 = vmatpush1.bf16.msra.mxu1 %v9257_v56 }
 0x13b   : > { %v9266_v58 = vcombine.high %v1061_v53, %v1065_v54  ;;  %v941_v61 = vld [vmem:[%s10680_s13 + $0x1280] sm:$0xff]  ;;  %6675 = vmatprep.subr.bf16.mxu0 %v9138_v57  ;;  %v9265_v2 = vcombine.low %v1061_v53, %v1065_v54 }
 0x13c   : > { %v945_v62 = vld [vmem:[%s10680_s13 + $0x12a0] sm:$0xff] }
 0x13d   : > { %v1069_v63 = vld [vmem:[%s10680_s13 + $0x1680] sm:$0xff]  ;;  %v9146_v3 = vcombine.high %v941_v61, %v945_v62  ;;  %6716 = vmatprep.subr.bf16.mxu1 %v9266_v58  ;;  %v9145_v9 = vcombine.low %v941_v61, %v945_v62  ;;  %v327_v62 = vld [vmem:[%s10673_s14 + $0x50] sm:$0xff] }
 0x13e   : > { %v1073_v0 = vld [vmem:[%s10680_s13 + $0x16a0] sm:$0xff]  ;;  %6676 = vmatpush1.bf16.msra.mxu0 %v9137_v1  ;;  %6717 = vmatpush1.bf16.msra.mxu1 %v9265_v2 }
 0x13f   : > { %v9274_v4 = vcombine.high %v1069_v63, %v1073_v0  ;;  %v949_v5 = vld [vmem:[%s10680_s13 + $0x12c0] sm:$0xff]  ;;  %6677 = vmatprep.subr.bf16.mxu0 %v9146_v3  ;;  %v9273_v10 = vcombine.low %v1069_v63, %v1073_v0 }
 0x140   : > { %v953_v6 = vld [vmem:[%s10680_s13 + $0x12e0] sm:$0xff] }
 0x141   : > { %v1077_v7 = vld [vmem:[%s10680_s13 + $0x16c0] sm:$0xff]  ;;  %v9154_v11 = vcombine.high %v949_v5, %v953_v6  ;;  %6718 = vmatprep.subr.bf16.mxu1 %v9274_v4  ;;  %v9153_v18 = vcombine.low %v949_v5, %v953_v6  ;;  %v330_v6 = vld [vmem:[%s10673_s14 + $0x68] sm:$0xff] }
 0x142   : > { %v1081_v8 = vld [vmem:[%s10680_s13 + $0x16e0] sm:$0xff]  ;;  %6678 = vmatpush1.bf16.msra.mxu0 %v9145_v9  ;;  %6719 = vmatpush1.bf16.msra.mxu1 %v9273_v10  ;;  %v332_v9 = vld [vmem:[%s10673_s14 + $0x78] sm:$0xff] }
 0x143   : > { %v9282_v12 = vcombine.high %v1077_v7, %v1081_v8  ;;  %v957_v13 = vld [vmem:[%s10680_s13 + $0x1300] sm:$0xff]  ;;  %6679 = vmatprep.subr.bf16.mxu0 %v9154_v11  ;;  %v9281_v19 = vcombine.low %v1077_v7, %v1081_v8  ;;  %v10941_v7 = vpack.c.bf16 %v327_v62, %v327_v62 }
 0x144   : > { %v961_v14 = vld [vmem:[%s10680_s13 + $0x1320] sm:$0xff] }
 0x145   : > { %v1085_v15 = vld [vmem:[%s10680_s13 + $0x1700] sm:$0xff]  ;;  %v9162_v20 = vcombine.high %v957_v13, %v961_v14  ;;  %6720 = vmatprep.subr.bf16.mxu1 %v9282_v12  ;;  %v9161_v27 = vcombine.low %v957_v13, %v961_v14 }
 0x146   : > { %v1089_v16 = vld [vmem:[%s10680_s13 + $0x1720] sm:$0xff]  ;;  %6680 = vmatpush1.bf16.msra.mxu0 %v9153_v18  ;;  %6721 = vmatpush1.bf16.msra.mxu1 %v9281_v19  ;;  %v10951_v19 = vpack.c.bf16 %v332_v9, %v332_v9 }
 0x147   : > { %v9290_v22 = vcombine.high %v1085_v15, %v1089_v16  ;;  %v965_v23 = vld [vmem:[%s10680_s13 + $0x1340] sm:$0xff]  ;;  %6681 = vmatprep.subr.bf16.mxu0 %v9162_v20  ;;  %v9289_v28 = vcombine.low %v1085_v15, %v1089_v16  ;;  %v10946_v15 = vpack.c.bf16 %v330_v6, %v330_v6 }
 0x148   : > { %v969_v24 = vld [vmem:[%s10680_s13 + $0x1360] sm:$0xff] }
 0x149   : > { %v1093_v25 = vld [vmem:[%s10680_s13 + $0x1740] sm:$0xff]  ;;  %v9170_v30 = vcombine.high %v965_v23, %v969_v24  ;;  %6722 = vmatprep.subr.bf16.mxu1 %v9290_v22  ;;  %v9169_v38 = vcombine.low %v965_v23, %v969_v24 }
 0x14a   : > { %v1097_v26 = vld [vmem:[%s10680_s13 + $0x1760] sm:$0xff]  ;;  %6682 = vmatpush1.bf16.msra.mxu0 %v9161_v27  ;;  %6723 = vmatpush1.bf16.msra.mxu1 %v9289_v28 }
 0x14b   : > { %v9298_v31 = vcombine.high %v1093_v25, %v1097_v26  ;;  %v973_v33 = vld [vmem:[%s10680_s13 + $0x1380] sm:$0xff]  ;;  %6683 = vmatprep.subr.bf16.mxu0 %v9170_v30  ;;  %v9297_v39 = vcombine.low %v1093_v25, %v1097_v26 }
 0x14c   : > { %v977_v34 = vld [vmem:[%s10680_s13 + $0x13a0] sm:$0xff] }
 0x14d   : > { %v1101_v35 = vld [vmem:[%s10680_s13 + $0x1780] sm:$0xff]  ;;  %v9178_v40 = vcombine.high %v973_v33, %v977_v34  ;;  %6724 = vmatprep.subr.bf16.mxu1 %v9298_v31  ;;  %v9177_v47 = vcombine.low %v973_v33, %v977_v34 }
 0x14e   : > { %v1105_v36 = vld [vmem:[%s10680_s13 + $0x17a0] sm:$0xff]  ;;  %6684 = vmatpush1.bf16.msra.mxu0 %v9169_v38  ;;  %6725 = vmatpush1.bf16.msra.mxu1 %v9297_v39 }
 0x14f   : > { %v9306_v42 = vcombine.high %v1101_v35, %v1105_v36  ;;  %v981_v43 = vld [vmem:[%s10680_s13 + $0x13c0] sm:$0xff]  ;;  %6685 = vmatprep.subr.bf16.mxu0 %v9178_v40  ;;  %v9305_v48 = vcombine.low %v1101_v35, %v1105_v36 }
 0x150   : > { %v985_v44 = vld [vmem:[%s10680_s13 + $0x13e0] sm:$0xff] }
 0x151   : > { %v1109_v45 = vld [vmem:[%s10680_s13 + $0x17c0] sm:$0xff]  ;;  %v9186_v50 = vcombine.high %v981_v43, %v985_v44  ;;  %6726 = vmatprep.subr.bf16.mxu1 %v9306_v42  ;;  %v9185_v57 = vcombine.low %v981_v43, %v985_v44 }
 0x152   : > { %v1113_v46 = vld [vmem:[%s10680_s13 + $0x17e0] sm:$0xff]  ;;  %6686 = vmatpush1.bf16.msra.mxu0 %v9177_v47  ;;  %6727 = vmatpush1.bf16.msra.mxu1 %v9305_v48 }
 0x153   : > { %v9314_v51 = vcombine.high %v1109_v45, %v1113_v46  ;;  %v1117_v53 = vld [vmem:[%s10680_s13 + $0x1800] sm:$0xff]  ;;  %6687 = vmatprep.subr.bf16.mxu0 %v9186_v50  ;;  %v9313_v61 = vcombine.low %v1109_v45, %v1113_v46 }
 0x154   : > { %v1121_v54 = vld [vmem:[%s10680_s13 + $0x1820] sm:$0xff] }
 0x155   : > { %v1245_v55 = vld [vmem:[%s10680_s13 + $0x1c00] sm:$0xff]  ;;  %v9322_v63 = vcombine.high %v1117_v53, %v1121_v54  ;;  %6728 = vmatprep.subr.bf16.mxu1 %v9314_v51  ;;  %v9321_v8 = vcombine.low %v1117_v53, %v1121_v54 }
 0x156   : > { %v1249_v56 = vld [vmem:[%s10680_s13 + $0x1c20] sm:$0xff]  ;;  %6688 = vmatpush1.bf16.msra.mxu0 %v9185_v57  ;;  %6729 = vmatpush1.bf16.msra.mxu1 %v9313_v61 }
 0x157   : > { %v325_v58 = vld [vmem:[%s10673_s14 + $0x40] sm:$0xff]  ;;  %v9450_v0 = vcombine.high %v1245_v55, %v1249_v56  ;;  %6739 = vmatprep.subr.bf16.mxu0 %v9322_v63  ;;  %v9449_v10 = vcombine.low %v1245_v55, %v1249_v56 }
 0x158   : > { %v1125_v1 = vld [vmem:[%s10680_s13 + $0x1840] sm:$0xff]  ;;  %v10936_v3 = vpack.c.bf16 %v325_v58, %v325_v58 }
 0x159   : > { %v1129_v2 = vld [vmem:[%s10680_s13 + $0x1860] sm:$0xff]  ;;  %6780 = vmatprep.subr.bf16.mxu1 %v9450_v0  ;;  %6731 = vmatmul.mubr.bf16.vlgmr.msra.gmra.mrb[8].mxu1 %v10941_v7 }
 0x15a   : > { %v1253_v4 = vld [vmem:[%s10680_s13 + $0x1c40] sm:$0xff]  ;;  %v9330_v11 = vcombine.high %v1125_v1, %v1129_v2  ;;  %6690 = vmatmul.mubr.bf16.vlgmr.msra.gmra.mrb[8].mxu0 %v10936_v3  ;;  %v9329_v20 = vcombine.low %v1125_v1, %v1129_v2  ;;  %6781 = vmatpush1.bf16.msra.mxu1 %v9449_v10 }
 0x15b   : > { %v1257_v5 = vld [vmem:[%s10680_s13 + $0x1c60] sm:$0xff]  ;;  %6740 = vmatpush1.bf16.msra.mxu0 %v9321_v8  ;;  %6771 = vmatprep.mubr.bf16.mxu0 %v10946_v15 }
 0x15c   : > { %v9458_v12 = vcombine.high %v1253_v4, %v1257_v5  ;;  %v1133_v13 = vld [vmem:[%s10680_s13 + $0x1880] sm:$0xff]  ;;  %6741 = vmatprep.subr.bf16.mxu0 %v9330_v11  ;;  %v9457_v22 = vcombine.low %v1253_v4, %v1257_v5  ;;  %6812 = vmatprep.mubr.bf16.mxu1 %v10951_v19 }
 0x15d   : > { %v1137_v14 = vld [vmem:[%s10680_s13 + $0x18a0] sm:$0xff] }
 0x15e   : > { %v1261_v16 = vld [vmem:[%s10680_s13 + $0x1c80] sm:$0xff]  ;;  %v9338_v23 = vcombine.high %v1133_v13, %v1137_v14  ;;  %6782 = vmatprep.subr.bf16.mxu1 %v9458_v12  ;;  %v9337_v30 = vcombine.low %v1133_v13, %v1137_v14 }
 0x15f   : > { %v1265_v18 = vld [vmem:[%s10680_s13 + $0x1ca0] sm:$0xff]  ;;  %6742 = vmatpush1.bf16.msra.mxu0 %v9329_v20  ;;  %6783 = vmatpush1.bf16.msra.mxu1 %v9457_v22 }
 0x160   : > { %v9466_v24 = vcombine.high %v1261_v16, %v1265_v18  ;;  %v1141_v25 = vld [vmem:[%s10680_s13 + $0x18c0] sm:$0xff]  ;;  %6743 = vmatprep.subr.bf16.mxu0 %v9338_v23  ;;  %v9465_v31 = vcombine.low %v1261_v16, %v1265_v18 }
 0x161   : > { %v1145_v26 = vld [vmem:[%s10680_s13 + $0x18e0] sm:$0xff] }
 0x162   : > { %v1269_v27 = vld [vmem:[%s10680_s13 + $0x1cc0] sm:$0xff]  ;;  %v9346_v33 = vcombine.high %v1141_v25, %v1145_v26  ;;  %6784 = vmatprep.subr.bf16.mxu1 %v9466_v24  ;;  %v9345_v40 = vcombine.low %v1141_v25, %v1145_v26 }
 0x163   : > { %v1273_v28 = vld [vmem:[%s10680_s13 + $0x1ce0] sm:$0xff]  ;;  %6744 = vmatpush1.bf16.msra.mxu0 %v9337_v30  ;;  %6785 = vmatpush1.bf16.msra.mxu1 %v9465_v31 }
 0x164   : > { %v9474_v34 = vcombine.high %v1269_v27, %v1273_v28  ;;  %v1149_v35 = vld [vmem:[%s10680_s13 + $0x1900] sm:$0xff]  ;;  %6745 = vmatprep.subr.bf16.mxu0 %v9346_v33  ;;  %v9473_v42 = vcombine.low %v1269_v27, %v1273_v28 }
 0x165   : > { %v1153_v36 = vld [vmem:[%s10680_s13 + $0x1920] sm:$0xff] }
 0x166   : > { %v1277_v38 = vld [vmem:[%s10680_s13 + $0x1d00] sm:$0xff]  ;;  %v9354_v43 = vcombine.high %v1149_v35, %v1153_v36  ;;  %6786 = vmatprep.subr.bf16.mxu1 %v9474_v34  ;;  %v9353_v50 = vcombine.low %v1149_v35, %v1153_v36 }
 0x167   : > { %v1281_v39 = vld [vmem:[%s10680_s13 + $0x1d20] sm:$0xff]  ;;  %6746 = vmatpush1.bf16.msra.mxu0 %v9345_v40  ;;  %6787 = vmatpush1.bf16.msra.mxu1 %v9473_v42 }
 0x168   : > { %v9482_v44 = vcombine.high %v1277_v38, %v1281_v39  ;;  %v1157_v45 = vld [vmem:[%s10680_s13 + $0x1940] sm:$0xff]  ;;  %6747 = vmatprep.subr.bf16.mxu0 %v9354_v43  ;;  %v9481_v51 = vcombine.low %v1277_v38, %v1281_v39 }
 0x169   : > { %v1161_v46 = vld [vmem:[%s10680_s13 + $0x1960] sm:$0xff] }
 0x16a   : > { %v1285_v47 = vld [vmem:[%s10680_s13 + $0x1d40] sm:$0xff]  ;;  %v9362_v53 = vcombine.high %v1157_v45, %v1161_v46  ;;  %6788 = vmatprep.subr.bf16.mxu1 %v9482_v44  ;;  %v9361_v61 = vcombine.low %v1157_v45, %v1161_v46 }
 0x16b   : > { %v1289_v48 = vld [vmem:[%s10680_s13 + $0x1d60] sm:$0xff]  ;;  %6748 = vmatpush1.bf16.msra.mxu0 %v9353_v50  ;;  %6789 = vmatpush1.bf16.msra.mxu1 %v9481_v51 }
 0x16c   : > { %v9490_v54 = vcombine.high %v1285_v47, %v1289_v48  ;;  %v1165_v55 = vld [vmem:[%s10680_s13 + $0x1980] sm:$0xff]  ;;  %6749 = vmatprep.subr.bf16.mxu0 %v9362_v53  ;;  %v9489_v62 = vcombine.low %v1285_v47, %v1289_v48 }
 0x16d   : > { %v1169_v56 = vld [vmem:[%s10680_s13 + $0x19a0] sm:$0xff] }
 0x16e   : > { %v1293_v57 = vld [vmem:[%s10680_s13 + $0x1d80] sm:$0xff]  ;;  %v9370_v63 = vcombine.high %v1165_v55, %v1169_v56  ;;  %6790 = vmatprep.subr.bf16.mxu1 %v9490_v54  ;;  %v9369_v6 = vcombine.low %v1165_v55, %v1169_v56 }
 0x16f   : > { %v1297_v58 = vld [vmem:[%s10680_s13 + $0x1da0] sm:$0xff]  ;;  %6750 = vmatpush1.bf16.msra.mxu0 %v9361_v61  ;;  %6791 = vmatpush1.bf16.msra.mxu1 %v9489_v62 }
 0x170   : > { %v9498_v0 = vcombine.high %v1293_v57, %v1297_v58  ;;  %v1173_v1 = vld [vmem:[%s10680_s13 + $0x19c0] sm:$0xff]  ;;  %6751 = vmatprep.subr.bf16.mxu0 %v9370_v63  ;;  %v9497_v8 = vcombine.low %v1293_v57, %v1297_v58 }
 0x171   : > { %v1177_v2 = vld [vmem:[%s10680_s13 + $0x19e0] sm:$0xff] }
 0x172   : > { %v1301_v4 = vld [vmem:[%s10680_s13 + $0x1dc0] sm:$0xff]  ;;  %v9378_v9 = vcombine.high %v1173_v1, %v1177_v2  ;;  %6792 = vmatprep.subr.bf16.mxu1 %v9498_v0  ;;  %v9377_v16 = vcombine.low %v1173_v1, %v1177_v2 }
 0x173   : > { %v1305_v5 = vld [vmem:[%s10680_s13 + $0x1de0] sm:$0xff]  ;;  %6752 = vmatpush1.bf16.msra.mxu0 %v9369_v6  ;;  %6793 = vmatpush1.bf16.msra.mxu1 %v9497_v8 }
 0x174   : > { %v9506_v10 = vcombine.high %v1301_v4, %v1305_v5  ;;  %v1181_v11 = vld [vmem:[%s10680_s13 + $0x1a00] sm:$0xff]  ;;  %6753 = vmatprep.subr.bf16.mxu0 %v9378_v9  ;;  %v9505_v18 = vcombine.low %v1301_v4, %v1305_v5 }
 0x175   : > { %v1185_v12 = vld [vmem:[%s10680_s13 + $0x1a20] sm:$0xff] }
 0x176   : > { %v1309_v13 = vld [vmem:[%s10680_s13 + $0x1e00] sm:$0xff]  ;;  %v9386_v20 = vcombine.high %v1181_v11, %v1185_v12  ;;  %6794 = vmatprep.subr.bf16.mxu1 %v9506_v10  ;;  %v9385_v27 = vcombine.low %v1181_v11, %v1185_v12 }
 0x177   : > { %v1313_v14 = vld [vmem:[%s10680_s13 + $0x1e20] sm:$0xff]  ;;  %6754 = vmatpush1.bf16.msra.mxu0 %v9377_v16  ;;  %6795 = vmatpush1.bf16.msra.mxu1 %v9505_v18 }
 0x178   : > { %v9514_v22 = vcombine.high %v1309_v13, %v1313_v14  ;;  %v1189_v23 = vld [vmem:[%s10680_s13 + $0x1a40] sm:$0xff]  ;;  %6755 = vmatprep.subr.bf16.mxu0 %v9386_v20  ;;  %v9513_v28 = vcombine.low %v1309_v13, %v1313_v14 }
 0x179   : > { %v1193_v24 = vld [vmem:[%s10680_s13 + $0x1a60] sm:$0xff] }
 0x17a   : > { %v1317_v25 = vld [vmem:[%s10680_s13 + $0x1e40] sm:$0xff]  ;;  %v9394_v30 = vcombine.high %v1189_v23, %v1193_v24  ;;  %6796 = vmatprep.subr.bf16.mxu1 %v9514_v22  ;;  %v9393_v38 = vcombine.low %v1189_v23, %v1193_v24 }
 0x17b   : > { %v1321_v26 = vld [vmem:[%s10680_s13 + $0x1e60] sm:$0xff]  ;;  %6756 = vmatpush1.bf16.msra.mxu0 %v9385_v27  ;;  %6797 = vmatpush1.bf16.msra.mxu1 %v9513_v28 }
 0x17c   : > { %v9522_v31 = vcombine.high %v1317_v25, %v1321_v26  ;;  %v1197_v33 = vld [vmem:[%s10680_s13 + $0x1a80] sm:$0xff]  ;;  %6757 = vmatprep.subr.bf16.mxu0 %v9394_v30  ;;  %v9521_v39 = vcombine.low %v1317_v25, %v1321_v26  ;;  %v350_v30 = vld [vmem:[%s10680_s13 + $0x8] sm:$0xff] }
 0x17d   : > { %v1201_v34 = vld [vmem:[%s10680_s13 + $0x1aa0] sm:$0xff] }
 0x17e   : > { %v1325_v35 = vld [vmem:[%s10680_s13 + $0x1e80] sm:$0xff]  ;;  %v9402_v40 = vcombine.high %v1197_v33, %v1201_v34  ;;  %6798 = vmatprep.subr.bf16.mxu1 %v9522_v31  ;;  %v9401_v47 = vcombine.low %v1197_v33, %v1201_v34  ;;  %v354_v31 = vld [vmem:[%s10680_s13 + $0x28] sm:$0xff] }
 0x17f   : > { %v1329_v36 = vld [vmem:[%s10680_s13 + $0x1ea0] sm:$0xff]  ;;  %6758 = vmatpush1.bf16.msra.mxu0 %v9393_v38  ;;  %6799 = vmatpush1.bf16.msra.mxu1 %v9521_v39  ;;  %v478_v33 = vld [vmem:[%s10680_s13 + $0x408] sm:$0xff]  ;;  %v331_v39 = vld [vmem:[%s10673_s14 + $0x70] sm:$0xff] }
 0x180   : > { %v9530_v42 = vcombine.high %v1325_v35, %v1329_v36  ;;  %v1205_v43 = vld [vmem:[%s10680_s13 + $0x1ac0] sm:$0xff]  ;;  %6759 = vmatprep.subr.bf16.mxu0 %v9402_v40  ;;  %v9529_v48 = vcombine.low %v1325_v35, %v1329_v36  ;;  %v482_v34 = vld [vmem:[%s10680_s13 + $0x428] sm:$0xff]  ;;  %v8556_v40 = vcombine.high %v350_v30, %v354_v31 }
 0x181   : > { %v1209_v44 = vld [vmem:[%s10680_s13 + $0x1ae0] sm:$0xff] }
 0x182   : > { %v1333_v45 = vld [vmem:[%s10680_s13 + $0x1ec0] sm:$0xff]  ;;  %v9410_v50 = vcombine.high %v1205_v43, %v1209_v44  ;;  %6800 = vmatprep.subr.bf16.mxu1 %v9530_v42  ;;  %v9409_v57 = vcombine.low %v1205_v43, %v1209_v44  ;;  %v8684_v42 = vcombine.high %v478_v33, %v482_v34  ;;  %v358_v43 = vld [vmem:[%s10680_s13 + $0x48] sm:$0xff] }
 0x183   : > { %v1337_v46 = vld [vmem:[%s10680_s13 + $0x1ee0] sm:$0xff]  ;;  %6760 = vmatpush1.bf16.msra.mxu0 %v9401_v47  ;;  %6801 = vmatpush1.bf16.msra.mxu1 %v9529_v48  ;;  %v362_v44 = vld [vmem:[%s10680_s13 + $0x68] sm:$0xff]  ;;  %v11020_v48 = vpack.c.bf16 %v331_v39, %v331_v39 }
 0x184   : > { %v9538_v51 = vcombine.high %v1333_v45, %v1337_v46  ;;  %v1213_v53 = vld [vmem:[%s10680_s13 + $0x1b00] sm:$0xff]  ;;  %6761 = vmatprep.subr.bf16.mxu0 %v9410_v50  ;;  %v9537_v58 = vcombine.low %v1333_v45, %v1337_v46  ;;  %v486_v46 = vld [vmem:[%s10680_s13 + $0x448] sm:$0xff]  ;;  %v8555_v50 = vcombine.low %v350_v30, %v354_v31 }
 0x185   : > { %v1217_v54 = vld [vmem:[%s10680_s13 + $0x1b20] sm:$0xff]  ;;  %v490_v47 = vld [vmem:[%s10680_s13 + $0x468] sm:$0xff] }
 0x186   : > { %v1341_v55 = vld [vmem:[%s10680_s13 + $0x1f00] sm:$0xff]  ;;  %v9418_v61 = vcombine.high %v1213_v53, %v1217_v54  ;;  %6802 = vmatprep.subr.bf16.mxu1 %v9538_v51  ;;  %v9417_v4 = vcombine.low %v1213_v53, %v1217_v54  ;;  %v8683_v51 = vcombine.low %v478_v33, %v482_v34  ;;  %v8564_v53 = vcombine.high %v358_v43, %v362_v44  ;;  %v398_v33 = vld [vmem:[%s10680_s13 + $0x188] sm:$0xff] }
 0x187   : > { %v1345_v56 = vld [vmem:[%s10680_s13 + $0x1f20] sm:$0xff]  ;;  %6762 = vmatpush1.bf16.msra.mxu0 %v9409_v57  ;;  %6803 = vmatpush1.bf16.msra.mxu1 %v9537_v58  ;;  %v8692_v54 = vcombine.high %v486_v46, %v490_v47  ;;  %v494_v57 = vld [vmem:[%s10680_s13 + $0x488] sm:$0xff] }
 0x188   : > { %v9546_v62 = vcombine.high %v1341_v55, %v1345_v56  ;;  %v1221_v63 = vld [vmem:[%s10680_s13 + $0x1b40] sm:$0xff]  ;;  %6763 = vmatprep.subr.bf16.mxu0 %v9418_v61  ;;  %v9545_v5 = vcombine.low %v1341_v55, %v1345_v56  ;;  %v366_v55 = vld [vmem:[%s10680_s13 + $0x88] sm:$0xff]  ;;  %v8563_v61 = vcombine.low %v358_v43, %v362_v44 }
 0x189   : > { %v1225_v0 = vld [vmem:[%s10680_s13 + $0x1b60] sm:$0xff]  ;;  %v370_v56 = vld [vmem:[%s10680_s13 + $0xa8] sm:$0xff] }
 0x18a   : > { %v1349_v1 = vld [vmem:[%s10680_s13 + $0x1f40] sm:$0xff]  ;;  %v9426_v6 = vcombine.high %v1221_v63, %v1225_v0  ;;  %6804 = vmatprep.subr.bf16.mxu1 %v9546_v62  ;;  %v9425_v13 = vcombine.low %v1221_v63, %v1225_v0  ;;  %v498_v58 = vld [vmem:[%s10680_s13 + $0x4a8] sm:$0xff]  ;;  %v8691_v62 = vcombine.low %v486_v46, %v490_v47  ;;  %v8572_v63 = vcombine.high %v366_v55, %v370_v56 }
 0x18b   : > { %v1353_v2 = vld [vmem:[%s10680_s13 + $0x1f60] sm:$0xff]  ;;  %6764 = vmatpush1.bf16.msra.mxu0 %v9417_v4  ;;  %6805 = vmatpush1.bf16.msra.mxu1 %v9545_v5  ;;  %v8700_v0 = vcombine.high %v494_v57, %v498_v58  ;;  %v502_v4 = vld [vmem:[%s10680_s13 + $0x4c8] sm:$0xff] }
 0x18c   : > { %v9554_v8 = vcombine.high %v1349_v1, %v1353_v2  ;;  %v1229_v9 = vld [vmem:[%s10680_s13 + $0x1b80] sm:$0xff]  ;;  %6765 = vmatprep.subr.bf16.mxu0 %v9426_v6  ;;  %v9553_v14 = vcombine.low %v1349_v1, %v1353_v2  ;;  %v374_v1 = vld [vmem:[%s10680_s13 + $0xc8] sm:$0xff]  ;;  %v8571_v6 = vcombine.low %v366_v55, %v370_v56 }
 0x18d   : > { %v1233_v10 = vld [vmem:[%s10680_s13 + $0x1ba0] sm:$0xff]  ;;  %v378_v2 = vld [vmem:[%s10680_s13 + $0xe8] sm:$0xff] }
 0x18e   : > { %v1357_v11 = vld [vmem:[%s10680_s13 + $0x1f80] sm:$0xff]  ;;  %v9434_v16 = vcombine.high %v1229_v9, %v1233_v10  ;;  %6806 = vmatprep.subr.bf16.mxu1 %v9554_v8  ;;  %v9433_v25 = vcombine.low %v1229_v9, %v1233_v10  ;;  %v506_v5 = vld [vmem:[%s10680_s13 + $0x4e8] sm:$0xff]  ;;  %v8699_v8 = vcombine.low %v494_v57, %v498_v58  ;;  %v8580_v9 = vcombine.high %v374_v1, %v378_v2 }
 0x18f   : > { %v1361_v12 = vld [vmem:[%s10680_s13 + $0x1fa0] sm:$0xff]  ;;  %6766 = vmatpush1.bf16.msra.mxu0 %v9425_v13  ;;  %6807 = vmatpush1.bf16.msra.mxu1 %v9553_v14  ;;  %v8708_v10 = vcombine.high %v502_v4, %v506_v5  ;;  %v510_v13 = vld [vmem:[%s10680_s13 + $0x508] sm:$0xff] }
 0x190   : > { %v9562_v18 = vcombine.high %v1357_v11, %v1361_v12  ;;  %v1237_v20 = vld [vmem:[%s10680_s13 + $0x1bc0] sm:$0xff]  ;;  %6767 = vmatprep.subr.bf16.mxu0 %v9434_v16  ;;  %v9561_v26 = vcombine.low %v1357_v11, %v1361_v12  ;;  %v382_v11 = vld [vmem:[%s10680_s13 + $0x108] sm:$0xff]  ;;  %v8579_v16 = vcombine.low %v374_v1, %v378_v2 }
 0x191   : > { %v1241_v22 = vld [vmem:[%s10680_s13 + $0x1be0] sm:$0xff]  ;;  %v386_v12 = vld [vmem:[%s10680_s13 + $0x128] sm:$0xff] }
 0x192   : > { %v1365_v23 = vld [vmem:[%s10680_s13 + $0x1fc0] sm:$0xff]  ;;  %v9442_v27 = vcombine.high %v1237_v20, %v1241_v22  ;;  %6808 = vmatprep.subr.bf16.mxu1 %v9562_v18  ;;  %v9441_v35 = vcombine.low %v1237_v20, %v1241_v22  ;;  %v514_v14 = vld [vmem:[%s10680_s13 + $0x528] sm:$0xff]  ;;  %v8707_v18 = vcombine.low %v502_v4, %v506_v5  ;;  %v8588_v20 = vcombine.high %v382_v11, %v386_v12 }
 0x193   : > { %v1369_v24 = vld [vmem:[%s10680_s13 + $0x1fe0] sm:$0xff]  ;;  %6768 = vmatpush1.bf16.msra.mxu0 %v9433_v25  ;;  %6809 = vmatpush1.bf16.msra.mxu1 %v9561_v26  ;;  %v8716_v22 = vcombine.high %v510_v13, %v514_v14  ;;  %v518_v25 = vld [vmem:[%s10680_s13 + $0x548] sm:$0xff] }
 0x194   : > { %v9570_v28 = vcombine.high %v1365_v23, %v1369_v24  ;;  %v329_v36 = vld [vmem:[%s10673_s14 + $0x60] sm:$0xff]  ;;  %6769 = vmatprep.subr.bf16.mxu0 %v9442_v27  ;;  %v9569_v38 = vcombine.low %v1365_v23, %v1369_v24  ;;  %v390_v23 = vld [vmem:[%s10680_s13 + $0x148] sm:$0xff]  ;;  %v8587_v27 = vcombine.low %v382_v11, %v386_v12 }
 0x195   : > { %v11016_v45 = vpack.c.bf16 %v329_v36, %v329_v36  ;;  %v394_v24 = vld [vmem:[%s10680_s13 + $0x168] sm:$0xff] }
 0x196   : > { %6810 = vmatprep.subr.bf16.mxu1 %v9570_v28  ;;  %v522_v26 = vld [vmem:[%s10680_s13 + $0x568] sm:$0xff]  ;;  %v8715_v28 = vcombine.low %v510_v13, %v514_v14  ;;  %v8596_v30 = vcombine.high %v390_v23, %v394_v24 }
 0x197   : > { %6770 = vmatpush1.bf16.msra.mxu0 %v9441_v35  ;;  %6811 = vmatpush1.bf16.msra.mxu1 %v9569_v38  ;;  %v8724_v31 = vcombine.high %v518_v25, %v522_v26  ;;  %v402_v34 = vld [vmem:[%s10680_s13 + $0x1a8] sm:$0xff]  ;;  %v8595_v38 = vcombine.low %v390_v23, %v394_v24  ;;  %v8723_v39 = vcombine.low %v518_v25, %v522_v26 }
 0x198   : > { %6821 = vmatprep.subr.bf16.mxu0 %v8556_v40  ;;  %6862 = vmatprep.subr.bf16.mxu1 %v8684_v42  ;;  %v526_v35 = vld [vmem:[%s10680_s13 + $0x588] sm:$0xff]  ;;  %v8604_v40 = vcombine.high %v398_v33, %v402_v34  ;;  %v8603_v57 = vcombine.low %v398_v33, %v402_v34 }
 0x199   : > { %v530_v36 = vld [vmem:[%s10680_s13 + $0x5a8] sm:$0xff] }
 0x19a   : > { %6772 = vmatmul.mubr.bf16.vlgmr.msra.gmra.mrb[12].mxu0 %v11016_v45  ;;  %6813 = vmatmul.mubr.bf16.vlgmr.msra.gmra.mrb[12].mxu1 %v11020_v48  ;;  %v8732_v43 = vcombine.high %v526_v35, %v530_v36  ;;  %v406_v44 = vld [vmem:[%s10680_s13 + $0x1c8] sm:$0xff] }
 0x19b   : > { %6822 = vmatpush1.bf16.msra.mxu0 %v8555_v50  ;;  %6863 = vmatpush1.bf16.msra.mxu1 %v8683_v51  ;;  %v410_v46 = vld [vmem:[%s10680_s13 + $0x1e8] sm:$0xff] }
 0x19c   : > { %6823 = vmatprep.subr.bf16.mxu0 %v8564_v53  ;;  %6864 = vmatprep.subr.bf16.mxu1 %v8692_v54  ;;  %v534_v51 = vld [vmem:[%s10680_s13 + $0x5c8] sm:$0xff] }
 0x19d   : > { %6853 = vmatprep.mubr.bf16.mxu0 %v10728_v59  ;;  %6894 = vmatprep.mubr.bf16.mxu1 %v10730_v60  ;;  %v538_v53 = vld [vmem:[%s10680_s13 + $0x5e8] sm:$0xff] }
 0x19e   : > { %v8740_v2 = vcombine.high %v534_v51, %v538_v53  ;;  %v414_v4 = vld [vmem:[%s10680_s13 + $0x208] sm:$0xff] }
 0x19f   : > { %6824 = vmatpush1.bf16.msra.mxu0 %v8563_v61  ;;  %6865 = vmatpush1.bf16.msra.mxu1 %v8691_v62  ;;  %v418_v5 = vld [vmem:[%s10680_s13 + $0x228] sm:$0xff] }
 0x1a0   : > { %6825 = vmatprep.subr.bf16.mxu0 %v8572_v63  ;;  %6866 = vmatprep.subr.bf16.mxu1 %v8700_v0  ;;  %v8731_v63 = vcombine.low %v526_v35, %v530_v36  ;;  %v8612_v0 = vcombine.high %v406_v44, %v410_v46  ;;  %v8620_v11 = vcombine.high %v414_v4, %v418_v5  ;;  %v422_v13 = vld [vmem:[%s10680_s13 + $0x248] sm:$0xff] }
 0x1a1   : > { %v426_v14 = vld [vmem:[%s10680_s13 + $0x268] sm:$0xff] }
 0x1a2   : > { %v8628_v23 = vcombine.high %v422_v13, %v426_v14  ;;  %v430_v25 = vld [vmem:[%s10680_s13 + $0x288] sm:$0xff] }
 0x1a3   : > { %6826 = vmatpush1.bf16.msra.mxu0 %v8571_v6  ;;  %6867 = vmatpush1.bf16.msra.mxu1 %v8699_v8  ;;  %v542_v6 = vld [vmem:[%s10680_s13 + $0x608] sm:$0xff] }
 0x1a4   : > { %6827 = vmatprep.subr.bf16.mxu0 %v8580_v9  ;;  %6868 = vmatprep.subr.bf16.mxu1 %v8708_v10  ;;  %v546_v8 = vld [vmem:[%s10680_s13 + $0x628] sm:$0xff]  ;;  %v8611_v9 = vcombine.low %v406_v44, %v410_v46  ;;  %v8739_v10 = vcombine.low %v534_v51, %v538_v53 }
 0x1a5   : > { %v8748_v12 = vcombine.high %v542_v6, %v546_v8  ;;  %v434_v26 = vld [vmem:[%s10680_s13 + $0x2a8] sm:$0xff] }
 0x1a6   : > { %v8636_v33 = vcombine.high %v430_v25, %v434_v26  ;;  %v438_v35 = vld [vmem:[%s10680_s13 + $0x2c8] sm:$0xff] }
 0x1a7   : > { %6828 = vmatpush1.bf16.msra.mxu0 %v8579_v16  ;;  %6869 = vmatpush1.bf16.msra.mxu1 %v8707_v18  ;;  %v550_v16 = vld [vmem:[%s10680_s13 + $0x648] sm:$0xff] }
 0x1a8   : > { %6829 = vmatprep.subr.bf16.mxu0 %v8588_v20  ;;  %6870 = vmatprep.subr.bf16.mxu1 %v8716_v22  ;;  %v554_v18 = vld [vmem:[%s10680_s13 + $0x668] sm:$0xff]  ;;  %v8619_v20 = vcombine.low %v414_v4, %v418_v5  ;;  %v8747_v22 = vcombine.low %v542_v6, %v546_v8 }
 0x1a9   : > { %v8756_v24 = vcombine.high %v550_v16, %v554_v18  ;;  %v442_v36 = vld [vmem:[%s10680_s13 + $0x2e8] sm:$0xff] }
 0x1aa   : > { %v6568_v47 = vpop.f32.mrb[0].mxu1  ;;  %v446_v46 = vld [vmem:[%s10680_s13 + $0x308] sm:$0xff]  ;;  %v8643_v53 = vcombine.low %v438_v35, %v442_v36 }
 0x1ab   : > { %6830 = vmatpush1.bf16.msra.mxu0 %v8587_v27  ;;  %6871 = vmatpush1.bf16.msra.mxu1 %v8715_v28  ;;  %v6527_v42 = vpop.f32.mrb[0].mxu0  ;;  %v6570_v55 = vpop.f32.mrb[1].mxu1  ;;  %v558_v27 = vld [vmem:[%s10680_s13 + $0x688] sm:$0xff] }
 0x1ac   : > { %6831 = vmatprep.subr.bf16.mxu0 %v8596_v30  ;;  %6872 = vmatprep.subr.bf16.mxu1 %v8724_v31  ;;  %v6529_v50 = vpop.f32.mrb[1].mxu0  ;;  %v11050_v54 = vadd.f32 %v6568_v47, %v6527_v42  ;;  %v6572_v61 = vpop.f32.mrb[2].mxu1  ;;  %v562_v28 = vld [vmem:[%s10680_s13 + $0x6a8] sm:$0xff]  ;;  %v8627_v30 = vcombine.low %v422_v13, %v426_v14  ;;  %v8755_v31 = vcombine.low %v550_v16, %v554_v18 }
 0x1ad   : > { %v6531_v56 = vpop.f32.mrb[2].mxu0  ;;  %v11052_v58 = vadd.f32 %v6570_v55, %v6529_v50  ;;  %v6573_v1 = vpop.f32.mrb[3].mxu1  ;;  %v8764_v34 = vcombine.high %v558_v27, %v562_v28  ;;  %v8763_v42 = vcombine.low %v558_v27, %v562_v28  ;;  %v450_v47 = vld [vmem:[%s10680_s13 + $0x328] sm:$0xff] }
 0x1ae   : > { %v6532_v62 = vpop.f32.mrb[3].mxu0  ;;  %v574_v50 = vld [vmem:[%s10680_s13 + $0x708] sm:$0xff]  ;;  %v8652_v56 = vcombine.high %v446_v46, %v450_v47  ;;  %v8651_v1 = vcombine.low %v446_v46, %v450_v47 }
 0x1af   : > { %6832 = vmatpush1.bf16.msra.mxu0 %v8595_v38  ;;  %6873 = vmatpush1.bf16.msra.mxu1 %v8723_v39  ;;  %v566_v38 = vld [vmem:[%s10680_s13 + $0x6c8] sm:$0xff] }
 0x1b0   : > { %6833 = vmatprep.subr.bf16.mxu0 %v8604_v40  ;;  %6874 = vmatprep.subr.bf16.mxu1 %v8732_v43  ;;  %v570_v39 = vld [vmem:[%s10680_s13 + $0x6e8] sm:$0xff]  ;;  %v8635_v40 = vcombine.low %v430_v25, %v434_v26  ;;  %v8644_v43 = vcombine.high %v438_v35, %v442_v36 }
 0x1b1   : > { %v8772_v44 = vcombine.high %v566_v38, %v570_v39  ;;  %v578_v51 = vld [vmem:[%s10680_s13 + $0x728] sm:$0xff]  ;;  %v8771_v55 = vcombine.low %v566_v38, %v570_v39 }
 0x1b2   : > { %v454_v61 = vld [vmem:[%s10680_s13 + $0x348] sm:$0xff] }
 0x1b3   : > { %6834 = vmatpush1.bf16.msra.mxu0 %v8603_v57  ;;  %6875 = vmatpush1.bf16.msra.mxu1 %v8731_v63  ;;  %v8780_v57 = vcombine.high %v574_v50, %v578_v51  ;;  %v458_v62 = vld [vmem:[%s10680_s13 + $0x368] sm:$0xff] }
 0x1b4   : > { %6835 = vmatprep.subr.bf16.mxu0 %v8612_v0  ;;  %6876 = vmatprep.subr.bf16.mxu1 %v8740_v2  ;;  %v582_v63 = vld [vmem:[%s10680_s13 + $0x748] sm:$0xff]  ;;  %v8779_v2 = vcombine.low %v574_v50, %v578_v51  ;;  %v8660_v4 = vcombine.high %v454_v61, %v458_v62 }
 0x1b5   : > { %v586_v0 = vld [vmem:[%s10680_s13 + $0x768] sm:$0xff] }
 0x1b6   : > { %v8788_v5 = vcombine.high %v582_v63, %v586_v0  ;;  %v462_v6 = vld [vmem:[%s10680_s13 + $0x388] sm:$0xff] }
 0x1b7   : > { %6836 = vmatpush1.bf16.msra.mxu0 %v8611_v9  ;;  %6877 = vmatpush1.bf16.msra.mxu1 %v8739_v10  ;;  %v466_v8 = vld [vmem:[%s10680_s13 + $0x3a8] sm:$0xff] }
 0x1b8   : > { %6837 = vmatprep.subr.bf16.mxu0 %v8620_v11  ;;  %6878 = vmatprep.subr.bf16.mxu1 %v8748_v12  ;;  %v590_v9 = vld [vmem:[%s10680_s13 + $0x788] sm:$0xff]  ;;  %v8659_v11 = vcombine.low %v454_v61, %v458_v62  ;;  %v8787_v12 = vcombine.low %v582_v63, %v586_v0  ;;  %v8668_v13 = vcombine.high %v462_v6, %v466_v8 }
 0x1b9   : > { %v594_v10 = vld [vmem:[%s10680_s13 + $0x7a8] sm:$0xff] }
 0x1ba   : > { %v8796_v14 = vcombine.high %v590_v9, %v594_v10  ;;  %v470_v16 = vld [vmem:[%s10680_s13 + $0x3c8] sm:$0xff] }
 0x1bb   : > { %6838 = vmatpush1.bf16.msra.mxu0 %v8619_v20  ;;  %6879 = vmatpush1.bf16.msra.mxu1 %v8747_v22  ;;  %v474_v18 = vld [vmem:[%s10680_s13 + $0x3e8] sm:$0xff] }
 0x1bc   : > { %6839 = vmatprep.subr.bf16.mxu0 %v8628_v23  ;;  %6880 = vmatprep.subr.bf16.mxu1 %v8756_v24  ;;  %v598_v20 = vld [vmem:[%s10680_s13 + $0x7c8] sm:$0xff]  ;;  %v8667_v23 = vcombine.low %v462_v6, %v466_v8  ;;  %v8795_v24 = vcombine.low %v590_v9, %v594_v10  ;;  %v8676_v25 = vcombine.high %v470_v16, %v474_v18 }
 0x1bd   : > { %v602_v22 = vld [vmem:[%s10680_s13 + $0x7e8] sm:$0xff] }
 0x1be   : > { %v8804_v26 = vcombine.high %v598_v20, %v602_v22  ;;  %v606_v27 = vld [vmem:[%s10680_s13 + $0x808] sm:$0xff] }
 0x1bf   : > { %6840 = vmatpush1.bf16.msra.mxu0 %v8627_v30  ;;  %6881 = vmatpush1.bf16.msra.mxu1 %v8755_v31  ;;  %v610_v28 = vld [vmem:[%s10680_s13 + $0x828] sm:$0xff] }
 0x1c0   : > { %6841 = vmatprep.subr.bf16.mxu0 %v8636_v33  ;;  %6882 = vmatprep.subr.bf16.mxu1 %v8764_v34  ;;  %v734_v30 = vld [vmem:[%s10680_s13 + $0xc08] sm:$0xff]  ;;  %v8675_v33 = vcombine.low %v470_v16, %v474_v18  ;;  %v8803_v34 = vcombine.low %v598_v20, %v602_v22  ;;  %v8812_v35 = vcombine.high %v606_v27, %v610_v28 }
 0x1c1   : > { %v738_v31 = vld [vmem:[%s10680_s13 + $0xc28] sm:$0xff] }
 0x1c2   : > { %v8940_v36 = vcombine.high %v734_v30, %v738_v31  ;;  %v614_v38 = vld [vmem:[%s10680_s13 + $0x848] sm:$0xff] }
 0x1c3   : > { %6842 = vmatpush1.bf16.msra.mxu0 %v8635_v40  ;;  %6883 = vmatpush1.bf16.msra.mxu1 %v8763_v42  ;;  %v618_v39 = vld [vmem:[%s10680_s13 + $0x868] sm:$0xff] }
 0x1c4   : > { %6843 = vmatprep.subr.bf16.mxu0 %v8644_v43  ;;  %6884 = vmatprep.subr.bf16.mxu1 %v8772_v44  ;;  %v742_v40 = vld [vmem:[%s10680_s13 + $0xc48] sm:$0xff]  ;;  %v8811_v43 = vcombine.low %v606_v27, %v610_v28  ;;  %v8939_v44 = vcombine.low %v734_v30, %v738_v31  ;;  %v8820_v46 = vcombine.high %v614_v38, %v618_v39 }
 0x1c5   : > { %v746_v42 = vld [vmem:[%s10680_s13 + $0xc68] sm:$0xff] }
 0x1c6   : > { %v8948_v47 = vcombine.high %v742_v40, %v746_v42  ;;  %v622_v50 = vld [vmem:[%s10680_s13 + $0x888] sm:$0xff] }
 0x1c7   : > { %6844 = vmatpush1.bf16.msra.mxu0 %v8643_v53  ;;  %6885 = vmatpush1.bf16.msra.mxu1 %v8771_v55  ;;  %v626_v51 = vld [vmem:[%s10680_s13 + $0x8a8] sm:$0xff] }
 0x1c8   : > { %6845 = vmatprep.subr.bf16.mxu0 %v8652_v56  ;;  %6886 = vmatprep.subr.bf16.mxu1 %v8780_v57  ;;  %v750_v53 = vld [vmem:[%s10680_s13 + $0xc88] sm:$0xff]  ;;  %v8819_v56 = vcombine.low %v614_v38, %v618_v39  ;;  %v8947_v57 = vcombine.low %v742_v40, %v746_v42  ;;  %v8828_v61 = vcombine.high %v622_v50, %v626_v51 }
 0x1c9   : > { %v754_v55 = vld [vmem:[%s10680_s13 + $0xca8] sm:$0xff] }
 0x1ca   : > { %v8956_v62 = vcombine.high %v750_v53, %v754_v55  ;;  %v630_v63 = vld [vmem:[%s10680_s13 + $0x8c8] sm:$0xff] }
 0x1cb   : > { %6846 = vmatpush1.bf16.msra.mxu0 %v8651_v1  ;;  %6887 = vmatpush1.bf16.msra.mxu1 %v8779_v2  ;;  %v634_v0 = vld [vmem:[%s10680_s13 + $0x8e8] sm:$0xff] }
 0x1cc   : > { %6847 = vmatprep.subr.bf16.mxu0 %v8660_v4  ;;  %6888 = vmatprep.subr.bf16.mxu1 %v8788_v5  ;;  %v758_v1 = vld [vmem:[%s10680_s13 + $0xcc8] sm:$0xff]  ;;  %v8827_v4 = vcombine.low %v622_v50, %v626_v51  ;;  %v8955_v5 = vcombine.low %v750_v53, %v754_v55  ;;  %v8836_v6 = vcombine.high %v630_v63, %v634_v0 }
 0x1cd   : > { %v762_v2 = vld [vmem:[%s10680_s13 + $0xce8] sm:$0xff] }
 0x1ce   : > { %v8964_v8 = vcombine.high %v758_v1, %v762_v2  ;;  %v638_v9 = vld [vmem:[%s10680_s13 + $0x908] sm:$0xff] }
 0x1cf   : > { %6848 = vmatpush1.bf16.msra.mxu0 %v8659_v11  ;;  %6889 = vmatpush1.bf16.msra.mxu1 %v8787_v12  ;;  %v642_v10 = vld [vmem:[%s10680_s13 + $0x928] sm:$0xff] }
 0x1d0   : > { %6849 = vmatprep.subr.bf16.mxu0 %v8668_v13  ;;  %6890 = vmatprep.subr.bf16.mxu1 %v8796_v14  ;;  %v766_v11 = vld [vmem:[%s10680_s13 + $0xd08] sm:$0xff]  ;;  %v8835_v13 = vcombine.low %v630_v63, %v634_v0  ;;  %v8963_v14 = vcombine.low %v758_v1, %v762_v2  ;;  %v8844_v16 = vcombine.high %v638_v9, %v642_v10 }
 0x1d1   : > { %v770_v12 = vld [vmem:[%s10680_s13 + $0xd28] sm:$0xff] }
 0x1d2   : > { %v8972_v18 = vcombine.high %v766_v11, %v770_v12  ;;  %v646_v20 = vld [vmem:[%s10680_s13 + $0x948] sm:$0xff] }
 0x1d3   : > { %6850 = vmatpush1.bf16.msra.mxu0 %v8667_v23  ;;  %6891 = vmatpush1.bf16.msra.mxu1 %v8795_v24  ;;  %v650_v22 = vld [vmem:[%s10680_s13 + $0x968] sm:$0xff] }
 0x1d4   : > { %6851 = vmatprep.subr.bf16.mxu0 %v8676_v25  ;;  %6892 = vmatprep.subr.bf16.mxu1 %v8804_v26  ;;  %v774_v23 = vld [vmem:[%s10680_s13 + $0xd48] sm:$0xff]  ;;  %v8843_v25 = vcombine.low %v638_v9, %v642_v10  ;;  %v8971_v26 = vcombine.low %v766_v11, %v770_v12  ;;  %v8852_v27 = vcombine.high %v646_v20, %v650_v22 }
 0x1d5   : > { %v778_v24 = vld [vmem:[%s10680_s13 + $0xd68] sm:$0xff] }
 0x1d6   : > { %v8980_v28 = vcombine.high %v774_v23, %v778_v24  ;;  %v654_v30 = vld [vmem:[%s10680_s13 + $0x988] sm:$0xff] }
 0x1d7   : > { %6852 = vmatpush1.bf16.msra.mxu0 %v8675_v33  ;;  %6893 = vmatpush1.bf16.msra.mxu1 %v8803_v34  ;;  %v658_v31 = vld [vmem:[%s10680_s13 + $0x9a8] sm:$0xff] }
 0x1d8   : > { %6903 = vmatprep.subr.bf16.mxu0 %v8812_v35  ;;  %6944 = vmatprep.subr.bf16.mxu1 %v8940_v36  ;;  %v782_v33 = vld [vmem:[%s10680_s13 + $0xd88] sm:$0xff]  ;;  %v8851_v35 = vcombine.low %v646_v20, %v650_v22  ;;  %v8979_v36 = vcombine.low %v774_v23, %v778_v24  ;;  %v8860_v38 = vcombine.high %v654_v30, %v658_v31 }
 0x1d9   : > { %v786_v34 = vld [vmem:[%s10680_s13 + $0xda8] sm:$0xff] }
 0x1da   : > { %6854 = vmatmul.mubr.bf16.vlgmr.msra.gmra.mrb[16].mxu0 %v10776_v17  ;;  %6895 = vmatmul.mubr.bf16.vlgmr.msra.gmra.mrb[16].mxu1 %v10781_v21  ;;  %v8988_v40 = vcombine.high %v782_v33, %v786_v34  ;;  %v662_v42 = vld [vmem:[%s10680_s13 + $0x9c8] sm:$0xff] }
 0x1db   : > { %6904 = vmatpush1.bf16.msra.mxu0 %v8811_v43  ;;  %6945 = vmatpush1.bf16.msra.mxu1 %v8939_v44  ;;  %v666_v43 = vld [vmem:[%s10680_s13 + $0x9e8] sm:$0xff] }
 0x1dc   : > { %6905 = vmatprep.subr.bf16.mxu0 %v8820_v46  ;;  %6946 = vmatprep.subr.bf16.mxu1 %v8948_v47  ;;  %v790_v50 = vld [vmem:[%s10680_s13 + $0xdc8] sm:$0xff]  ;;  %v8868_v0 = vcombine.high %v662_v42, %v666_v43  ;;  %v8867_v9 = vcombine.low %v662_v42, %v666_v43 }
 0x1dd   : > { %6935 = vmatprep.mubr.bf16.mxu0 %v10786_v29  ;;  %6976 = vmatprep.mubr.bf16.mxu1 %v10791_v32  ;;  %v794_v51 = vld [vmem:[%s10680_s13 + $0xde8] sm:$0xff] }
 0x1de   : > { %v8996_v2 = vcombine.high %v790_v50, %v794_v51  ;;  %v8995_v10 = vcombine.low %v790_v50, %v794_v51  ;;  %v830_v50 = vld [vmem:[%s10680_s13 + $0xf08] sm:$0xff] }
 0x1df   : > { %6906 = vmatpush1.bf16.msra.mxu0 %v8819_v56  ;;  %6947 = vmatpush1.bf16.msra.mxu1 %v8947_v57  ;;  %v8859_v57 = vcombine.low %v654_v30, %v658_v31  ;;  %v834_v51 = vld [vmem:[%s10680_s13 + $0xf28] sm:$0xff] }
 0x1e0   : > { %6907 = vmatprep.subr.bf16.mxu0 %v8828_v61  ;;  %6948 = vmatprep.subr.bf16.mxu1 %v8956_v62 }
 0x1e3   : > { %6908 = vmatpush1.bf16.msra.mxu0 %v8827_v4  ;;  %6949 = vmatpush1.bf16.msra.mxu1 %v8955_v5  ;;  %v670_v4 = vld [vmem:[%s10680_s13 + $0xa08] sm:$0xff] }
 0x1e4   : > { %6909 = vmatprep.subr.bf16.mxu0 %v8836_v6  ;;  %6950 = vmatprep.subr.bf16.mxu1 %v8964_v8  ;;  %v674_v5 = vld [vmem:[%s10680_s13 + $0xa28] sm:$0xff] }
 0x1e5   : > { %v798_v6 = vld [vmem:[%s10680_s13 + $0xe08] sm:$0xff]  ;;  %v8876_v11 = vcombine.high %v670_v4, %v674_v5  ;;  %v8875_v20 = vcombine.low %v670_v4, %v674_v5 }
 0x1e6   : > { %v802_v8 = vld [vmem:[%s10680_s13 + $0xe28] sm:$0xff] }
 0x1e7   : > { %6910 = vmatpush1.bf16.msra.mxu0 %v8835_v13  ;;  %6951 = vmatpush1.bf16.msra.mxu1 %v8963_v14  ;;  %v9004_v12 = vcombine.high %v798_v6, %v802_v8  ;;  %v678_v13 = vld [vmem:[%s10680_s13 + $0xa48] sm:$0xff]  ;;  %v9003_v22 = vcombine.low %v798_v6, %v802_v8 }
 0x1e8   : > { %6911 = vmatprep.subr.bf16.mxu0 %v8844_v16  ;;  %6952 = vmatprep.subr.bf16.mxu1 %v8972_v18  ;;  %v682_v14 = vld [vmem:[%s10680_s13 + $0xa68] sm:$0xff] }
 0x1e9   : > { %v806_v16 = vld [vmem:[%s10680_s13 + $0xe48] sm:$0xff]  ;;  %v8884_v23 = vcombine.high %v678_v13, %v682_v14  ;;  %v8883_v30 = vcombine.low %v678_v13, %v682_v14 }
 0x1ea   : > { %v810_v18 = vld [vmem:[%s10680_s13 + $0xe68] sm:$0xff] }
 0x1eb   : > { %6912 = vmatpush1.bf16.msra.mxu0 %v8843_v25  ;;  %6953 = vmatpush1.bf16.msra.mxu1 %v8971_v26  ;;  %v6650_v46 = vpop.f32.mrb[4].mxu1  ;;  %v9012_v24 = vcombine.high %v806_v16, %v810_v18  ;;  %v686_v25 = vld [vmem:[%s10680_s13 + $0xa88] sm:$0xff]  ;;  %v9011_v31 = vcombine.low %v806_v16, %v810_v18 }
 0x1ec   : > { %6913 = vmatprep.subr.bf16.mxu0 %v8852_v27  ;;  %v6609_v39 = vpop.f32.mrb[4].mxu0  ;;  %6954 = vmatprep.subr.bf16.mxu1 %v8980_v28  ;;  %v6652_v55 = vpop.f32.mrb[5].mxu1  ;;  %v690_v26 = vld [vmem:[%s10680_s13 + $0xaa8] sm:$0xff] }
 0x1ed   : > { %v6610_v44 = vadd.f32 %v6609_v39, %v11050_v54  ;;  %v6611_v47 = vpop.f32.mrb[5].mxu0  ;;  %v6654_v62 = vpop.f32.mrb[6].mxu1  ;;  %v8987_v54 = vcombine.low %v782_v33, %v786_v34  ;;  %v814_v27 = vld [vmem:[%s10680_s13 + $0xe88] sm:$0xff]  ;;  %v8892_v33 = vcombine.high %v686_v25, %v690_v26 }
 0x1ee   : > { %v6612_v53 = vadd.f32 %v6611_v47, %v11052_v58  ;;  %v6613_v56 = vpop.f32.mrb[6].mxu0  ;;  %v6655_v58 = vpop.f32.mrb[7].mxu1  ;;  %v818_v28 = vld [vmem:[%s10680_s13 + $0xea8] sm:$0xff] }
 0x1ef   : > { %6914 = vmatpush1.bf16.msra.mxu0 %v8851_v35  ;;  %v11124_v61 = vadd.f32 %v6650_v46, %v6610_v44  ;;  %6955 = vmatpush1.bf16.msra.mxu1 %v8979_v36  ;;  %v6614_v63 = vpop.f32.mrb[7].mxu0  ;;  %v9020_v34 = vcombine.high %v814_v27, %v818_v28  ;;  %v694_v35 = vld [vmem:[%s10680_s13 + $0xac8] sm:$0xff]  ;;  %v9019_v42 = vcombine.low %v814_v27, %v818_v28 }
 0x1f0   : > { %6915 = vmatprep.subr.bf16.mxu0 %v8860_v38  ;;  %v11126_v1 = vadd.f32 %v6652_v55, %v6612_v53  ;;  %6956 = vmatprep.subr.bf16.mxu1 %v8988_v40  ;;  %v698_v36 = vld [vmem:[%s10680_s13 + $0xae8] sm:$0xff]  ;;  %v8891_v40 = vcombine.low %v686_v25, %v690_v26 }
 0x1f1   : > { %v822_v38 = vld [vmem:[%s10680_s13 + $0xec8] sm:$0xff]  ;;  %v8900_v43 = vcombine.high %v694_v35, %v698_v36  ;;  %v8899_v53 = vcombine.low %v694_v35, %v698_v36 }
 0x1f2   : > { %v826_v39 = vld [vmem:[%s10680_s13 + $0xee8] sm:$0xff] }
 0x1f3   : > { %6916 = vmatpush1.bf16.msra.mxu0 %v8859_v57  ;;  %6957 = vmatpush1.bf16.msra.mxu1 %v8987_v54  ;;  %v9028_v44 = vcombine.high %v822_v38, %v826_v39  ;;  %v702_v46 = vld [vmem:[%s10680_s13 + $0xb08] sm:$0xff]  ;;  %v9027_v55 = vcombine.low %v822_v38, %v826_v39  ;;  %v9036_v57 = vcombine.high %v830_v50, %v834_v51 }
 0x1f4   : > { %6917 = vmatprep.subr.bf16.mxu0 %v8868_v0  ;;  %6958 = vmatprep.subr.bf16.mxu1 %v8996_v2  ;;  %v706_v47 = vld [vmem:[%s10680_s13 + $0xb28] sm:$0xff]  ;;  %v9035_v2 = vcombine.low %v830_v50, %v834_v51 }
 0x1f5   : > { %v8908_v56 = vcombine.high %v702_v46, %v706_v47  ;;  %v710_v62 = vld [vmem:[%s10680_s13 + $0xb48] sm:$0xff]  ;;  %v8907_v58 = vcombine.low %v702_v46, %v706_v47 }
 0x1f6   : > { %v714_v63 = vld [vmem:[%s10680_s13 + $0xb68] sm:$0xff] }
 0x1f7   : > { %6918 = vmatpush1.bf16.msra.mxu0 %v8867_v9  ;;  %6959 = vmatpush1.bf16.msra.mxu1 %v8995_v10  ;;  %v838_v54 = vld [vmem:[%s10680_s13 + $0xf48] sm:$0xff]  ;;  %v8916_v4 = vcombine.high %v710_v62, %v714_v63 }
 0x1f8   : > { %6919 = vmatprep.subr.bf16.mxu0 %v8876_v11  ;;  %6960 = vmatprep.subr.bf16.mxu1 %v9004_v12  ;;  %v842_v0 = vld [vmem:[%s10680_s13 + $0xf68] sm:$0xff]  ;;  %v8915_v11 = vcombine.low %v710_v62, %v714_v63 }
 0x1f9   : > { %v9044_v5 = vcombine.high %v838_v54, %v842_v0  ;;  %v718_v6 = vld [vmem:[%s10680_s13 + $0xb88] sm:$0xff]  ;;  %v9043_v12 = vcombine.low %v838_v54, %v842_v0 }
 0x1fa   : > { %v722_v8 = vld [vmem:[%s10680_s13 + $0xba8] sm:$0xff] }
 0x1fb   : > { %6920 = vmatpush1.bf16.msra.mxu0 %v8875_v20  ;;  %6961 = vmatpush1.bf16.msra.mxu1 %v9003_v22  ;;  %v846_v9 = vld [vmem:[%s10680_s13 + $0xf88] sm:$0xff]  ;;  %v8924_v13 = vcombine.high %v718_v6, %v722_v8 }
 0x1fc   : > { %6921 = vmatprep.subr.bf16.mxu0 %v8884_v23  ;;  %6962 = vmatprep.subr.bf16.mxu1 %v9012_v24  ;;  %v850_v10 = vld [vmem:[%s10680_s13 + $0xfa8] sm:$0xff]  ;;  %v8923_v23 = vcombine.low %v718_v6, %v722_v8 }
 0x1fd   : > { %v9052_v14 = vcombine.high %v846_v9, %v850_v10  ;;  %v726_v16 = vld [vmem:[%s10680_s13 + $0xbc8] sm:$0xff]  ;;  %v9051_v24 = vcombine.low %v846_v9, %v850_v10 }
 0x1fe   : > { %v730_v18 = vld [vmem:[%s10680_s13 + $0xbe8] sm:$0xff] }
 0x1ff   : > { %6922 = vmatpush1.bf16.msra.mxu0 %v8883_v30  ;;  %6963 = vmatpush1.bf16.msra.mxu1 %v9011_v31  ;;  %v854_v20 = vld [vmem:[%s10680_s13 + $0xfc8] sm:$0xff]  ;;  %v8932_v25 = vcombine.high %v726_v16, %v730_v18 }
 0x200   : > { %6923 = vmatprep.subr.bf16.mxu0 %v8892_v33  ;;  %6964 = vmatprep.subr.bf16.mxu1 %v9020_v34  ;;  %v858_v22 = vld [vmem:[%s10680_s13 + $0xfe8] sm:$0xff]  ;;  %v8931_v33 = vcombine.low %v726_v16, %v730_v18 }
 0x201   : > { %v9060_v26 = vcombine.high %v854_v20, %v858_v22  ;;  %v862_v27 = vld [vmem:[%s10680_s13 + $0x1008] sm:$0xff]  ;;  %v9059_v34 = vcombine.low %v854_v20, %v858_v22 }
 0x202   : > { %v866_v28 = vld [vmem:[%s10680_s13 + $0x1028] sm:$0xff] }
 0x203   : > { %6924 = vmatpush1.bf16.msra.mxu0 %v8891_v40  ;;  %6965 = vmatpush1.bf16.msra.mxu1 %v9019_v42  ;;  %v990_v30 = vld [vmem:[%s10680_s13 + $0x1408] sm:$0xff]  ;;  %v9068_v35 = vcombine.high %v862_v27, %v866_v28 }
 0x204   : > { %6925 = vmatprep.subr.bf16.mxu0 %v8900_v43  ;;  %6966 = vmatprep.subr.bf16.mxu1 %v9028_v44  ;;  %v994_v31 = vld [vmem:[%s10680_s13 + $0x1428] sm:$0xff]  ;;  %v9067_v43 = vcombine.low %v862_v27, %v866_v28 }
 0x205   : > { %v9196_v36 = vcombine.high %v990_v30, %v994_v31  ;;  %v870_v38 = vld [vmem:[%s10680_s13 + $0x1048] sm:$0xff]  ;;  %v9195_v44 = vcombine.low %v990_v30, %v994_v31 }
 0x206   : > { %v874_v39 = vld [vmem:[%s10680_s13 + $0x1068] sm:$0xff] }
 0x207   : > { %6926 = vmatpush1.bf16.msra.mxu0 %v8899_v53  ;;  %6967 = vmatpush1.bf16.msra.mxu1 %v9027_v55  ;;  %v998_v40 = vld [vmem:[%s10680_s13 + $0x1448] sm:$0xff]  ;;  %v9076_v46 = vcombine.high %v870_v38, %v874_v39 }
 0x208   : > { %6927 = vmatprep.subr.bf16.mxu0 %v8908_v56  ;;  %6968 = vmatprep.subr.bf16.mxu1 %v9036_v57  ;;  %v1002_v42 = vld [vmem:[%s10680_s13 + $0x1468] sm:$0xff]  ;;  %v9075_v56 = vcombine.low %v870_v38, %v874_v39 }
 0x209   : > { %v9204_v47 = vcombine.high %v998_v40, %v1002_v42  ;;  %v878_v50 = vld [vmem:[%s10680_s13 + $0x1088] sm:$0xff]  ;;  %v9203_v57 = vcombine.low %v998_v40, %v1002_v42 }
 0x20a   : > { %v882_v51 = vld [vmem:[%s10680_s13 + $0x10a8] sm:$0xff] }
 0x20b   : > { %6928 = vmatpush1.bf16.msra.mxu0 %v8907_v58  ;;  %6969 = vmatpush1.bf16.msra.mxu1 %v9035_v2  ;;  %v1006_v53 = vld [vmem:[%s10680_s13 + $0x1488] sm:$0xff]  ;;  %v9084_v62 = vcombine.high %v878_v50, %v882_v51 }
 0x20c   : > { %6929 = vmatprep.subr.bf16.mxu0 %v8916_v4  ;;  %6970 = vmatprep.subr.bf16.mxu1 %v9044_v5  ;;  %v1010_v55 = vld [vmem:[%s10680_s13 + $0x14a8] sm:$0xff]  ;;  %v9083_v4 = vcombine.low %v878_v50, %v882_v51 }
 0x20d   : > { %v9212_v63 = vcombine.high %v1006_v53, %v1010_v55  ;;  %v886_v54 = vld [vmem:[%s10680_s13 + $0x10c8] sm:$0xff]  ;;  %v9211_v5 = vcombine.low %v1006_v53, %v1010_v55 }
 0x20e   : > { %v890_v0 = vld [vmem:[%s10680_s13 + $0x10e8] sm:$0xff] }
 0x20f   : > { %6930 = vmatpush1.bf16.msra.mxu0 %v8915_v11  ;;  %6971 = vmatpush1.bf16.msra.mxu1 %v9043_v12  ;;  %v1014_v58 = vld [vmem:[%s10680_s13 + $0x14c8] sm:$0xff]  ;;  %v9092_v6 = vcombine.high %v886_v54, %v890_v0 }
 0x210   : > { %6931 = vmatprep.subr.bf16.mxu0 %v8924_v13  ;;  %6972 = vmatprep.subr.bf16.mxu1 %v9052_v14  ;;  %v1018_v2 = vld [vmem:[%s10680_s13 + $0x14e8] sm:$0xff]  ;;  %v9091_v13 = vcombine.low %v886_v54, %v890_v0 }
 0x211   : > { %v9220_v8 = vcombine.high %v1014_v58, %v1018_v2  ;;  %v894_v9 = vld [vmem:[%s10680_s13 + $0x1108] sm:$0xff]  ;;  %v9219_v14 = vcombine.low %v1014_v58, %v1018_v2 }
 0x212   : > { %v898_v10 = vld [vmem:[%s10680_s13 + $0x1128] sm:$0xff] }
 0x213   : > { %6932 = vmatpush1.bf16.msra.mxu0 %v8923_v23  ;;  %6973 = vmatpush1.bf16.msra.mxu1 %v9051_v24  ;;  %v1022_v11 = vld [vmem:[%s10680_s13 + $0x1508] sm:$0xff]  ;;  %v9100_v16 = vcombine.high %v894_v9, %v898_v10 }
 0x214   : > { %6933 = vmatprep.subr.bf16.mxu0 %v8932_v25  ;;  %6974 = vmatprep.subr.bf16.mxu1 %v9060_v26  ;;  %v1026_v12 = vld [vmem:[%s10680_s13 + $0x1528] sm:$0xff]  ;;  %v9099_v25 = vcombine.low %v894_v9, %v898_v10 }
 0x215   : > { %v9228_v18 = vcombine.high %v1022_v11, %v1026_v12  ;;  %v902_v20 = vld [vmem:[%s10680_s13 + $0x1148] sm:$0xff]  ;;  %v9227_v26 = vcombine.low %v1022_v11, %v1026_v12 }
 0x216   : > { %v906_v22 = vld [vmem:[%s10680_s13 + $0x1168] sm:$0xff] }
 0x217   : > { %6934 = vmatpush1.bf16.msra.mxu0 %v8931_v33  ;;  %6975 = vmatpush1.bf16.msra.mxu1 %v9059_v34  ;;  %v1030_v23 = vld [vmem:[%s10680_s13 + $0x1548] sm:$0xff]  ;;  %v9108_v27 = vcombine.high %v902_v20, %v906_v22 }
 0x218   : > { %6985 = vmatprep.subr.bf16.mxu0 %v9068_v35  ;;  %7026 = vmatprep.subr.bf16.mxu1 %v9196_v36  ;;  %v1034_v24 = vld [vmem:[%s10680_s13 + $0x1568] sm:$0xff]  ;;  %v9107_v35 = vcombine.low %v902_v20, %v906_v22 }
 0x219   : > { %v9236_v28 = vcombine.high %v1030_v23, %v1034_v24  ;;  %v910_v30 = vld [vmem:[%s10680_s13 + $0x1188] sm:$0xff]  ;;  %v9235_v36 = vcombine.low %v1030_v23, %v1034_v24 }
 0x21a   : > { %6936 = vmatmul.mubr.bf16.vlgmr.msra.gmra.mrb[20].mxu0 %v10856_v37  ;;  %6977 = vmatmul.mubr.bf16.vlgmr.msra.gmra.mrb[20].mxu1 %v10861_v41  ;;  %v914_v31 = vld [vmem:[%s10680_s13 + $0x11a8] sm:$0xff] }
 0x21b   : > { %6986 = vmatpush1.bf16.msra.mxu0 %v9067_v43  ;;  %7027 = vmatpush1.bf16.msra.mxu1 %v9195_v44  ;;  %v1038_v33 = vld [vmem:[%s10680_s13 + $0x1588] sm:$0xff]  ;;  %v9116_v38 = vcombine.high %v910_v30, %v914_v31 }
 0x21c   : > { %6987 = vmatprep.subr.bf16.mxu0 %v9076_v46  ;;  %7028 = vmatprep.subr.bf16.mxu1 %v9204_v47  ;;  %v1042_v34 = vld [vmem:[%s10680_s13 + $0x15a8] sm:$0xff] }
 0x21d   : > { %7017 = vmatprep.mubr.bf16.mxu0 %v10866_v49  ;;  %7058 = vmatprep.mubr.bf16.mxu1 %v10871_v52  ;;  %v9244_v40 = vcombine.high %v1038_v33, %v1042_v34  ;;  %v918_v42 = vld [vmem:[%s10680_s13 + $0x11c8] sm:$0xff] }
 0x21e   : > { %v922_v43 = vld [vmem:[%s10680_s13 + $0x11e8] sm:$0xff] }
 0x21f   : > { %6988 = vmatpush1.bf16.msra.mxu0 %v9075_v56  ;;  %7029 = vmatpush1.bf16.msra.mxu1 %v9203_v57  ;;  %v1046_v50 = vld [vmem:[%s10680_s13 + $0x15c8] sm:$0xff]  ;;  %v9115_v57 = vcombine.low %v910_v30, %v914_v31  ;;  %v9124_v0 = vcombine.high %v918_v42, %v922_v43  ;;  %v9123_v9 = vcombine.low %v918_v42, %v922_v43 }
 0x220   : > { %6989 = vmatprep.subr.bf16.mxu0 %v9084_v62  ;;  %7030 = vmatprep.subr.bf16.mxu1 %v9212_v63  ;;  %v1050_v51 = vld [vmem:[%s10680_s13 + $0x15e8] sm:$0xff] }
 0x221   : > { %v9252_v2 = vcombine.high %v1046_v50, %v1050_v51  ;;  %v9251_v10 = vcombine.low %v1046_v50, %v1050_v51  ;;  %v1086_v50 = vld [vmem:[%s10680_s13 + $0x1708] sm:$0xff] }
 0x222   : > { %v1090_v51 = vld [vmem:[%s10680_s13 + $0x1728] sm:$0xff] }
 0x223   : > { %6990 = vmatpush1.bf16.msra.mxu0 %v9083_v4  ;;  %7031 = vmatpush1.bf16.msra.mxu1 %v9211_v5  ;;  %v926_v4 = vld [vmem:[%s10680_s13 + $0x1208] sm:$0xff] }
 0x224   : > { %6991 = vmatprep.subr.bf16.mxu0 %v9092_v6  ;;  %7032 = vmatprep.subr.bf16.mxu1 %v9220_v8  ;;  %v930_v5 = vld [vmem:[%s10680_s13 + $0x1228] sm:$0xff] }
 0x225   : > { %v1054_v6 = vld [vmem:[%s10680_s13 + $0x1608] sm:$0xff]  ;;  %v9132_v11 = vcombine.high %v926_v4, %v930_v5  ;;  %v9131_v20 = vcombine.low %v926_v4, %v930_v5 }
 0x226   : > { %v1058_v8 = vld [vmem:[%s10680_s13 + $0x1628] sm:$0xff] }
 0x227   : > { %6992 = vmatpush1.bf16.msra.mxu0 %v9091_v13  ;;  %7033 = vmatpush1.bf16.msra.mxu1 %v9219_v14  ;;  %v9260_v12 = vcombine.high %v1054_v6, %v1058_v8  ;;  %v934_v13 = vld [vmem:[%s10680_s13 + $0x1248] sm:$0xff]  ;;  %v9259_v22 = vcombine.low %v1054_v6, %v1058_v8 }
 0x228   : > { %6993 = vmatprep.subr.bf16.mxu0 %v9100_v16  ;;  %7034 = vmatprep.subr.bf16.mxu1 %v9228_v18  ;;  %v938_v14 = vld [vmem:[%s10680_s13 + $0x1268] sm:$0xff] }
 0x229   : > { %v1062_v16 = vld [vmem:[%s10680_s13 + $0x1648] sm:$0xff]  ;;  %v9140_v23 = vcombine.high %v934_v13, %v938_v14  ;;  %v9139_v30 = vcombine.low %v934_v13, %v938_v14 }
 0x22a   : > { %v1066_v18 = vld [vmem:[%s10680_s13 + $0x1668] sm:$0xff] }
 0x22b   : > { %6994 = vmatpush1.bf16.msra.mxu0 %v9099_v25  ;;  %7035 = vmatpush1.bf16.msra.mxu1 %v9227_v26  ;;  %v9268_v24 = vcombine.high %v1062_v16, %v1066_v18  ;;  %v942_v25 = vld [vmem:[%s10680_s13 + $0x1288] sm:$0xff]  ;;  %v9267_v31 = vcombine.low %v1062_v16, %v1066_v18 }
 0x22c   : > { %6995 = vmatprep.subr.bf16.mxu0 %v9108_v27  ;;  %7036 = vmatprep.subr.bf16.mxu1 %v9236_v28  ;;  %v6732_v46 = vpop.f32.mrb[8].mxu1  ;;  %v946_v26 = vld [vmem:[%s10680_s13 + $0x12a8] sm:$0xff] }
 0x22d   : > { %v6691_v39 = vpop.f32.mrb[8].mxu0  ;;  %v6734_v55 = vpop.f32.mrb[9].mxu1  ;;  %v1070_v27 = vld [vmem:[%s10680_s13 + $0x1688] sm:$0xff] }
 0x22e   : > { %v6692_v44 = vadd.f32 %v6691_v39, %v11124_v61  ;;  %v6693_v47 = vpop.f32.mrb[9].mxu0  ;;  %v6736_v63 = vpop.f32.mrb[10].mxu1  ;;  %v9243_v61 = vcombine.low %v1038_v33, %v1042_v34  ;;  %v1074_v28 = vld [vmem:[%s10680_s13 + $0x16a8] sm:$0xff]  ;;  %v9148_v33 = vcombine.high %v942_v25, %v946_v26 }
 0x22f   : > { %v6694_v53 = vadd.f32 %v6693_v47, %v11126_v1  ;;  %v6695_v56 = vpop.f32.mrb[10].mxu0  ;;  %6996 = vmatpush1.bf16.msra.mxu0 %v9107_v35  ;;  %7037 = vmatpush1.bf16.msra.mxu1 %v9235_v36  ;;  %v6737_v1 = vpop.f32.mrb[11].mxu1  ;;  %v9276_v34 = vcombine.high %v1070_v27, %v1074_v28  ;;  %v950_v35 = vld [vmem:[%s10680_s13 + $0x12c8] sm:$0xff]  ;;  %v9275_v42 = vcombine.low %v1070_v27, %v1074_v28 }
 0x230   : > { %v11198_v62 = vadd.f32 %v6732_v46, %v6692_v44  ;;  %v6696_v54 = vpop.f32.mrb[11].mxu0  ;;  %6997 = vmatprep.subr.bf16.mxu0 %v9116_v38  ;;  %7038 = vmatprep.subr.bf16.mxu1 %v9244_v40  ;;  %v954_v36 = vld [vmem:[%s10680_s13 + $0x12e8] sm:$0xff]  ;;  %v9147_v40 = vcombine.low %v942_v25, %v946_v26 }
 0x231   : > { %v11200_v58 = vadd.f32 %v6734_v55, %v6694_v53  ;;  %v1078_v38 = vld [vmem:[%s10680_s13 + $0x16c8] sm:$0xff]  ;;  %v9156_v43 = vcombine.high %v950_v35, %v954_v36  ;;  %v9155_v53 = vcombine.low %v950_v35, %v954_v36 }
 0x232   : > { %v1082_v39 = vld [vmem:[%s10680_s13 + $0x16e8] sm:$0xff] }
 0x233   : > { %6998 = vmatpush1.bf16.msra.mxu0 %v9115_v57  ;;  %7039 = vmatpush1.bf16.msra.mxu1 %v9243_v61  ;;  %v9284_v44 = vcombine.high %v1078_v38, %v1082_v39  ;;  %v958_v46 = vld [vmem:[%s10680_s13 + $0x1308] sm:$0xff]  ;;  %v9283_v55 = vcombine.low %v1078_v38, %v1082_v39  ;;  %v9292_v57 = vcombine.high %v1086_v50, %v1090_v51 }
 0x234   : > { %6999 = vmatprep.subr.bf16.mxu0 %v9124_v0  ;;  %7040 = vmatprep.subr.bf16.mxu1 %v9252_v2  ;;  %v962_v47 = vld [vmem:[%s10680_s13 + $0x1328] sm:$0xff]  ;;  %v9291_v2 = vcombine.low %v1086_v50, %v1090_v51 }
 0x235   : > { %v9164_v56 = vcombine.high %v958_v46, %v962_v47  ;;  %v966_v63 = vld [vmem:[%s10680_s13 + $0x1348] sm:$0xff]  ;;  %v9163_v1 = vcombine.low %v958_v46, %v962_v47 }
 0x236   : > { %v970_v54 = vld [vmem:[%s10680_s13 + $0x1368] sm:$0xff] }
 0x237   : > { %7000 = vmatpush1.bf16.msra.mxu0 %v9123_v9  ;;  %7041 = vmatpush1.bf16.msra.mxu1 %v9251_v10  ;;  %v1094_v61 = vld [vmem:[%s10680_s13 + $0x1748] sm:$0xff]  ;;  %v9172_v4 = vcombine.high %v966_v63, %v970_v54 }
 0x238   : > { %7001 = vmatprep.subr.bf16.mxu0 %v9132_v11  ;;  %7042 = vmatprep.subr.bf16.mxu1 %v9260_v12  ;;  %v1098_v0 = vld [vmem:[%s10680_s13 + $0x1768] sm:$0xff]  ;;  %v9171_v11 = vcombine.low %v966_v63, %v970_v54 }
 0x239   : > { %v9300_v5 = vcombine.high %v1094_v61, %v1098_v0  ;;  %v974_v6 = vld [vmem:[%s10680_s13 + $0x1388] sm:$0xff]  ;;  %v9299_v12 = vcombine.low %v1094_v61, %v1098_v0 }
 0x23a   : > { %v978_v8 = vld [vmem:[%s10680_s13 + $0x13a8] sm:$0xff] }
 0x23b   : > { %7002 = vmatpush1.bf16.msra.mxu0 %v9131_v20  ;;  %7043 = vmatpush1.bf16.msra.mxu1 %v9259_v22  ;;  %v1102_v9 = vld [vmem:[%s10680_s13 + $0x1788] sm:$0xff]  ;;  %v9180_v13 = vcombine.high %v974_v6, %v978_v8 }
 0x23c   : > { %7003 = vmatprep.subr.bf16.mxu0 %v9140_v23  ;;  %7044 = vmatprep.subr.bf16.mxu1 %v9268_v24  ;;  %v1106_v10 = vld [vmem:[%s10680_s13 + $0x17a8] sm:$0xff]  ;;  %v9179_v23 = vcombine.low %v974_v6, %v978_v8 }
 0x23d   : > { %v9308_v14 = vcombine.high %v1102_v9, %v1106_v10  ;;  %v982_v16 = vld [vmem:[%s10680_s13 + $0x13c8] sm:$0xff]  ;;  %v9307_v24 = vcombine.low %v1102_v9, %v1106_v10 }
 0x23e   : > { %v986_v18 = vld [vmem:[%s10680_s13 + $0x13e8] sm:$0xff] }
 0x23f   : > { %7004 = vmatpush1.bf16.msra.mxu0 %v9139_v30  ;;  %7045 = vmatpush1.bf16.msra.mxu1 %v9267_v31  ;;  %v1110_v20 = vld [vmem:[%s10680_s13 + $0x17c8] sm:$0xff]  ;;  %v9188_v25 = vcombine.high %v982_v16, %v986_v18 }
 0x240   : > { %7005 = vmatprep.subr.bf16.mxu0 %v9148_v33  ;;  %7046 = vmatprep.subr.bf16.mxu1 %v9276_v34  ;;  %v1114_v22 = vld [vmem:[%s10680_s13 + $0x17e8] sm:$0xff]  ;;  %v9187_v33 = vcombine.low %v982_v16, %v986_v18 }
 0x241   : > { %v9316_v26 = vcombine.high %v1110_v20, %v1114_v22  ;;  %v1118_v27 = vld [vmem:[%s10680_s13 + $0x1808] sm:$0xff]  ;;  %v9315_v34 = vcombine.low %v1110_v20, %v1114_v22 }
 0x242   : > { %v1122_v28 = vld [vmem:[%s10680_s13 + $0x1828] sm:$0xff] }
 0x243   : > { %7006 = vmatpush1.bf16.msra.mxu0 %v9147_v40  ;;  %7047 = vmatpush1.bf16.msra.mxu1 %v9275_v42  ;;  %v1246_v30 = vld [vmem:[%s10680_s13 + $0x1c08] sm:$0xff]  ;;  %v9324_v35 = vcombine.high %v1118_v27, %v1122_v28 }
 0x244   : > { %7007 = vmatprep.subr.bf16.mxu0 %v9156_v43  ;;  %7048 = vmatprep.subr.bf16.mxu1 %v9284_v44  ;;  %v1250_v31 = vld [vmem:[%s10680_s13 + $0x1c28] sm:$0xff]  ;;  %v9323_v43 = vcombine.low %v1118_v27, %v1122_v28 }
 0x245   : > { %v9452_v36 = vcombine.high %v1246_v30, %v1250_v31  ;;  %v1126_v38 = vld [vmem:[%s10680_s13 + $0x1848] sm:$0xff]  ;;  %v9451_v44 = vcombine.low %v1246_v30, %v1250_v31 }
 0x246   : > { %v1130_v39 = vld [vmem:[%s10680_s13 + $0x1868] sm:$0xff] }
 0x247   : > { %7008 = vmatpush1.bf16.msra.mxu0 %v9155_v53  ;;  %7049 = vmatpush1.bf16.msra.mxu1 %v9283_v55  ;;  %v1254_v40 = vld [vmem:[%s10680_s13 + $0x1c48] sm:$0xff]  ;;  %v9332_v46 = vcombine.high %v1126_v38, %v1130_v39 }
 0x248   : > { %7009 = vmatprep.subr.bf16.mxu0 %v9164_v56  ;;  %7050 = vmatprep.subr.bf16.mxu1 %v9292_v57  ;;  %v1258_v42 = vld [vmem:[%s10680_s13 + $0x1c68] sm:$0xff]  ;;  %v9331_v56 = vcombine.low %v1126_v38, %v1130_v39 }
 0x249   : > { %v9460_v47 = vcombine.high %v1254_v40, %v1258_v42  ;;  %v1134_v50 = vld [vmem:[%s10680_s13 + $0x1888] sm:$0xff]  ;;  %v9459_v57 = vcombine.low %v1254_v40, %v1258_v42 }
 0x24a   : > { %v1138_v51 = vld [vmem:[%s10680_s13 + $0x18a8] sm:$0xff] }
 0x24b   : > { %7010 = vmatpush1.bf16.msra.mxu0 %v9163_v1  ;;  %7051 = vmatpush1.bf16.msra.mxu1 %v9291_v2  ;;  %v1262_v53 = vld [vmem:[%s10680_s13 + $0x1c88] sm:$0xff]  ;;  %v9340_v63 = vcombine.high %v1134_v50, %v1138_v51 }
 0x24c   : > { %7011 = vmatprep.subr.bf16.mxu0 %v9172_v4  ;;  %7052 = vmatprep.subr.bf16.mxu1 %v9300_v5  ;;  %v1266_v55 = vld [vmem:[%s10680_s13 + $0x1ca8] sm:$0xff]  ;;  %v9339_v4 = vcombine.low %v1134_v50, %v1138_v51 }
 0x24d   : > { %v9468_v54 = vcombine.high %v1262_v53, %v1266_v55  ;;  %v1142_v61 = vld [vmem:[%s10680_s13 + $0x18c8] sm:$0xff]  ;;  %v9467_v5 = vcombine.low %v1262_v53, %v1266_v55  ;;  %v309_v53 = vld [vmem:[#allocation2] sm:$0xff] }
 0x24e   : > { %v1146_v0 = vld [vmem:[%s10680_s13 + $0x18e8] sm:$0xff] }
 0x24f   : > { %7012 = vmatpush1.bf16.msra.mxu0 %v9171_v11  ;;  %7053 = vmatpush1.bf16.msra.mxu1 %v9299_v12  ;;  %v1270_v1 = vld [vmem:[%s10680_s13 + $0x1cc8] sm:$0xff]  ;;  %v9348_v6 = vcombine.high %v1142_v61, %v1146_v0 }
 0x250   : > { %7013 = vmatprep.subr.bf16.mxu0 %v9180_v13  ;;  %7054 = vmatprep.subr.bf16.mxu1 %v9308_v14  ;;  %v1274_v2 = vld [vmem:[%s10680_s13 + $0x1ce8] sm:$0xff]  ;;  %v9347_v13 = vcombine.low %v1142_v61, %v1146_v0 }
 0x251   : > { %v9476_v8 = vcombine.high %v1270_v1, %v1274_v2  ;;  %v1150_v9 = vld [vmem:[%s10680_s13 + $0x1908] sm:$0xff]  ;;  %v9475_v14 = vcombine.low %v1270_v1, %v1274_v2 }
 0x252   : > { %v1154_v10 = vld [vmem:[%s10680_s13 + $0x1928] sm:$0xff] }
 0x253   : > { %7014 = vmatpush1.bf16.msra.mxu0 %v9179_v23  ;;  %7055 = vmatpush1.bf16.msra.mxu1 %v9307_v24  ;;  %v1278_v11 = vld [vmem:[%s10680_s13 + $0x1d08] sm:$0xff]  ;;  %v9356_v16 = vcombine.high %v1150_v9, %v1154_v10 }
 0x254   : > { %7015 = vmatprep.subr.bf16.mxu0 %v9188_v25  ;;  %7056 = vmatprep.subr.bf16.mxu1 %v9316_v26  ;;  %v1282_v12 = vld [vmem:[%s10680_s13 + $0x1d28] sm:$0xff]  ;;  %v9355_v25 = vcombine.low %v1150_v9, %v1154_v10 }
 0x255   : > { %v9484_v18 = vcombine.high %v1278_v11, %v1282_v12  ;;  %v1158_v20 = vld [vmem:[%s10680_s13 + $0x1948] sm:$0xff]  ;;  %v9483_v26 = vcombine.low %v1278_v11, %v1282_v12 }
 0x256   : > { %v1162_v22 = vld [vmem:[%s10680_s13 + $0x1968] sm:$0xff] }
 0x257   : > { %7016 = vmatpush1.bf16.msra.mxu0 %v9187_v33  ;;  %7057 = vmatpush1.bf16.msra.mxu1 %v9315_v34  ;;  %v1286_v23 = vld [vmem:[%s10680_s13 + $0x1d48] sm:$0xff]  ;;  %v9364_v27 = vcombine.high %v1158_v20, %v1162_v22 }
 0x258   : > { %7067 = vmatprep.subr.bf16.mxu0 %v9324_v35  ;;  %7108 = vmatprep.subr.bf16.mxu1 %v9452_v36  ;;  %v1290_v24 = vld [vmem:[%s10680_s13 + $0x1d68] sm:$0xff]  ;;  %v9363_v35 = vcombine.low %v1158_v20, %v1162_v22 }
 0x259   : > { %v9492_v28 = vcombine.high %v1286_v23, %v1290_v24  ;;  %v1166_v30 = vld [vmem:[%s10680_s13 + $0x1988] sm:$0xff]  ;;  %v9491_v36 = vcombine.low %v1286_v23, %v1290_v24 }
 0x25a   : > { %7018 = vmatmul.mubr.bf16.vlgmr.msra.gmra.mrb[24].mxu0 %v10936_v3  ;;  %7059 = vmatmul.mubr.bf16.vlgmr.msra.gmra.mrb[24].mxu1 %v10941_v7  ;;  %v1170_v31 = vld [vmem:[%s10680_s13 + $0x19a8] sm:$0xff] }
 0x25b   : > { %7068 = vmatpush1.bf16.msra.mxu0 %v9323_v43  ;;  %7109 = vmatpush1.bf16.msra.mxu1 %v9451_v44  ;;  %v1294_v33 = vld [vmem:[%s10680_s13 + $0x1d88] sm:$0xff]  ;;  %v9372_v38 = vcombine.high %v1166_v30, %v1170_v31 }
 0x25c   : > { %7069 = vmatprep.subr.bf16.mxu0 %v9332_v46  ;;  %7110 = vmatprep.subr.bf16.mxu1 %v9460_v47  ;;  %v1298_v34 = vld [vmem:[%s10680_s13 + $0x1da8] sm:$0xff] }
 0x25d   : > { %7099 = vmatprep.mubr.bf16.mxu0 %v10946_v15  ;;  %7140 = vmatprep.mubr.bf16.mxu1 %v10951_v19  ;;  %v9500_v40 = vcombine.high %v1294_v33, %v1298_v34  ;;  %v1174_v42 = vld [vmem:[%s10680_s13 + $0x19c8] sm:$0xff]  ;;  %v9499_v1 = vcombine.low %v1294_v33, %v1298_v34 }
 0x25e   : > { %v1178_v43 = vld [vmem:[%s10680_s13 + $0x19e8] sm:$0xff] }
 0x25f   : > { %7070 = vmatpush1.bf16.msra.mxu0 %v9331_v56  ;;  %7111 = vmatpush1.bf16.msra.mxu1 %v9459_v57  ;;  %v1302_v50 = vld [vmem:[%s10680_s13 + $0x1dc8] sm:$0xff]  ;;  %v9380_v2 = vcombine.high %v1174_v42, %v1178_v43 }
 0x260   : > { %7071 = vmatprep.subr.bf16.mxu0 %v9340_v63  ;;  %7112 = vmatprep.subr.bf16.mxu1 %v9468_v54  ;;  %v1306_v51 = vld [vmem:[%s10680_s13 + $0x1de8] sm:$0xff]  ;;  %v9371_v63 = vcombine.low %v1166_v30, %v1170_v31 }
 0x261   : > { %v310_v61 = vld [vmem:[#allocation2 + $0x8] sm:$0xff] }
 0x262   : > { %v1310_v10 = vld [vmem:[%s10680_s13 + $0x1e08] sm:$0xff] }
 0x263   : > { %7072 = vmatpush1.bf16.msra.mxu0 %v9339_v4  ;;  %7113 = vmatpush1.bf16.msra.mxu1 %v9467_v5  ;;  %v1314_v11 = vld [vmem:[%s10680_s13 + $0x1e28] sm:$0xff] }
 0x264   : > { %7073 = vmatprep.subr.bf16.mxu0 %v9348_v6  ;;  %7114 = vmatprep.subr.bf16.mxu1 %v9476_v8  ;;  %v1182_v6 = vld [vmem:[%s10680_s13 + $0x1a08] sm:$0xff] }
 0x265   : > { %v1186_v8 = vld [vmem:[%s10680_s13 + $0x1a28] sm:$0xff] }
 0x266   : > { %v1190_v20 = vld [vmem:[%s10680_s13 + $0x1a48] sm:$0xff] }
 0x267   : > { %7074 = vmatpush1.bf16.msra.mxu0 %v9347_v13  ;;  %7115 = vmatpush1.bf16.msra.mxu1 %v9475_v14  ;;  %v9379_v13 = vcombine.low %v1174_v42, %v1178_v43  ;;  %v9507_v14 = vcombine.low %v1302_v50, %v1306_v51  ;;  %v1194_v22 = vld [vmem:[%s10680_s13 + $0x1a68] sm:$0xff] }
 0x268   : > { %7075 = vmatprep.subr.bf16.mxu0 %v9356_v16  ;;  %7116 = vmatprep.subr.bf16.mxu1 %v9484_v18  ;;  %v9388_v16 = vcombine.high %v1182_v6, %v1186_v8  ;;  %v9516_v18 = vcombine.high %v1310_v10, %v1314_v11  ;;  %v1318_v23 = vld [vmem:[%s10680_s13 + $0x1e48] sm:$0xff] }
 0x269   : > { %v1322_v24 = vld [vmem:[%s10680_s13 + $0x1e68] sm:$0xff] }
 0x26a   : > { %v1198_v30 = vld [vmem:[%s10680_s13 + $0x1a88] sm:$0xff] }
 0x26b   : > { %7076 = vmatpush1.bf16.msra.mxu0 %v9355_v25  ;;  %7117 = vmatpush1.bf16.msra.mxu1 %v9483_v26  ;;  %v9387_v25 = vcombine.low %v1182_v6, %v1186_v8  ;;  %v9515_v26 = vcombine.low %v1310_v10, %v1314_v11  ;;  %v1202_v31 = vld [vmem:[%s10680_s13 + $0x1aa8] sm:$0xff] }
 0x26c   : > { %7077 = vmatprep.subr.bf16.mxu0 %v9364_v27  ;;  %7118 = vmatprep.subr.bf16.mxu1 %v9492_v28  ;;  %v9396_v27 = vcombine.high %v1190_v20, %v1194_v22  ;;  %v9524_v28 = vcombine.high %v1318_v23, %v1322_v24  ;;  %v1326_v33 = vld [vmem:[%s10680_s13 + $0x1e88] sm:$0xff] }
 0x26d   : > { %v6773_v39 = vpop.f32.mrb[12].mxu0  ;;  %v6814_v46 = vpop.f32.mrb[12].mxu1  ;;  %v1330_v34 = vld [vmem:[%s10680_s13 + $0x1ea8] sm:$0xff] }
 0x26e   : > { %v6774_v44 = vadd.f32 %v6773_v39, %v11198_v62  ;;  %v6775_v47 = vpop.f32.mrb[13].mxu0  ;;  %v6816_v56 = vpop.f32.mrb[13].mxu1  ;;  %v9532_v39 = vcombine.high %v1326_v33, %v1330_v34  ;;  %v1210_v42 = vld [vmem:[%s10680_s13 + $0x1ae8] sm:$0xff] }
 0x26f   : > { %v6776_v55 = vadd.f32 %v6775_v47, %v11200_v58  ;;  %v6777_v57 = vpop.f32.mrb[14].mxu0  ;;  %7078 = vmatpush1.bf16.msra.mxu0 %v9363_v35  ;;  %v6818_v0 = vpop.f32.mrb[14].mxu1  ;;  %7119 = vmatpush1.bf16.msra.mxu1 %v9491_v36  ;;  %v9508_v58 = vcombine.high %v1302_v50, %v1306_v51  ;;  %v9395_v35 = vcombine.low %v1190_v20, %v1194_v22  ;;  %v1334_v43 = vld [vmem:[%s10680_s13 + $0x1ec8] sm:$0xff] }
 0x270   : > { %v6815_v54 = vadd.f32 %v6814_v46, %v6774_v44  ;;  %v6778_v62 = vpop.f32.mrb[15].mxu0  ;;  %7079 = vmatprep.subr.bf16.mxu0 %v9372_v38  ;;  %v6819_v5 = vpop.f32.mrb[15].mxu1  ;;  %7120 = vmatprep.subr.bf16.mxu1 %v9500_v40  ;;  %v9523_v36 = vcombine.low %v1318_v23, %v1322_v24  ;;  %v9404_v38 = vcombine.high %v1198_v30, %v1202_v31  ;;  %v1206_v40 = vld [vmem:[%s10680_s13 + $0x1ac8] sm:$0xff] }
 0x271   : > { %v6817_v4 = vadd.f32 %v6816_v56, %v6776_v55  ;;  %v1338_v44 = vld [vmem:[%s10680_s13 + $0x1ee8] sm:$0xff]  ;;  %v9403_v46 = vcombine.low %v1198_v30, %v1202_v31  ;;  %v9531_v47 = vcombine.low %v1326_v33, %v1330_v34  ;;  %v9412_v50 = vcombine.high %v1206_v40, %v1210_v42  ;;  %v351_v30 = vld [vmem:[%s10680_s13 + $0x10] sm:$0xff] }
 0x272   : > { %v7805_v9 = vadd.f32 %v6815_v54, %v309_v53  ;;  %v9540_v51 = vcombine.high %v1334_v43, %v1338_v44  ;;  %v1214_v53 = vld [vmem:[%s10680_s13 + $0x1b08] sm:$0xff]  ;;  %v9539_v54 = vcombine.low %v1334_v43, %v1338_v44  ;;  %v355_v31 = vld [vmem:[%s10680_s13 + $0x30] sm:$0xff] }
 0x273   : > { %v7806_v12 = vadd.f32 %v6817_v4, %v310_v61  ;;  %7080 = vmatpush1.bf16.msra.mxu0 %v9371_v63  ;;  %7121 = vmatpush1.bf16.msra.mxu1 %v9499_v1  ;;  %v1218_v55 = vld [vmem:[%s10680_s13 + $0x1b28] sm:$0xff]  ;;  %v9411_v63 = vcombine.low %v1206_v40, %v1210_v42  ;;  %v479_v33 = vld [vmem:[%s10680_s13 + $0x410] sm:$0xff] }
 0x274   : > { %7813 = vst [vmem:[#allocation2] sm:$0xff] %v7805_v9  ;;  %7081 = vmatprep.subr.bf16.mxu0 %v9380_v2  ;;  %7122 = vmatprep.subr.bf16.mxu1 %v9508_v58  ;;  %v1342_v56 = vld [vmem:[%s10680_s13 + $0x1f08] sm:$0xff]  ;;  %v9420_v61 = vcombine.high %v1214_v53, %v1218_v55  ;;  %v9419_v5 = vcombine.low %v1214_v53, %v1218_v55  ;;  %v483_v34 = vld [vmem:[%s10680_s13 + $0x430] sm:$0xff] }
 0x275   : > { %7814 = vst [vmem:[#allocation2 + $0x8] sm:$0xff] %v7806_v12  ;;  %v1346_v57 = vld [vmem:[%s10680_s13 + $0x1f28] sm:$0xff]  ;;  %v359_v40 = vld [vmem:[%s10680_s13 + $0x50] sm:$0xff] }
 0x276   : > { %v9548_v0 = vcombine.high %v1342_v56, %v1346_v57  ;;  %v1222_v62 = vld [vmem:[%s10680_s13 + $0x1b48] sm:$0xff]  ;;  %v9547_v58 = vcombine.low %v1342_v56, %v1346_v57  ;;  %v363_v42 = vld [vmem:[%s10680_s13 + $0x70] sm:$0xff] }
 0x277   : > { %7082 = vmatpush1.bf16.msra.mxu0 %v9379_v13  ;;  %7123 = vmatpush1.bf16.msra.mxu1 %v9507_v14  ;;  %v1226_v1 = vld [vmem:[%s10680_s13 + $0x1b68] sm:$0xff]  ;;  %v487_v43 = vld [vmem:[%s10680_s13 + $0x450] sm:$0xff] }
 0x278   : > { %7083 = vmatprep.subr.bf16.mxu0 %v9388_v16  ;;  %7124 = vmatprep.subr.bf16.mxu1 %v9516_v18  ;;  %v1350_v2 = vld [vmem:[%s10680_s13 + $0x1f48] sm:$0xff]  ;;  %v9428_v6 = vcombine.high %v1222_v62, %v1226_v1  ;;  %v9427_v13 = vcombine.low %v1222_v62, %v1226_v1  ;;  %v491_v44 = vld [vmem:[%s10680_s13 + $0x470] sm:$0xff] }
 0x279   : > { %v1354_v4 = vld [vmem:[%s10680_s13 + $0x1f68] sm:$0xff]  ;;  %v367_v53 = vld [vmem:[%s10680_s13 + $0x90] sm:$0xff] }
 0x27a   : > { %v9556_v8 = vcombine.high %v1350_v2, %v1354_v4  ;;  %v1230_v9 = vld [vmem:[%s10680_s13 + $0x1b88] sm:$0xff]  ;;  %v9555_v14 = vcombine.low %v1350_v2, %v1354_v4  ;;  %v371_v55 = vld [vmem:[%s10680_s13 + $0xb0] sm:$0xff] }
 0x27b   : > { %7084 = vmatpush1.bf16.msra.mxu0 %v9387_v25  ;;  %7125 = vmatpush1.bf16.msra.mxu1 %v9515_v26  ;;  %v1234_v10 = vld [vmem:[%s10680_s13 + $0x1ba8] sm:$0xff]  ;;  %v495_v56 = vld [vmem:[%s10680_s13 + $0x490] sm:$0xff] }
 0x27c   : > { %7085 = vmatprep.subr.bf16.mxu0 %v9396_v27  ;;  %7126 = vmatprep.subr.bf16.mxu1 %v9524_v28  ;;  %v1358_v11 = vld [vmem:[%s10680_s13 + $0x1f88] sm:$0xff]  ;;  %v9436_v16 = vcombine.high %v1230_v9, %v1234_v10  ;;  %v9435_v25 = vcombine.low %v1230_v9, %v1234_v10  ;;  %v499_v57 = vld [vmem:[%s10680_s13 + $0x4b0] sm:$0xff] }
 0x27d   : > { %v1362_v12 = vld [vmem:[%s10680_s13 + $0x1fa8] sm:$0xff]  ;;  %v375_v62 = vld [vmem:[%s10680_s13 + $0xd0] sm:$0xff] }
 0x27e   : > { %v9564_v18 = vcombine.high %v1358_v11, %v1362_v12  ;;  %v1238_v20 = vld [vmem:[%s10680_s13 + $0x1bc8] sm:$0xff]  ;;  %v9563_v26 = vcombine.low %v1358_v11, %v1362_v12  ;;  %v379_v1 = vld [vmem:[%s10680_s13 + $0xf0] sm:$0xff] }
 0x27f   : > { %7086 = vmatpush1.bf16.msra.mxu0 %v9395_v35  ;;  %7127 = vmatpush1.bf16.msra.mxu1 %v9523_v36  ;;  %v1242_v22 = vld [vmem:[%s10680_s13 + $0x1be8] sm:$0xff]  ;;  %v503_v2 = vld [vmem:[%s10680_s13 + $0x4d0] sm:$0xff] }
 0x280   : > { %7087 = vmatprep.subr.bf16.mxu0 %v9404_v38  ;;  %7128 = vmatprep.subr.bf16.mxu1 %v9532_v39  ;;  %v1366_v23 = vld [vmem:[%s10680_s13 + $0x1fc8] sm:$0xff]  ;;  %v9444_v27 = vcombine.high %v1238_v20, %v1242_v22  ;;  %v9443_v35 = vcombine.low %v1238_v20, %v1242_v22  ;;  %v8558_v38 = vcombine.high %v351_v30, %v355_v31  ;;  %v507_v4 = vld [vmem:[%s10680_s13 + $0x4f0] sm:$0xff] }
 0x281   : > { %v1370_v24 = vld [vmem:[%s10680_s13 + $0x1fe8] sm:$0xff]  ;;  %v8686_v39 = vcombine.high %v479_v33, %v483_v34  ;;  %v383_v9 = vld [vmem:[%s10680_s13 + $0x110] sm:$0xff] }
 0x282   : > { %v9572_v28 = vcombine.high %v1366_v23, %v1370_v24  ;;  %v9571_v36 = vcombine.low %v1366_v23, %v1370_v24  ;;  %v387_v10 = vld [vmem:[%s10680_s13 + $0x130] sm:$0xff] }
 0x283   : > { %7088 = vmatpush1.bf16.msra.mxu0 %v9403_v46  ;;  %7129 = vmatpush1.bf16.msra.mxu1 %v9531_v47  ;;  %v8557_v46 = vcombine.low %v351_v30, %v355_v31  ;;  %v8685_v47 = vcombine.low %v479_v33, %v483_v34  ;;  %v511_v11 = vld [vmem:[%s10680_s13 + $0x510] sm:$0xff] }
 0x284   : > { %7089 = vmatprep.subr.bf16.mxu0 %v9412_v50  ;;  %7130 = vmatprep.subr.bf16.mxu1 %v9540_v51  ;;  %v8566_v50 = vcombine.high %v359_v40, %v363_v42  ;;  %v8694_v51 = vcombine.high %v487_v43, %v491_v44  ;;  %v515_v12 = vld [vmem:[%s10680_s13 + $0x530] sm:$0xff] }
 0x285   : > { %v391_v20 = vld [vmem:[%s10680_s13 + $0x150] sm:$0xff] }
 0x286   : > { %v395_v22 = vld [vmem:[%s10680_s13 + $0x170] sm:$0xff] }
 0x287   : > { %7090 = vmatpush1.bf16.msra.mxu0 %v9411_v63  ;;  %7131 = vmatpush1.bf16.msra.mxu1 %v9539_v54  ;;  %v8565_v63 = vcombine.low %v359_v40, %v363_v42  ;;  %v8693_v54 = vcombine.low %v487_v43, %v491_v44  ;;  %v519_v23 = vld [vmem:[%s10680_s13 + $0x550] sm:$0xff] }
 0x288   : > { %7091 = vmatprep.subr.bf16.mxu0 %v9420_v61  ;;  %7132 = vmatprep.subr.bf16.mxu1 %v9548_v0  ;;  %v8574_v61 = vcombine.high %v367_v53, %v371_v55  ;;  %v8702_v0 = vcombine.high %v495_v56, %v499_v57  ;;  %v523_v24 = vld [vmem:[%s10680_s13 + $0x570] sm:$0xff] }
 0x289   : > { %v399_v30 = vld [vmem:[%s10680_s13 + $0x190] sm:$0xff] }
 0x28a   : > { %v403_v31 = vld [vmem:[%s10680_s13 + $0x1b0] sm:$0xff] }
 0x28b   : > { %7092 = vmatpush1.bf16.msra.mxu0 %v9419_v5  ;;  %7133 = vmatpush1.bf16.msra.mxu1 %v9547_v58  ;;  %v8573_v5 = vcombine.low %v367_v53, %v371_v55  ;;  %v8701_v58 = vcombine.low %v495_v56, %v499_v57  ;;  %v527_v33 = vld [vmem:[%s10680_s13 + $0x590] sm:$0xff]  ;;  %v8605_v56 = vcombine.low %v399_v30, %v403_v31 }
 0x28c   : > { %7093 = vmatprep.subr.bf16.mxu0 %v9428_v6  ;;  %7134 = vmatprep.subr.bf16.mxu1 %v9556_v8  ;;  %v8582_v6 = vcombine.high %v375_v62, %v379_v1  ;;  %v8710_v8 = vcombine.high %v503_v2, %v507_v4  ;;  %v531_v34 = vld [vmem:[%s10680_s13 + $0x5b0] sm:$0xff] }
 0x28d   : > { %v8734_v40 = vcombine.high %v527_v33, %v531_v34  ;;  %v407_v42 = vld [vmem:[%s10680_s13 + $0x1d0] sm:$0xff] }
 0x28e   : > { %v411_v43 = vld [vmem:[%s10680_s13 + $0x1f0] sm:$0xff] }
 0x28f   : > { %7094 = vmatpush1.bf16.msra.mxu0 %v9427_v13  ;;  %7135 = vmatpush1.bf16.msra.mxu1 %v9555_v14  ;;  %v8581_v13 = vcombine.low %v375_v62, %v379_v1  ;;  %v8709_v14 = vcombine.low %v503_v2, %v507_v4  ;;  %v415_v2 = vld [vmem:[%s10680_s13 + $0x210] sm:$0xff] }
 0x290   : > { %7095 = vmatprep.subr.bf16.mxu0 %v9436_v16  ;;  %7136 = vmatprep.subr.bf16.mxu1 %v9564_v18  ;;  %v8590_v16 = vcombine.high %v383_v9, %v387_v10  ;;  %v8718_v18 = vcombine.high %v511_v11, %v515_v12  ;;  %v419_v4 = vld [vmem:[%s10680_s13 + $0x230] sm:$0xff] }
 0x293   : > { %7096 = vmatpush1.bf16.msra.mxu0 %v9435_v25  ;;  %7137 = vmatpush1.bf16.msra.mxu1 %v9563_v26  ;;  %v8589_v25 = vcombine.low %v383_v9, %v387_v10  ;;  %v8717_v26 = vcombine.low %v511_v11, %v515_v12  ;;  %v8622_v9 = vcombine.high %v415_v2, %v419_v4  ;;  %v423_v11 = vld [vmem:[%s10680_s13 + $0x250] sm:$0xff] }
 0x294   : > { %7097 = vmatprep.subr.bf16.mxu0 %v9444_v27  ;;  %7138 = vmatprep.subr.bf16.mxu1 %v9572_v28  ;;  %v8598_v27 = vcombine.high %v391_v20, %v395_v22  ;;  %v8726_v28 = vcombine.high %v519_v23, %v523_v24  ;;  %v427_v12 = vld [vmem:[%s10680_s13 + $0x270] sm:$0xff] }
 0x297   : > { %7098 = vmatpush1.bf16.msra.mxu0 %v9443_v35  ;;  %7139 = vmatpush1.bf16.msra.mxu1 %v9571_v36  ;;  %v8597_v35 = vcombine.low %v391_v20, %v395_v22  ;;  %v8725_v36 = vcombine.low %v519_v23, %v523_v24  ;;  %v8630_v20 = vcombine.high %v423_v11, %v427_v12  ;;  %v431_v23 = vld [vmem:[%s10680_s13 + $0x290] sm:$0xff] }
 0x298   : > { %7149 = vmatprep.subr.bf16.mxu0 %v8558_v38  ;;  %7190 = vmatprep.subr.bf16.mxu1 %v8686_v39  ;;  %v8606_v38 = vcombine.high %v399_v30, %v403_v31  ;;  %v435_v24 = vld [vmem:[%s10680_s13 + $0x2b0] sm:$0xff] }
 0x299   : > { %v8638_v30 = vcombine.high %v431_v23, %v435_v24 }
 0x29a   : > { %7100 = vmatmul.mubr.bf16.vlgmr.msra.gmra.mrb[28].mxu0 %v11016_v45  ;;  %7141 = vmatmul.mubr.bf16.vlgmr.msra.gmra.mrb[28].mxu1 %v11020_v48 }
 0x29b   : > { %7150 = vmatpush1.bf16.msra.mxu0 %v8557_v46  ;;  %7191 = vmatpush1.bf16.msra.mxu1 %v8685_v47  ;;  %v535_v47 = vld [vmem:[%s10680_s13 + $0x5d0] sm:$0xff] }
 0x29c   : > { %7151 = vmatprep.subr.bf16.mxu0 %v8566_v50  ;;  %7192 = vmatprep.subr.bf16.mxu1 %v8694_v51  ;;  %v539_v50 = vld [vmem:[%s10680_s13 + $0x5f0] sm:$0xff] }
 0x29d   : > { %7181 = vmatprep.mubr.bf16.mxu0 %v10728_v59  ;;  %7222 = vmatprep.mubr.bf16.mxu1 %v10730_v60  ;;  %v8742_v1 = vcombine.high %v535_v47, %v539_v50 }
 0x29f   : > { %7152 = vmatpush1.bf16.msra.mxu0 %v8565_v63  ;;  %7193 = vmatpush1.bf16.msra.mxu1 %v8693_v54 }
 0x2a0   : > { %7153 = vmatprep.subr.bf16.mxu0 %v8574_v61  ;;  %7194 = vmatprep.subr.bf16.mxu1 %v8702_v0  ;;  %v8733_v61 = vcombine.low %v527_v33, %v531_v34  ;;  %v8614_v0 = vcombine.high %v407_v42, %v411_v43  ;;  %v439_v33 = vld [vmem:[%s10680_s13 + $0x2d0] sm:$0xff] }
 0x2a1   : > { %v443_v34 = vld [vmem:[%s10680_s13 + $0x2f0] sm:$0xff] }
 0x2a3   : > { %7154 = vmatpush1.bf16.msra.mxu0 %v8573_v5  ;;  %7195 = vmatpush1.bf16.msra.mxu1 %v8701_v58  ;;  %v543_v5 = vld [vmem:[%s10680_s13 + $0x610] sm:$0xff] }
 0x2a4   : > { %7155 = vmatprep.subr.bf16.mxu0 %v8582_v6  ;;  %7196 = vmatprep.subr.bf16.mxu1 %v8710_v8  ;;  %v547_v58 = vld [vmem:[%s10680_s13 + $0x630] sm:$0xff]  ;;  %v8613_v6 = vcombine.low %v407_v42, %v411_v43  ;;  %v8741_v8 = vcombine.low %v535_v47, %v539_v50  ;;  %v8645_v50 = vcombine.low %v439_v33, %v443_v34 }
 0x2a5   : > { %v8750_v10 = vcombine.high %v543_v5, %v547_v58  ;;  %v447_v43 = vld [vmem:[%s10680_s13 + $0x310] sm:$0xff] }
 0x2a6   : > { %v579_v47 = vld [vmem:[%s10680_s13 + $0x730] sm:$0xff] }
 0x2a7   : > { %7156 = vmatpush1.bf16.msra.mxu0 %v8581_v13  ;;  %7197 = vmatpush1.bf16.msra.mxu1 %v8709_v14  ;;  %v551_v13 = vld [vmem:[%s10680_s13 + $0x650] sm:$0xff] }
 0x2a8   : > { %7157 = vmatprep.subr.bf16.mxu0 %v8590_v16  ;;  %7198 = vmatprep.subr.bf16.mxu1 %v8718_v18  ;;  %v555_v14 = vld [vmem:[%s10680_s13 + $0x670] sm:$0xff]  ;;  %v8621_v16 = vcombine.low %v415_v2, %v419_v4  ;;  %v8749_v18 = vcombine.low %v543_v5, %v547_v58 }
 0x2a9   : > { %v8758_v22 = vcombine.high %v551_v13, %v555_v14  ;;  %v463_v5 = vld [vmem:[%s10680_s13 + $0x390] sm:$0xff] }
 0x2aa   : > { %v467_v58 = vld [vmem:[%s10680_s13 + $0x3b0] sm:$0xff] }
 0x2ab   : > { %7158 = vmatpush1.bf16.msra.mxu0 %v8589_v25  ;;  %7199 = vmatpush1.bf16.msra.mxu1 %v8717_v26  ;;  %v559_v25 = vld [vmem:[%s10680_s13 + $0x690] sm:$0xff] }
 0x2ac   : > { %7159 = vmatprep.subr.bf16.mxu0 %v8598_v27  ;;  %7200 = vmatprep.subr.bf16.mxu1 %v8726_v28  ;;  %v563_v26 = vld [vmem:[%s10680_s13 + $0x6b0] sm:$0xff]  ;;  %v8629_v27 = vcombine.low %v423_v11, %v427_v12  ;;  %v8757_v28 = vcombine.low %v551_v13, %v555_v14  ;;  %v8670_v11 = vcombine.high %v463_v5, %v467_v58 }
 0x2ad   : > { %v6855_v39 = vpop.f32.mrb[16].mxu0  ;;  %v6896_v44 = vpop.f32.mrb[16].mxu1  ;;  %v8766_v31 = vcombine.high %v559_v25, %v563_v26  ;;  %v471_v13 = vld [vmem:[%s10680_s13 + $0x3d0] sm:$0xff] }
 0x2ae   : > { %v6857_v46 = vpop.f32.mrb[17].mxu0  ;;  %v11340_v51 = vadd.f32 %v6896_v44, %v6855_v39  ;;  %v6898_v53 = vpop.f32.mrb[17].mxu1  ;;  %v8765_v39 = vcombine.low %v559_v25, %v563_v26  ;;  %v451_v44 = vld [vmem:[%s10680_s13 + $0x330] sm:$0xff] }
 0x2af   : > { %v6859_v55 = vpop.f32.mrb[18].mxu0  ;;  %7160 = vmatpush1.bf16.msra.mxu0 %v8597_v35  ;;  %v11342_v57 = vadd.f32 %v6898_v53, %v6857_v46  ;;  %v6900_v63 = vpop.f32.mrb[18].mxu1  ;;  %7201 = vmatpush1.bf16.msra.mxu1 %v8725_v36  ;;  %v567_v35 = vld [vmem:[%s10680_s13 + $0x6d0] sm:$0xff] }
 0x2b0   : > { %v6860_v54 = vpop.f32.mrb[19].mxu0  ;;  %7161 = vmatprep.subr.bf16.mxu0 %v8606_v38  ;;  %v6901_v62 = vpop.f32.mrb[19].mxu1  ;;  %7202 = vmatprep.subr.bf16.mxu1 %v8734_v40  ;;  %v571_v36 = vld [vmem:[%s10680_s13 + $0x6f0] sm:$0xff]  ;;  %v8637_v38 = vcombine.low %v431_v23, %v435_v24  ;;  %v8646_v40 = vcombine.high %v439_v33, %v443_v34  ;;  %v8654_v55 = vcombine.high %v447_v43, %v451_v44 }
 0x2b1   : > { %v8774_v42 = vcombine.high %v567_v35, %v571_v36  ;;  %v575_v46 = vld [vmem:[%s10680_s13 + $0x710] sm:$0xff]  ;;  %v8773_v53 = vcombine.low %v567_v35, %v571_v36  ;;  %v8653_v62 = vcombine.low %v447_v43, %v451_v44 }
 0x2b2   : > { %v455_v63 = vld [vmem:[%s10680_s13 + $0x350] sm:$0xff] }
 0x2b3   : > { %7162 = vmatpush1.bf16.msra.mxu0 %v8605_v56  ;;  %7203 = vmatpush1.bf16.msra.mxu1 %v8733_v61  ;;  %v8782_v56 = vcombine.high %v575_v46, %v579_v47  ;;  %v459_v54 = vld [vmem:[%s10680_s13 + $0x370] sm:$0xff] }
 0x2b4   : > { %7163 = vmatprep.subr.bf16.mxu0 %v8614_v0  ;;  %7204 = vmatprep.subr.bf16.mxu1 %v8742_v1  ;;  %v583_v61 = vld [vmem:[%s10680_s13 + $0x750] sm:$0xff]  ;;  %v8781_v1 = vcombine.low %v575_v46, %v579_v47  ;;  %v8662_v2 = vcombine.high %v455_v63, %v459_v54 }
 0x2b5   : > { %v587_v0 = vld [vmem:[%s10680_s13 + $0x770] sm:$0xff] }
 0x2b6   : > { %v8790_v4 = vcombine.high %v583_v61, %v587_v0  ;;  %v475_v14 = vld [vmem:[%s10680_s13 + $0x3f0] sm:$0xff] }
 0x2b7   : > { %7164 = vmatpush1.bf16.msra.mxu0 %v8613_v6  ;;  %7205 = vmatpush1.bf16.msra.mxu1 %v8741_v8  ;;  %v591_v6 = vld [vmem:[%s10680_s13 + $0x790] sm:$0xff]  ;;  %v8678_v23 = vcombine.high %v471_v13, %v475_v14 }
 0x2b8   : > { %7165 = vmatprep.subr.bf16.mxu0 %v8622_v9  ;;  %7206 = vmatprep.subr.bf16.mxu1 %v8750_v10  ;;  %v595_v8 = vld [vmem:[%s10680_s13 + $0x7b0] sm:$0xff]  ;;  %v8661_v9 = vcombine.low %v455_v63, %v459_v54  ;;  %v8789_v10 = vcombine.low %v583_v61, %v587_v0 }
 0x2b9   : > { %v8798_v12 = vcombine.high %v591_v6, %v595_v8  ;;  %v607_v25 = vld [vmem:[%s10680_s13 + $0x810] sm:$0xff] }
 0x2ba   : > { %v611_v26 = vld [vmem:[%s10680_s13 + $0x830] sm:$0xff] }
 0x2bb   : > { %7166 = vmatpush1.bf16.msra.mxu0 %v8621_v16  ;;  %7207 = vmatpush1.bf16.msra.mxu1 %v8749_v18  ;;  %v599_v16 = vld [vmem:[%s10680_s13 + $0x7d0] sm:$0xff]  ;;  %v8814_v33 = vcombine.high %v607_v25, %v611_v26 }
 0x2bc   : > { %7167 = vmatprep.subr.bf16.mxu0 %v8630_v20  ;;  %7208 = vmatprep.subr.bf16.mxu1 %v8758_v22  ;;  %v603_v18 = vld [vmem:[%s10680_s13 + $0x7f0] sm:$0xff]  ;;  %v8669_v20 = vcombine.low %v463_v5, %v467_v58  ;;  %v8797_v22 = vcombine.low %v591_v6, %v595_v8 }
 0x2bd   : > { %v8806_v24 = vcombine.high %v599_v16, %v603_v18  ;;  %v615_v35 = vld [vmem:[%s10680_s13 + $0x850] sm:$0xff] }
 0x2be   : > { %v619_v36 = vld [vmem:[%s10680_s13 + $0x870] sm:$0xff] }
 0x2bf   : > { %7168 = vmatpush1.bf16.msra.mxu0 %v8629_v27  ;;  %7209 = vmatpush1.bf16.msra.mxu1 %v8757_v28  ;;  %v735_v27 = vld [vmem:[%s10680_s13 + $0xc10] sm:$0xff]  ;;  %v8822_v43 = vcombine.high %v615_v35, %v619_v36 }
 0x2c0   : > { %7169 = vmatprep.subr.bf16.mxu0 %v8638_v30  ;;  %7210 = vmatprep.subr.bf16.mxu1 %v8766_v31  ;;  %v739_v28 = vld [vmem:[%s10680_s13 + $0xc30] sm:$0xff]  ;;  %v8677_v30 = vcombine.low %v471_v13, %v475_v14  ;;  %v8805_v31 = vcombine.low %v599_v16, %v603_v18 }
 0x2c1   : > { %v8942_v34 = vcombine.high %v735_v27, %v739_v28  ;;  %v623_v46 = vld [vmem:[%s10680_s13 + $0x890] sm:$0xff] }
 0x2c2   : > { %v627_v47 = vld [vmem:[%s10680_s13 + $0x8b0] sm:$0xff] }
 0x2c3   : > { %7170 = vmatpush1.bf16.msra.mxu0 %v8637_v38  ;;  %7211 = vmatpush1.bf16.msra.mxu1 %v8765_v39  ;;  %v743_v38 = vld [vmem:[%s10680_s13 + $0xc50] sm:$0xff]  ;;  %v8830_v63 = vcombine.high %v623_v46, %v627_v47 }
 0x2c4   : > { %7171 = vmatprep.subr.bf16.mxu0 %v8646_v40  ;;  %7212 = vmatprep.subr.bf16.mxu1 %v8774_v42  ;;  %v747_v39 = vld [vmem:[%s10680_s13 + $0xc70] sm:$0xff]  ;;  %v8813_v40 = vcombine.low %v607_v25, %v611_v26  ;;  %v8941_v42 = vcombine.low %v735_v27, %v739_v28 }
 0x2c5   : > { %v8950_v44 = vcombine.high %v743_v38, %v747_v39  ;;  %v631_v61 = vld [vmem:[%s10680_s13 + $0x8d0] sm:$0xff] }
 0x2c6   : > { %v635_v0 = vld [vmem:[%s10680_s13 + $0x8f0] sm:$0xff] }
 0x2c7   : > { %7172 = vmatpush1.bf16.msra.mxu0 %v8645_v50  ;;  %7213 = vmatpush1.bf16.msra.mxu1 %v8773_v53  ;;  %v751_v50 = vld [vmem:[%s10680_s13 + $0xc90] sm:$0xff]  ;;  %v8838_v5 = vcombine.high %v631_v61, %v635_v0 }
 0x2c8   : > { %7173 = vmatprep.subr.bf16.mxu0 %v8654_v55  ;;  %7214 = vmatprep.subr.bf16.mxu1 %v8782_v56  ;;  %v755_v53 = vld [vmem:[%s10680_s13 + $0xcb0] sm:$0xff]  ;;  %v8821_v55 = vcombine.low %v615_v35, %v619_v36  ;;  %v8949_v56 = vcombine.low %v743_v38, %v747_v39 }
 0x2c9   : > { %v8958_v54 = vcombine.high %v751_v50, %v755_v53  ;;  %v639_v6 = vld [vmem:[%s10680_s13 + $0x910] sm:$0xff] }
 0x2ca   : > { %v643_v8 = vld [vmem:[%s10680_s13 + $0x930] sm:$0xff] }
 0x2cb   : > { %7174 = vmatpush1.bf16.msra.mxu0 %v8653_v62  ;;  %7215 = vmatpush1.bf16.msra.mxu1 %v8781_v1  ;;  %v759_v62 = vld [vmem:[%s10680_s13 + $0xcd0] sm:$0xff]  ;;  %v8846_v13 = vcombine.high %v639_v6, %v643_v8 }
 0x2cc   : > { %7175 = vmatprep.subr.bf16.mxu0 %v8662_v2  ;;  %7216 = vmatprep.subr.bf16.mxu1 %v8790_v4  ;;  %v763_v1 = vld [vmem:[%s10680_s13 + $0xcf0] sm:$0xff]  ;;  %v8829_v2 = vcombine.low %v623_v46, %v627_v47  ;;  %v8957_v4 = vcombine.low %v751_v50, %v755_v53 }
 0x2cd   : > { %v8966_v58 = vcombine.high %v759_v62, %v763_v1  ;;  %v647_v16 = vld [vmem:[%s10680_s13 + $0x950] sm:$0xff] }
 0x2ce   : > { %v651_v18 = vld [vmem:[%s10680_s13 + $0x970] sm:$0xff] }
 0x2cf   : > { %7176 = vmatpush1.bf16.msra.mxu0 %v8661_v9  ;;  %7217 = vmatpush1.bf16.msra.mxu1 %v8789_v10  ;;  %v767_v9 = vld [vmem:[%s10680_s13 + $0xd10] sm:$0xff]  ;;  %v8854_v25 = vcombine.high %v647_v16, %v651_v18 }
 0x2d0   : > { %7177 = vmatprep.subr.bf16.mxu0 %v8670_v11  ;;  %7218 = vmatprep.subr.bf16.mxu1 %v8798_v12  ;;  %v771_v10 = vld [vmem:[%s10680_s13 + $0xd30] sm:$0xff]  ;;  %v8837_v11 = vcombine.low %v631_v61, %v635_v0  ;;  %v8965_v12 = vcombine.low %v759_v62, %v763_v1 }
 0x2d1   : > { %v8974_v14 = vcombine.high %v767_v9, %v771_v10  ;;  %v655_v27 = vld [vmem:[%s10680_s13 + $0x990] sm:$0xff] }
 0x2d2   : > { %v659_v28 = vld [vmem:[%s10680_s13 + $0x9b0] sm:$0xff] }
 0x2d3   : > { %7178 = vmatpush1.bf16.msra.mxu0 %v8669_v20  ;;  %7219 = vmatpush1.bf16.msra.mxu1 %v8797_v22  ;;  %v775_v20 = vld [vmem:[%s10680_s13 + $0xd50] sm:$0xff]  ;;  %v8862_v35 = vcombine.high %v655_v27, %v659_v28 }
 0x2d4   : > { %7179 = vmatprep.subr.bf16.mxu0 %v8678_v23  ;;  %7220 = vmatprep.subr.bf16.mxu1 %v8806_v24  ;;  %v779_v22 = vld [vmem:[%s10680_s13 + $0xd70] sm:$0xff]  ;;  %v8845_v23 = vcombine.low %v639_v6, %v643_v8  ;;  %v8973_v24 = vcombine.low %v767_v9, %v771_v10 }
 0x2d5   : > { %v8982_v26 = vcombine.high %v775_v20, %v779_v22  ;;  %v663_v39 = vld [vmem:[%s10680_s13 + $0x9d0] sm:$0xff] }
 0x2d6   : > { %v791_v46 = vld [vmem:[%s10680_s13 + $0xdd0] sm:$0xff] }
 0x2d7   : > { %7180 = vmatpush1.bf16.msra.mxu0 %v8677_v30  ;;  %7221 = vmatpush1.bf16.msra.mxu1 %v8805_v31  ;;  %v783_v30 = vld [vmem:[%s10680_s13 + $0xd90] sm:$0xff] }
 0x2d8   : > { %7231 = vmatprep.subr.bf16.mxu0 %v8814_v33  ;;  %7272 = vmatprep.subr.bf16.mxu1 %v8942_v34  ;;  %v787_v31 = vld [vmem:[%s10680_s13 + $0xdb0] sm:$0xff]  ;;  %v8853_v33 = vcombine.low %v647_v16, %v651_v18  ;;  %v8981_v34 = vcombine.low %v775_v20, %v779_v22 }
 0x2d9   : > { %v8990_v38 = vcombine.high %v783_v30, %v787_v31  ;;  %v795_v47 = vld [vmem:[%s10680_s13 + $0xdf0] sm:$0xff] }
 0x2da   : > { %7182 = vmatmul.mubr.bf16.vlgmr.msra.gmra.mrb[32].mxu0 %v10776_v17  ;;  %7223 = vmatmul.mubr.bf16.vlgmr.msra.gmra.mrb[32].mxu1 %v10781_v21  ;;  %v8998_v1 = vcombine.high %v791_v46, %v795_v47  ;;  %v8997_v8 = vcombine.low %v791_v46, %v795_v47  ;;  %v831_v46 = vld [vmem:[%s10680_s13 + $0xf10] sm:$0xff] }
 0x2db   : > { %7232 = vmatpush1.bf16.msra.mxu0 %v8813_v40  ;;  %7273 = vmatpush1.bf16.msra.mxu1 %v8941_v42  ;;  %v667_v40 = vld [vmem:[%s10680_s13 + $0x9f0] sm:$0xff] }
 0x2dc   : > { %7233 = vmatprep.subr.bf16.mxu0 %v8822_v43  ;;  %7274 = vmatprep.subr.bf16.mxu1 %v8950_v44  ;;  %v8870_v0 = vcombine.high %v663_v39, %v667_v40  ;;  %v8869_v6 = vcombine.low %v663_v39, %v667_v40  ;;  %v835_v47 = vld [vmem:[%s10680_s13 + $0xf30] sm:$0xff] }
 0x2dd   : > { %7263 = vmatprep.mubr.bf16.mxu0 %v10786_v29  ;;  %7304 = vmatprep.mubr.bf16.mxu1 %v10791_v32 }
 0x2df   : > { %7234 = vmatpush1.bf16.msra.mxu0 %v8821_v55  ;;  %7275 = vmatpush1.bf16.msra.mxu1 %v8949_v56  ;;  %v8861_v56 = vcombine.low %v655_v27, %v659_v28 }
 0x2e0   : > { %7235 = vmatprep.subr.bf16.mxu0 %v8830_v63  ;;  %7276 = vmatprep.subr.bf16.mxu1 %v8958_v54 }
 0x2e3   : > { %7236 = vmatpush1.bf16.msra.mxu0 %v8829_v2  ;;  %7277 = vmatpush1.bf16.msra.mxu1 %v8957_v4  ;;  %v671_v2 = vld [vmem:[%s10680_s13 + $0xa10] sm:$0xff] }
 0x2e4   : > { %7237 = vmatprep.subr.bf16.mxu0 %v8838_v5  ;;  %7278 = vmatprep.subr.bf16.mxu1 %v8966_v58  ;;  %v675_v4 = vld [vmem:[%s10680_s13 + $0xa30] sm:$0xff] }
 0x2e5   : > { %v799_v5 = vld [vmem:[%s10680_s13 + $0xe10] sm:$0xff]  ;;  %v8878_v9 = vcombine.high %v671_v2, %v675_v4  ;;  %v8877_v16 = vcombine.low %v671_v2, %v675_v4 }
 0x2e6   : > { %v803_v58 = vld [vmem:[%s10680_s13 + $0xe30] sm:$0xff] }
 0x2e7   : > { %7238 = vmatpush1.bf16.msra.mxu0 %v8837_v11  ;;  %7279 = vmatpush1.bf16.msra.mxu1 %v8965_v12  ;;  %v9006_v10 = vcombine.high %v799_v5, %v803_v58  ;;  %v679_v11 = vld [vmem:[%s10680_s13 + $0xa50] sm:$0xff]  ;;  %v9005_v18 = vcombine.low %v799_v5, %v803_v58 }
 0x2e8   : > { %7239 = vmatprep.subr.bf16.mxu0 %v8846_v13  ;;  %7280 = vmatprep.subr.bf16.mxu1 %v8974_v14  ;;  %v683_v12 = vld [vmem:[%s10680_s13 + $0xa70] sm:$0xff] }
 0x2e9   : > { %v807_v13 = vld [vmem:[%s10680_s13 + $0xe50] sm:$0xff]  ;;  %v8886_v20 = vcombine.high %v679_v11, %v683_v12  ;;  %v8885_v27 = vcombine.low %v679_v11, %v683_v12 }
 0x2ea   : > { %v811_v14 = vld [vmem:[%s10680_s13 + $0xe70] sm:$0xff] }
 0x2eb   : > { %7240 = vmatpush1.bf16.msra.mxu0 %v8845_v23  ;;  %7281 = vmatpush1.bf16.msra.mxu1 %v8973_v24  ;;  %v9014_v22 = vcombine.high %v807_v13, %v811_v14  ;;  %v687_v23 = vld [vmem:[%s10680_s13 + $0xa90] sm:$0xff]  ;;  %v9013_v28 = vcombine.low %v807_v13, %v811_v14 }
 0x2ec   : > { %7241 = vmatprep.subr.bf16.mxu0 %v8854_v25  ;;  %7282 = vmatprep.subr.bf16.mxu1 %v8982_v26  ;;  %v691_v24 = vld [vmem:[%s10680_s13 + $0xab0] sm:$0xff] }
 0x2ed   : > { %v6937_v36 = vpop.f32.mrb[20].mxu0  ;;  %v6978_v43 = vpop.f32.mrb[20].mxu1  ;;  %v815_v25 = vld [vmem:[%s10680_s13 + $0xe90] sm:$0xff] }
 0x2ee   : > { %v6938_v42 = vadd.f32 %v6937_v36, %v11340_v51  ;;  %v6939_v44 = vpop.f32.mrb[21].mxu0  ;;  %v6980_v53 = vpop.f32.mrb[21].mxu1  ;;  %v8989_v51 = vcombine.low %v783_v30, %v787_v31  ;;  %v819_v26 = vld [vmem:[%s10680_s13 + $0xeb0] sm:$0xff]  ;;  %v8894_v30 = vcombine.high %v687_v23, %v691_v24 }
 0x2ef   : > { %v6940_v50 = vadd.f32 %v6939_v44, %v11342_v57  ;;  %v6941_v55 = vpop.f32.mrb[22].mxu0  ;;  %7242 = vmatpush1.bf16.msra.mxu0 %v8853_v33  ;;  %v6982_v54 = vpop.f32.mrb[22].mxu1  ;;  %7283 = vmatpush1.bf16.msra.mxu1 %v8981_v34  ;;  %v9022_v31 = vcombine.high %v815_v25, %v819_v26  ;;  %v695_v33 = vld [vmem:[%s10680_s13 + $0xad0] sm:$0xff]  ;;  %v9021_v39 = vcombine.low %v815_v25, %v819_v26 }
 0x2f0   : > { %v11414_v63 = vadd.f32 %v6978_v43, %v6938_v42  ;;  %v6942_v61 = vpop.f32.mrb[23].mxu0  ;;  %7243 = vmatprep.subr.bf16.mxu0 %v8862_v35  ;;  %v6983_v57 = vpop.f32.mrb[23].mxu1  ;;  %7284 = vmatprep.subr.bf16.mxu1 %v8990_v38  ;;  %v699_v34 = vld [vmem:[%s10680_s13 + $0xaf0] sm:$0xff]  ;;  %v8893_v38 = vcombine.low %v687_v23, %v691_v24 }
 0x2f1   : > { %v11416_v62 = vadd.f32 %v6980_v53, %v6940_v50  ;;  %v823_v35 = vld [vmem:[%s10680_s13 + $0xed0] sm:$0xff]  ;;  %v8902_v40 = vcombine.high %v695_v33, %v699_v34  ;;  %v8901_v50 = vcombine.low %v695_v33, %v699_v34 }
 0x2f2   : > { %v827_v36 = vld [vmem:[%s10680_s13 + $0xef0] sm:$0xff] }
 0x2f3   : > { %7244 = vmatpush1.bf16.msra.mxu0 %v8861_v56  ;;  %7285 = vmatpush1.bf16.msra.mxu1 %v8989_v51  ;;  %v9030_v42 = vcombine.high %v823_v35, %v827_v36  ;;  %v703_v43 = vld [vmem:[%s10680_s13 + $0xb10] sm:$0xff]  ;;  %v9029_v53 = vcombine.low %v823_v35, %v827_v36  ;;  %v9038_v56 = vcombine.high %v831_v46, %v835_v47 }
 0x2f4   : > { %7245 = vmatprep.subr.bf16.mxu0 %v8870_v0  ;;  %7286 = vmatprep.subr.bf16.mxu1 %v8998_v1  ;;  %v707_v44 = vld [vmem:[%s10680_s13 + $0xb30] sm:$0xff]  ;;  %v9037_v1 = vcombine.low %v831_v46, %v835_v47 }
 0x2f5   : > { %v8910_v55 = vcombine.high %v703_v43, %v707_v44  ;;  %v711_v54 = vld [vmem:[%s10680_s13 + $0xb50] sm:$0xff]  ;;  %v8909_v57 = vcombine.low %v703_v43, %v707_v44 }
 0x2f6   : > { %v715_v61 = vld [vmem:[%s10680_s13 + $0xb70] sm:$0xff] }
 0x2f7   : > { %7246 = vmatpush1.bf16.msra.mxu0 %v8869_v6  ;;  %7287 = vmatpush1.bf16.msra.mxu1 %v8997_v8  ;;  %v839_v51 = vld [vmem:[%s10680_s13 + $0xf50] sm:$0xff]  ;;  %v8918_v2 = vcombine.high %v711_v54, %v715_v61 }
 0x2f8   : > { %7247 = vmatprep.subr.bf16.mxu0 %v8878_v9  ;;  %7288 = vmatprep.subr.bf16.mxu1 %v9006_v10  ;;  %v843_v0 = vld [vmem:[%s10680_s13 + $0xf70] sm:$0xff]  ;;  %v8917_v9 = vcombine.low %v711_v54, %v715_v61 }
 0x2f9   : > { %v9046_v4 = vcombine.high %v839_v51, %v843_v0  ;;  %v719_v5 = vld [vmem:[%s10680_s13 + $0xb90] sm:$0xff]  ;;  %v9045_v10 = vcombine.low %v839_v51, %v843_v0 }
 0x2fa   : > { %v723_v58 = vld [vmem:[%s10680_s13 + $0xbb0] sm:$0xff] }
 0x2fb   : > { %7248 = vmatpush1.bf16.msra.mxu0 %v8877_v16  ;;  %7289 = vmatpush1.bf16.msra.mxu1 %v9005_v18  ;;  %v847_v6 = vld [vmem:[%s10680_s13 + $0xf90] sm:$0xff]  ;;  %v8926_v11 = vcombine.high %v719_v5, %v723_v58 }
 0x2fc   : > { %7249 = vmatprep.subr.bf16.mxu0 %v8886_v20  ;;  %7290 = vmatprep.subr.bf16.mxu1 %v9014_v22  ;;  %v851_v8 = vld [vmem:[%s10680_s13 + $0xfb0] sm:$0xff]  ;;  %v8925_v20 = vcombine.low %v719_v5, %v723_v58 }
 0x2fd   : > { %v9054_v12 = vcombine.high %v847_v6, %v851_v8  ;;  %v727_v13 = vld [vmem:[%s10680_s13 + $0xbd0] sm:$0xff]  ;;  %v9053_v22 = vcombine.low %v847_v6, %v851_v8 }
 0x2fe   : > { %v731_v14 = vld [vmem:[%s10680_s13 + $0xbf0] sm:$0xff] }
 0x2ff   : > { %7250 = vmatpush1.bf16.msra.mxu0 %v8885_v27  ;;  %7291 = vmatpush1.bf16.msra.mxu1 %v9013_v28  ;;  %v855_v16 = vld [vmem:[%s10680_s13 + $0xfd0] sm:$0xff]  ;;  %v8934_v23 = vcombine.high %v727_v13, %v731_v14 }
 0x300   : > { %7251 = vmatprep.subr.bf16.mxu0 %v8894_v30  ;;  %7292 = vmatprep.subr.bf16.mxu1 %v9022_v31  ;;  %v859_v18 = vld [vmem:[%s10680_s13 + $0xff0] sm:$0xff]  ;;  %v8933_v30 = vcombine.low %v727_v13, %v731_v14 }
 0x301   : > { %v9062_v24 = vcombine.high %v855_v16, %v859_v18  ;;  %v863_v25 = vld [vmem:[%s10680_s13 + $0x1010] sm:$0xff]  ;;  %v9061_v31 = vcombine.low %v855_v16, %v859_v18 }
 0x302   : > { %v867_v26 = vld [vmem:[%s10680_s13 + $0x1030] sm:$0xff] }
 0x303   : > { %7252 = vmatpush1.bf16.msra.mxu0 %v8893_v38  ;;  %7293 = vmatpush1.bf16.msra.mxu1 %v9021_v39  ;;  %v991_v27 = vld [vmem:[%s10680_s13 + $0x1410] sm:$0xff]  ;;  %v9070_v33 = vcombine.high %v863_v25, %v867_v26 }
 0x304   : > { %7253 = vmatprep.subr.bf16.mxu0 %v8902_v40  ;;  %7294 = vmatprep.subr.bf16.mxu1 %v9030_v42  ;;  %v995_v28 = vld [vmem:[%s10680_s13 + $0x1430] sm:$0xff]  ;;  %v9069_v40 = vcombine.low %v863_v25, %v867_v26 }
 0x305   : > { %v9198_v34 = vcombine.high %v991_v27, %v995_v28  ;;  %v871_v35 = vld [vmem:[%s10680_s13 + $0x1050] sm:$0xff]  ;;  %v9197_v42 = vcombine.low %v991_v27, %v995_v28 }
 0x306   : > { %v875_v36 = vld [vmem:[%s10680_s13 + $0x1070] sm:$0xff] }
 0x307   : > { %7254 = vmatpush1.bf16.msra.mxu0 %v8901_v50  ;;  %7295 = vmatpush1.bf16.msra.mxu1 %v9029_v53  ;;  %v999_v38 = vld [vmem:[%s10680_s13 + $0x1450] sm:$0xff]  ;;  %v9078_v43 = vcombine.high %v871_v35, %v875_v36 }
 0x308   : > { %7255 = vmatprep.subr.bf16.mxu0 %v8910_v55  ;;  %7296 = vmatprep.subr.bf16.mxu1 %v9038_v56  ;;  %v1003_v39 = vld [vmem:[%s10680_s13 + $0x1470] sm:$0xff]  ;;  %v9077_v55 = vcombine.low %v871_v35, %v875_v36 }
 0x309   : > { %v9206_v44 = vcombine.high %v999_v38, %v1003_v39  ;;  %v879_v46 = vld [vmem:[%s10680_s13 + $0x1090] sm:$0xff]  ;;  %v9205_v56 = vcombine.low %v999_v38, %v1003_v39 }
 0x30a   : > { %v883_v47 = vld [vmem:[%s10680_s13 + $0x10b0] sm:$0xff] }
 0x30b   : > { %7256 = vmatpush1.bf16.msra.mxu0 %v8909_v57  ;;  %7297 = vmatpush1.bf16.msra.mxu1 %v9037_v1  ;;  %v1007_v50 = vld [vmem:[%s10680_s13 + $0x1490] sm:$0xff]  ;;  %v9086_v54 = vcombine.high %v879_v46, %v883_v47 }
 0x30c   : > { %7257 = vmatprep.subr.bf16.mxu0 %v8918_v2  ;;  %7298 = vmatprep.subr.bf16.mxu1 %v9046_v4  ;;  %v1011_v53 = vld [vmem:[%s10680_s13 + $0x14b0] sm:$0xff]  ;;  %v9085_v2 = vcombine.low %v879_v46, %v883_v47 }
 0x30d   : > { %v9214_v61 = vcombine.high %v1007_v50, %v1011_v53  ;;  %v887_v51 = vld [vmem:[%s10680_s13 + $0x10d0] sm:$0xff]  ;;  %v9213_v4 = vcombine.low %v1007_v50, %v1011_v53 }
 0x30e   : > { %v891_v0 = vld [vmem:[%s10680_s13 + $0x10f0] sm:$0xff] }
 0x30f   : > { %7258 = vmatpush1.bf16.msra.mxu0 %v8917_v9  ;;  %7299 = vmatpush1.bf16.msra.mxu1 %v9045_v10  ;;  %v1015_v57 = vld [vmem:[%s10680_s13 + $0x14d0] sm:$0xff]  ;;  %v9094_v5 = vcombine.high %v887_v51, %v891_v0 }
 0x310   : > { %7259 = vmatprep.subr.bf16.mxu0 %v8926_v11  ;;  %7300 = vmatprep.subr.bf16.mxu1 %v9054_v12  ;;  %v1019_v1 = vld [vmem:[%s10680_s13 + $0x14f0] sm:$0xff]  ;;  %v9093_v11 = vcombine.low %v887_v51, %v891_v0 }
 0x311   : > { %v9222_v58 = vcombine.high %v1015_v57, %v1019_v1  ;;  %v895_v6 = vld [vmem:[%s10680_s13 + $0x1110] sm:$0xff]  ;;  %v9221_v12 = vcombine.low %v1015_v57, %v1019_v1 }
 0x312   : > { %v899_v8 = vld [vmem:[%s10680_s13 + $0x1130] sm:$0xff] }
 0x313   : > { %7260 = vmatpush1.bf16.msra.mxu0 %v8925_v20  ;;  %7301 = vmatpush1.bf16.msra.mxu1 %v9053_v22  ;;  %v1023_v9 = vld [vmem:[%s10680_s13 + $0x1510] sm:$0xff]  ;;  %v9102_v13 = vcombine.high %v895_v6, %v899_v8 }
 0x314   : > { %7261 = vmatprep.subr.bf16.mxu0 %v8934_v23  ;;  %7302 = vmatprep.subr.bf16.mxu1 %v9062_v24  ;;  %v1027_v10 = vld [vmem:[%s10680_s13 + $0x1530] sm:$0xff]  ;;  %v9101_v23 = vcombine.low %v895_v6, %v899_v8 }
 0x315   : > { %v9230_v14 = vcombine.high %v1023_v9, %v1027_v10  ;;  %v903_v16 = vld [vmem:[%s10680_s13 + $0x1150] sm:$0xff]  ;;  %v9229_v24 = vcombine.low %v1023_v9, %v1027_v10 }
 0x316   : > { %v907_v18 = vld [vmem:[%s10680_s13 + $0x1170] sm:$0xff] }
 0x317   : > { %7262 = vmatpush1.bf16.msra.mxu0 %v8933_v30  ;;  %7303 = vmatpush1.bf16.msra.mxu1 %v9061_v31  ;;  %v1031_v20 = vld [vmem:[%s10680_s13 + $0x1550] sm:$0xff]  ;;  %v9110_v25 = vcombine.high %v903_v16, %v907_v18 }
 0x318   : > { %7313 = vmatprep.subr.bf16.mxu0 %v9070_v33  ;;  %7354 = vmatprep.subr.bf16.mxu1 %v9198_v34  ;;  %v1035_v22 = vld [vmem:[%s10680_s13 + $0x1570] sm:$0xff]  ;;  %v9109_v33 = vcombine.low %v903_v16, %v907_v18 }
 0x319   : > { %v9238_v26 = vcombine.high %v1031_v20, %v1035_v22  ;;  %v911_v27 = vld [vmem:[%s10680_s13 + $0x1190] sm:$0xff]  ;;  %v9237_v34 = vcombine.low %v1031_v20, %v1035_v22 }
 0x31a   : > { %7264 = vmatmul.mubr.bf16.vlgmr.msra.gmra.mrb[36].mxu0 %v10856_v37  ;;  %7305 = vmatmul.mubr.bf16.vlgmr.msra.gmra.mrb[36].mxu1 %v10861_v41  ;;  %v915_v28 = vld [vmem:[%s10680_s13 + $0x11b0] sm:$0xff] }
 0x31b   : > { %7314 = vmatpush1.bf16.msra.mxu0 %v9069_v40  ;;  %7355 = vmatpush1.bf16.msra.mxu1 %v9197_v42  ;;  %v1039_v30 = vld [vmem:[%s10680_s13 + $0x1590] sm:$0xff]  ;;  %v9118_v35 = vcombine.high %v911_v27, %v915_v28 }
 0x31c   : > { %7315 = vmatprep.subr.bf16.mxu0 %v9078_v43  ;;  %7356 = vmatprep.subr.bf16.mxu1 %v9206_v44  ;;  %v1043_v31 = vld [vmem:[%s10680_s13 + $0x15b0] sm:$0xff] }
 0x31d   : > { %7345 = vmatprep.mubr.bf16.mxu0 %v10866_v49  ;;  %7386 = vmatprep.mubr.bf16.mxu1 %v10871_v52  ;;  %v9246_v38 = vcombine.high %v1039_v30, %v1043_v31  ;;  %v919_v39 = vld [vmem:[%s10680_s13 + $0x11d0] sm:$0xff] }
 0x31e   : > { %v923_v40 = vld [vmem:[%s10680_s13 + $0x11f0] sm:$0xff] }
 0x31f   : > { %7316 = vmatpush1.bf16.msra.mxu0 %v9077_v55  ;;  %7357 = vmatpush1.bf16.msra.mxu1 %v9205_v56  ;;  %v1047_v46 = vld [vmem:[%s10680_s13 + $0x15d0] sm:$0xff]  ;;  %v9117_v56 = vcombine.low %v911_v27, %v915_v28  ;;  %v9126_v0 = vcombine.high %v919_v39, %v923_v40  ;;  %v9125_v6 = vcombine.low %v919_v39, %v923_v40 }
 0x320   : > { %7317 = vmatprep.subr.bf16.mxu0 %v9086_v54  ;;  %7358 = vmatprep.subr.bf16.mxu1 %v9214_v61  ;;  %v1051_v47 = vld [vmem:[%s10680_s13 + $0x15f0] sm:$0xff] }
 0x321   : > { %v9254_v1 = vcombine.high %v1047_v46, %v1051_v47  ;;  %v9253_v8 = vcombine.low %v1047_v46, %v1051_v47  ;;  %v1087_v46 = vld [vmem:[%s10680_s13 + $0x1710] sm:$0xff] }
 0x322   : > { %v1091_v47 = vld [vmem:[%s10680_s13 + $0x1730] sm:$0xff] }
 0x323   : > { %7318 = vmatpush1.bf16.msra.mxu0 %v9085_v2  ;;  %7359 = vmatpush1.bf16.msra.mxu1 %v9213_v4  ;;  %v927_v2 = vld [vmem:[%s10680_s13 + $0x1210] sm:$0xff] }
 0x324   : > { %7319 = vmatprep.subr.bf16.mxu0 %v9094_v5  ;;  %7360 = vmatprep.subr.bf16.mxu1 %v9222_v58  ;;  %v931_v4 = vld [vmem:[%s10680_s13 + $0x1230] sm:$0xff] }
 0x325   : > { %v1055_v5 = vld [vmem:[%s10680_s13 + $0x1610] sm:$0xff]  ;;  %v9134_v9 = vcombine.high %v927_v2, %v931_v4  ;;  %v9133_v16 = vcombine.low %v927_v2, %v931_v4 }
 0x326   : > { %v1059_v58 = vld [vmem:[%s10680_s13 + $0x1630] sm:$0xff] }
 0x327   : > { %7320 = vmatpush1.bf16.msra.mxu0 %v9093_v11  ;;  %7361 = vmatpush1.bf16.msra.mxu1 %v9221_v12  ;;  %v9262_v10 = vcombine.high %v1055_v5, %v1059_v58  ;;  %v935_v11 = vld [vmem:[%s10680_s13 + $0x1250] sm:$0xff]  ;;  %v9261_v18 = vcombine.low %v1055_v5, %v1059_v58 }
 0x328   : > { %7321 = vmatprep.subr.bf16.mxu0 %v9102_v13  ;;  %7362 = vmatprep.subr.bf16.mxu1 %v9230_v14  ;;  %v939_v12 = vld [vmem:[%s10680_s13 + $0x1270] sm:$0xff] }
 0x329   : > { %v1063_v13 = vld [vmem:[%s10680_s13 + $0x1650] sm:$0xff]  ;;  %v9142_v20 = vcombine.high %v935_v11, %v939_v12  ;;  %v9141_v27 = vcombine.low %v935_v11, %v939_v12 }
 0x32a   : > { %v1067_v14 = vld [vmem:[%s10680_s13 + $0x1670] sm:$0xff] }
 0x32b   : > { %7322 = vmatpush1.bf16.msra.mxu0 %v9101_v23  ;;  %7363 = vmatpush1.bf16.msra.mxu1 %v9229_v24  ;;  %v9270_v22 = vcombine.high %v1063_v13, %v1067_v14  ;;  %v943_v23 = vld [vmem:[%s10680_s13 + $0x1290] sm:$0xff]  ;;  %v9269_v28 = vcombine.low %v1063_v13, %v1067_v14 }
 0x32c   : > { %7323 = vmatprep.subr.bf16.mxu0 %v9110_v25  ;;  %7364 = vmatprep.subr.bf16.mxu1 %v9238_v26  ;;  %v947_v24 = vld [vmem:[%s10680_s13 + $0x12b0] sm:$0xff] }
 0x32d   : > { %v7019_v36 = vpop.f32.mrb[24].mxu0  ;;  %v7060_v43 = vpop.f32.mrb[24].mxu1  ;;  %v1071_v25 = vld [vmem:[%s10680_s13 + $0x1690] sm:$0xff] }
 0x32e   : > { %v7020_v42 = vadd.f32 %v7019_v36, %v11414_v63  ;;  %v7021_v44 = vpop.f32.mrb[25].mxu0  ;;  %v7062_v53 = vpop.f32.mrb[25].mxu1  ;;  %v9245_v63 = vcombine.low %v1039_v30, %v1043_v31  ;;  %v1075_v26 = vld [vmem:[%s10680_s13 + $0x16b0] sm:$0xff]  ;;  %v9150_v30 = vcombine.high %v943_v23, %v947_v24 }
 0x32f   : > { %v7022_v50 = vadd.f32 %v7021_v44, %v11416_v62  ;;  %v7023_v55 = vpop.f32.mrb[26].mxu0  ;;  %7324 = vmatpush1.bf16.msra.mxu0 %v9109_v33  ;;  %v7064_v61 = vpop.f32.mrb[26].mxu1  ;;  %7365 = vmatpush1.bf16.msra.mxu1 %v9237_v34  ;;  %v9278_v31 = vcombine.high %v1071_v25, %v1075_v26  ;;  %v951_v33 = vld [vmem:[%s10680_s13 + $0x12d0] sm:$0xff]  ;;  %v9277_v39 = vcombine.low %v1071_v25, %v1075_v26 }
 0x330   : > { %v11488_v54 = vadd.f32 %v7060_v43, %v7020_v42  ;;  %v7024_v51 = vpop.f32.mrb[27].mxu0  ;;  %7325 = vmatprep.subr.bf16.mxu0 %v9118_v35  ;;  %v7065_v62 = vpop.f32.mrb[27].mxu1  ;;  %7366 = vmatprep.subr.bf16.mxu1 %v9246_v38  ;;  %v955_v34 = vld [vmem:[%s10680_s13 + $0x12f0] sm:$0xff]  ;;  %v9149_v38 = vcombine.low %v943_v23, %v947_v24 }
 0x331   : > { %v11490_v57 = vadd.f32 %v7062_v53, %v7022_v50  ;;  %v1079_v35 = vld [vmem:[%s10680_s13 + $0x16d0] sm:$0xff]  ;;  %v9158_v40 = vcombine.high %v951_v33, %v955_v34  ;;  %v9157_v50 = vcombine.low %v951_v33, %v955_v34 }
 0x332   : > { %v1083_v36 = vld [vmem:[%s10680_s13 + $0x16f0] sm:$0xff] }
 0x333   : > { %7326 = vmatpush1.bf16.msra.mxu0 %v9117_v56  ;;  %7367 = vmatpush1.bf16.msra.mxu1 %v9245_v63  ;;  %v9286_v42 = vcombine.high %v1079_v35, %v1083_v36  ;;  %v959_v43 = vld [vmem:[%s10680_s13 + $0x1310] sm:$0xff]  ;;  %v9285_v53 = vcombine.low %v1079_v35, %v1083_v36  ;;  %v9294_v56 = vcombine.high %v1087_v46, %v1091_v47 }
 0x334   : > { %7327 = vmatprep.subr.bf16.mxu0 %v9126_v0  ;;  %7368 = vmatprep.subr.bf16.mxu1 %v9254_v1  ;;  %v963_v44 = vld [vmem:[%s10680_s13 + $0x1330] sm:$0xff]  ;;  %v9293_v1 = vcombine.low %v1087_v46, %v1091_v47 }
 0x335   : > { %v9166_v55 = vcombine.high %v959_v43, %v963_v44  ;;  %v967_v61 = vld [vmem:[%s10680_s13 + $0x1350] sm:$0xff]  ;;  %v9165_v62 = vcombine.low %v959_v43, %v963_v44 }
 0x336   : > { %v971_v51 = vld [vmem:[%s10680_s13 + $0x1370] sm:$0xff] }
 0x337   : > { %7328 = vmatpush1.bf16.msra.mxu0 %v9125_v6  ;;  %7369 = vmatpush1.bf16.msra.mxu1 %v9253_v8  ;;  %v1095_v63 = vld [vmem:[%s10680_s13 + $0x1750] sm:$0xff]  ;;  %v9174_v2 = vcombine.high %v967_v61, %v971_v51 }
 0x338   : > { %7329 = vmatprep.subr.bf16.mxu0 %v9134_v9  ;;  %7370 = vmatprep.subr.bf16.mxu1 %v9262_v10  ;;  %v1099_v0 = vld [vmem:[%s10680_s13 + $0x1770] sm:$0xff]  ;;  %v9173_v9 = vcombine.low %v967_v61, %v971_v51 }
 0x339   : > { %v9302_v4 = vcombine.high %v1095_v63, %v1099_v0  ;;  %v975_v5 = vld [vmem:[%s10680_s13 + $0x1390] sm:$0xff]  ;;  %v9301_v10 = vcombine.low %v1095_v63, %v1099_v0 }
 0x33a   : > { %v979_v58 = vld [vmem:[%s10680_s13 + $0x13b0] sm:$0xff] }
 0x33b   : > { %7330 = vmatpush1.bf16.msra.mxu0 %v9133_v16  ;;  %7371 = vmatpush1.bf16.msra.mxu1 %v9261_v18  ;;  %v1103_v6 = vld [vmem:[%s10680_s13 + $0x1790] sm:$0xff]  ;;  %v9182_v11 = vcombine.high %v975_v5, %v979_v58 }
 0x33c   : > { %7331 = vmatprep.subr.bf16.mxu0 %v9142_v20  ;;  %7372 = vmatprep.subr.bf16.mxu1 %v9270_v22  ;;  %v1107_v8 = vld [vmem:[%s10680_s13 + $0x17b0] sm:$0xff]  ;;  %v9181_v20 = vcombine.low %v975_v5, %v979_v58 }
 0x33d   : > { %v9310_v12 = vcombine.high %v1103_v6, %v1107_v8  ;;  %v983_v13 = vld [vmem:[%s10680_s13 + $0x13d0] sm:$0xff]  ;;  %v9309_v22 = vcombine.low %v1103_v6, %v1107_v8 }
 0x33e   : > { %v987_v14 = vld [vmem:[%s10680_s13 + $0x13f0] sm:$0xff] }
 0x33f   : > { %7332 = vmatpush1.bf16.msra.mxu0 %v9141_v27  ;;  %7373 = vmatpush1.bf16.msra.mxu1 %v9269_v28  ;;  %v1111_v16 = vld [vmem:[%s10680_s13 + $0x17d0] sm:$0xff]  ;;  %v9190_v23 = vcombine.high %v983_v13, %v987_v14 }
 0x340   : > { %7333 = vmatprep.subr.bf16.mxu0 %v9150_v30  ;;  %7374 = vmatprep.subr.bf16.mxu1 %v9278_v31  ;;  %v1115_v18 = vld [vmem:[%s10680_s13 + $0x17f0] sm:$0xff]  ;;  %v9189_v30 = vcombine.low %v983_v13, %v987_v14 }
 0x341   : > { %v9318_v24 = vcombine.high %v1111_v16, %v1115_v18  ;;  %v1119_v25 = vld [vmem:[%s10680_s13 + $0x1810] sm:$0xff]  ;;  %v9317_v31 = vcombine.low %v1111_v16, %v1115_v18 }
 0x342   : > { %v1123_v26 = vld [vmem:[%s10680_s13 + $0x1830] sm:$0xff] }
 0x343   : > { %7334 = vmatpush1.bf16.msra.mxu0 %v9149_v38  ;;  %7375 = vmatpush1.bf16.msra.mxu1 %v9277_v39  ;;  %v1247_v27 = vld [vmem:[%s10680_s13 + $0x1c10] sm:$0xff]  ;;  %v9326_v33 = vcombine.high %v1119_v25, %v1123_v26 }
 0x344   : > { %7335 = vmatprep.subr.bf16.mxu0 %v9158_v40  ;;  %7376 = vmatprep.subr.bf16.mxu1 %v9286_v42  ;;  %v1251_v28 = vld [vmem:[%s10680_s13 + $0x1c30] sm:$0xff]  ;;  %v9325_v40 = vcombine.low %v1119_v25, %v1123_v26 }
 0x345   : > { %v9454_v34 = vcombine.high %v1247_v27, %v1251_v28  ;;  %v1127_v35 = vld [vmem:[%s10680_s13 + $0x1850] sm:$0xff]  ;;  %v9453_v42 = vcombine.low %v1247_v27, %v1251_v28 }
 0x346   : > { %v1131_v36 = vld [vmem:[%s10680_s13 + $0x1870] sm:$0xff] }
 0x347   : > { %7336 = vmatpush1.bf16.msra.mxu0 %v9157_v50  ;;  %7377 = vmatpush1.bf16.msra.mxu1 %v9285_v53  ;;  %v1255_v38 = vld [vmem:[%s10680_s13 + $0x1c50] sm:$0xff]  ;;  %v9334_v43 = vcombine.high %v1127_v35, %v1131_v36 }
 0x348   : > { %7337 = vmatprep.subr.bf16.mxu0 %v9166_v55  ;;  %7378 = vmatprep.subr.bf16.mxu1 %v9294_v56  ;;  %v1259_v39 = vld [vmem:[%s10680_s13 + $0x1c70] sm:$0xff]  ;;  %v9333_v55 = vcombine.low %v1127_v35, %v1131_v36 }
 0x349   : > { %v9462_v44 = vcombine.high %v1255_v38, %v1259_v39  ;;  %v1135_v46 = vld [vmem:[%s10680_s13 + $0x1890] sm:$0xff]  ;;  %v9461_v56 = vcombine.low %v1255_v38, %v1259_v39 }
 0x34a   : > { %v1139_v47 = vld [vmem:[%s10680_s13 + $0x18b0] sm:$0xff] }
 0x34b   : > { %7338 = vmatpush1.bf16.msra.mxu0 %v9165_v62  ;;  %7379 = vmatpush1.bf16.msra.mxu1 %v9293_v1  ;;  %v1263_v50 = vld [vmem:[%s10680_s13 + $0x1c90] sm:$0xff]  ;;  %v9342_v61 = vcombine.high %v1135_v46, %v1139_v47 }
 0x34c   : > { %7339 = vmatprep.subr.bf16.mxu0 %v9174_v2  ;;  %7380 = vmatprep.subr.bf16.mxu1 %v9302_v4  ;;  %v1267_v53 = vld [vmem:[%s10680_s13 + $0x1cb0] sm:$0xff]  ;;  %v9341_v2 = vcombine.low %v1135_v46, %v1139_v47 }
 0x34d   : > { %v9470_v51 = vcombine.high %v1263_v50, %v1267_v53  ;;  %v1143_v63 = vld [vmem:[%s10680_s13 + $0x18d0] sm:$0xff]  ;;  %v9469_v4 = vcombine.low %v1263_v50, %v1267_v53 }
 0x34e   : > { %v1147_v0 = vld [vmem:[%s10680_s13 + $0x18f0] sm:$0xff] }
 0x34f   : > { %7340 = vmatpush1.bf16.msra.mxu0 %v9173_v9  ;;  %7381 = vmatpush1.bf16.msra.mxu1 %v9301_v10  ;;  %v1271_v62 = vld [vmem:[%s10680_s13 + $0x1cd0] sm:$0xff]  ;;  %v9350_v5 = vcombine.high %v1143_v63, %v1147_v0 }
 0x350   : > { %7341 = vmatprep.subr.bf16.mxu0 %v9182_v11  ;;  %7382 = vmatprep.subr.bf16.mxu1 %v9310_v12  ;;  %v1275_v1 = vld [vmem:[%s10680_s13 + $0x1cf0] sm:$0xff]  ;;  %v9349_v11 = vcombine.low %v1143_v63, %v1147_v0  ;;  %v312_v63 = vld [vmem:[#allocation2 + $0x18] sm:$0xff] }
 0x351   : > { %v9478_v58 = vcombine.high %v1271_v62, %v1275_v1  ;;  %v1151_v6 = vld [vmem:[%s10680_s13 + $0x1910] sm:$0xff]  ;;  %v9477_v12 = vcombine.low %v1271_v62, %v1275_v1 }
 0x352   : > { %v1155_v8 = vld [vmem:[%s10680_s13 + $0x1930] sm:$0xff] }
 0x353   : > { %7342 = vmatpush1.bf16.msra.mxu0 %v9181_v20  ;;  %7383 = vmatpush1.bf16.msra.mxu1 %v9309_v22  ;;  %v1279_v9 = vld [vmem:[%s10680_s13 + $0x1d10] sm:$0xff]  ;;  %v9358_v13 = vcombine.high %v1151_v6, %v1155_v8 }
 0x354   : > { %7343 = vmatprep.subr.bf16.mxu0 %v9190_v23  ;;  %7384 = vmatprep.subr.bf16.mxu1 %v9318_v24  ;;  %v1283_v10 = vld [vmem:[%s10680_s13 + $0x1d30] sm:$0xff]  ;;  %v9357_v23 = vcombine.low %v1151_v6, %v1155_v8 }
 0x355   : > { %v9486_v14 = vcombine.high %v1279_v9, %v1283_v10  ;;  %v1159_v16 = vld [vmem:[%s10680_s13 + $0x1950] sm:$0xff]  ;;  %v9485_v24 = vcombine.low %v1279_v9, %v1283_v10 }
 0x356   : > { %v1163_v18 = vld [vmem:[%s10680_s13 + $0x1970] sm:$0xff] }
 0x357   : > { %7344 = vmatpush1.bf16.msra.mxu0 %v9189_v30  ;;  %7385 = vmatpush1.bf16.msra.mxu1 %v9317_v31  ;;  %v1287_v20 = vld [vmem:[%s10680_s13 + $0x1d50] sm:$0xff]  ;;  %v9366_v25 = vcombine.high %v1159_v16, %v1163_v18 }
 0x358   : > { %7395 = vmatprep.subr.bf16.mxu0 %v9326_v33  ;;  %7436 = vmatprep.subr.bf16.mxu1 %v9454_v34  ;;  %v1291_v22 = vld [vmem:[%s10680_s13 + $0x1d70] sm:$0xff]  ;;  %v9365_v33 = vcombine.low %v1159_v16, %v1163_v18 }
 0x359   : > { %v9494_v26 = vcombine.high %v1287_v20, %v1291_v22  ;;  %v1167_v27 = vld [vmem:[%s10680_s13 + $0x1990] sm:$0xff]  ;;  %v9493_v34 = vcombine.low %v1287_v20, %v1291_v22 }
 0x35a   : > { %7346 = vmatmul.mubr.bf16.vlgmr.msra.gmra.mrb[40].mxu0 %v10936_v3  ;;  %7387 = vmatmul.mubr.bf16.vlgmr.msra.gmra.mrb[40].mxu1 %v10941_v7  ;;  %v1171_v28 = vld [vmem:[%s10680_s13 + $0x19b0] sm:$0xff] }
 0x35b   : > { %7396 = vmatpush1.bf16.msra.mxu0 %v9325_v40  ;;  %7437 = vmatpush1.bf16.msra.mxu1 %v9453_v42  ;;  %v1295_v30 = vld [vmem:[%s10680_s13 + $0x1d90] sm:$0xff]  ;;  %v9374_v35 = vcombine.high %v1167_v27, %v1171_v28 }
 0x35c   : > { %7397 = vmatprep.subr.bf16.mxu0 %v9334_v43  ;;  %7438 = vmatprep.subr.bf16.mxu1 %v9462_v44  ;;  %v1299_v31 = vld [vmem:[%s10680_s13 + $0x1db0] sm:$0xff] }
 0x35d   : > { %7427 = vmatprep.mubr.bf16.mxu0 %v10946_v15  ;;  %7468 = vmatprep.mubr.bf16.mxu1 %v10951_v19  ;;  %v9502_v38 = vcombine.high %v1295_v30, %v1299_v31  ;;  %v1175_v39 = vld [vmem:[%s10680_s13 + $0x19d0] sm:$0xff]  ;;  %v9501_v62 = vcombine.low %v1295_v30, %v1299_v31 }
 0x35e   : > { %v1179_v40 = vld [vmem:[%s10680_s13 + $0x19f0] sm:$0xff] }
 0x35f   : > { %7398 = vmatpush1.bf16.msra.mxu0 %v9333_v55  ;;  %7439 = vmatpush1.bf16.msra.mxu1 %v9461_v56  ;;  %v1303_v46 = vld [vmem:[%s10680_s13 + $0x1dd0] sm:$0xff]  ;;  %v9382_v1 = vcombine.high %v1175_v39, %v1179_v40 }
 0x360   : > { %7399 = vmatprep.subr.bf16.mxu0 %v9342_v61  ;;  %7440 = vmatprep.subr.bf16.mxu1 %v9470_v51  ;;  %v1307_v47 = vld [vmem:[%s10680_s13 + $0x1df0] sm:$0xff]  ;;  %v9373_v61 = vcombine.low %v1167_v27, %v1171_v28 }
 0x361   : > { %v311_v50 = vld [vmem:[#allocation2 + $0x10] sm:$0xff] }
 0x362   : > { %v1311_v8 = vld [vmem:[%s10680_s13 + $0x1e10] sm:$0xff] }
 0x363   : > { %7400 = vmatpush1.bf16.msra.mxu0 %v9341_v2  ;;  %7441 = vmatpush1.bf16.msra.mxu1 %v9469_v4  ;;  %v1315_v9 = vld [vmem:[%s10680_s13 + $0x1e30] sm:$0xff] }
 0x364   : > { %7401 = vmatprep.subr.bf16.mxu0 %v9350_v5  ;;  %7442 = vmatprep.subr.bf16.mxu1 %v9478_v58  ;;  %v1183_v5 = vld [vmem:[%s10680_s13 + $0x1a10] sm:$0xff] }
 0x365   : > { %v1187_v58 = vld [vmem:[%s10680_s13 + $0x1a30] sm:$0xff] }
 0x366   : > { %v1191_v16 = vld [vmem:[%s10680_s13 + $0x1a50] sm:$0xff] }
 0x367   : > { %7402 = vmatpush1.bf16.msra.mxu0 %v9349_v11  ;;  %7443 = vmatpush1.bf16.msra.mxu1 %v9477_v12  ;;  %v9381_v11 = vcombine.low %v1175_v39, %v1179_v40  ;;  %v9509_v12 = vcombine.low %v1303_v46, %v1307_v47  ;;  %v1195_v18 = vld [vmem:[%s10680_s13 + $0x1a70] sm:$0xff] }
 0x368   : > { %7403 = vmatprep.subr.bf16.mxu0 %v9358_v13  ;;  %7444 = vmatprep.subr.bf16.mxu1 %v9486_v14  ;;  %v9390_v13 = vcombine.high %v1183_v5, %v1187_v58  ;;  %v9518_v14 = vcombine.high %v1311_v8, %v1315_v9  ;;  %v1319_v20 = vld [vmem:[%s10680_s13 + $0x1e50] sm:$0xff] }
 0x369   : > { %v1323_v22 = vld [vmem:[%s10680_s13 + $0x1e70] sm:$0xff] }
 0x36a   : > { %v1199_v27 = vld [vmem:[%s10680_s13 + $0x1a90] sm:$0xff] }
 0x36b   : > { %7404 = vmatpush1.bf16.msra.mxu0 %v9357_v23  ;;  %7445 = vmatpush1.bf16.msra.mxu1 %v9485_v24  ;;  %v9389_v23 = vcombine.low %v1183_v5, %v1187_v58  ;;  %v9517_v24 = vcombine.low %v1311_v8, %v1315_v9  ;;  %v1203_v28 = vld [vmem:[%s10680_s13 + $0x1ab0] sm:$0xff] }
 0x36c   : > { %7405 = vmatprep.subr.bf16.mxu0 %v9366_v25  ;;  %7446 = vmatprep.subr.bf16.mxu1 %v9494_v26  ;;  %v9398_v25 = vcombine.high %v1191_v16, %v1195_v18  ;;  %v9526_v26 = vcombine.high %v1319_v20, %v1323_v22  ;;  %v1327_v30 = vld [vmem:[%s10680_s13 + $0x1e90] sm:$0xff] }
 0x36d   : > { %v7101_v36 = vpop.f32.mrb[28].mxu0  ;;  %v7142_v43 = vpop.f32.mrb[28].mxu1  ;;  %v1331_v31 = vld [vmem:[%s10680_s13 + $0x1eb0] sm:$0xff] }
 0x36e   : > { %v7102_v42 = vadd.f32 %v7101_v36, %v11488_v54  ;;  %v7103_v44 = vpop.f32.mrb[29].mxu0  ;;  %v7144_v55 = vpop.f32.mrb[29].mxu1  ;;  %v9534_v36 = vcombine.high %v1327_v30, %v1331_v31  ;;  %v1211_v39 = vld [vmem:[%s10680_s13 + $0x1af0] sm:$0xff] }
 0x36f   : > { %v7104_v53 = vadd.f32 %v7103_v44, %v11490_v57  ;;  %v7105_v56 = vpop.f32.mrb[30].mxu0  ;;  %7406 = vmatpush1.bf16.msra.mxu0 %v9365_v33  ;;  %v7146_v0 = vpop.f32.mrb[30].mxu1  ;;  %7447 = vmatpush1.bf16.msra.mxu1 %v9493_v34  ;;  %v9510_v57 = vcombine.high %v1303_v46, %v1307_v47  ;;  %v9397_v33 = vcombine.low %v1191_v16, %v1195_v18  ;;  %v1335_v40 = vld [vmem:[%s10680_s13 + $0x1ed0] sm:$0xff] }
 0x370   : > { %v7143_v51 = vadd.f32 %v7142_v43, %v7102_v42  ;;  %v7106_v54 = vpop.f32.mrb[31].mxu0  ;;  %7407 = vmatprep.subr.bf16.mxu0 %v9374_v35  ;;  %v7147_v4 = vpop.f32.mrb[31].mxu1  ;;  %7448 = vmatprep.subr.bf16.mxu1 %v9502_v38  ;;  %v9525_v34 = vcombine.low %v1319_v20, %v1323_v22  ;;  %v9406_v35 = vcombine.high %v1199_v27, %v1203_v28  ;;  %v1207_v38 = vld [vmem:[%s10680_s13 + $0x1ad0] sm:$0xff] }
 0x371   : > { %v7145_v2 = vadd.f32 %v7144_v55, %v7104_v53  ;;  %v1339_v42 = vld [vmem:[%s10680_s13 + $0x1ef0] sm:$0xff]  ;;  %v9405_v43 = vcombine.low %v1199_v27, %v1203_v28  ;;  %v9533_v44 = vcombine.low %v1327_v30, %v1331_v31  ;;  %v9414_v46 = vcombine.high %v1207_v38, %v1211_v39  ;;  %v352_v27 = vld [vmem:[%s10680_s13 + $0x18] sm:$0xff] }
 0x372   : > { %v7807_v6 = vadd.f32 %v7143_v51, %v311_v50  ;;  %v9542_v47 = vcombine.high %v1335_v40, %v1339_v42  ;;  %v1215_v50 = vld [vmem:[%s10680_s13 + $0x1b10] sm:$0xff]  ;;  %v9541_v51 = vcombine.low %v1335_v40, %v1339_v42  ;;  %v356_v28 = vld [vmem:[%s10680_s13 + $0x38] sm:$0xff] }
 0x373   : > { %v7808_v10 = vadd.f32 %v7145_v2, %v312_v63  ;;  %7408 = vmatpush1.bf16.msra.mxu0 %v9373_v61  ;;  %7449 = vmatpush1.bf16.msra.mxu1 %v9501_v62  ;;  %v1219_v53 = vld [vmem:[%s10680_s13 + $0x1b30] sm:$0xff]  ;;  %v9413_v61 = vcombine.low %v1207_v38, %v1211_v39  ;;  %v480_v30 = vld [vmem:[%s10680_s13 + $0x418] sm:$0xff] }
 0x374   : > { %7815 = vst [vmem:[#allocation2 + $0x10] sm:$0xff] %v7807_v6  ;;  %7409 = vmatprep.subr.bf16.mxu0 %v9382_v1  ;;  %7450 = vmatprep.subr.bf16.mxu1 %v9510_v57  ;;  %v1343_v55 = vld [vmem:[%s10680_s13 + $0x1f10] sm:$0xff]  ;;  %v9422_v63 = vcombine.high %v1215_v50, %v1219_v53  ;;  %v9421_v4 = vcombine.low %v1215_v50, %v1219_v53  ;;  %v484_v31 = vld [vmem:[%s10680_s13 + $0x438] sm:$0xff] }
 0x375   : > { %7816 = vst [vmem:[#allocation2 + $0x18] sm:$0xff] %v7808_v10  ;;  %v1347_v56 = vld [vmem:[%s10680_s13 + $0x1f30] sm:$0xff]  ;;  %v360_v38 = vld [vmem:[%s10680_s13 + $0x58] sm:$0xff] }
 0x376   : > { %v9550_v0 = vcombine.high %v1343_v55, %v1347_v56  ;;  %v1223_v54 = vld [vmem:[%s10680_s13 + $0x1b50] sm:$0xff]  ;;  %v9549_v57 = vcombine.low %v1343_v55, %v1347_v56  ;;  %v364_v39 = vld [vmem:[%s10680_s13 + $0x78] sm:$0xff] }
 0x377   : > { %7410 = vmatpush1.bf16.msra.mxu0 %v9381_v11  ;;  %7451 = vmatpush1.bf16.msra.mxu1 %v9509_v12  ;;  %v1227_v62 = vld [vmem:[%s10680_s13 + $0x1b70] sm:$0xff]  ;;  %v488_v40 = vld [vmem:[%s10680_s13 + $0x458] sm:$0xff] }
 0x378   : > { %7411 = vmatprep.subr.bf16.mxu0 %v9390_v13  ;;  %7452 = vmatprep.subr.bf16.mxu1 %v9518_v14  ;;  %v1351_v1 = vld [vmem:[%s10680_s13 + $0x1f50] sm:$0xff]  ;;  %v9430_v5 = vcombine.high %v1223_v54, %v1227_v62  ;;  %v9429_v11 = vcombine.low %v1223_v54, %v1227_v62  ;;  %v492_v42 = vld [vmem:[%s10680_s13 + $0x478] sm:$0xff] }
 0x379   : > { %v1355_v2 = vld [vmem:[%s10680_s13 + $0x1f70] sm:$0xff]  ;;  %v368_v50 = vld [vmem:[%s10680_s13 + $0x98] sm:$0xff] }
 0x37a   : > { %v9558_v58 = vcombine.high %v1351_v1, %v1355_v2  ;;  %v1231_v6 = vld [vmem:[%s10680_s13 + $0x1b90] sm:$0xff]  ;;  %v9557_v12 = vcombine.low %v1351_v1, %v1355_v2  ;;  %v372_v53 = vld [vmem:[%s10680_s13 + $0xb8] sm:$0xff] }
 0x37b   : > { %7412 = vmatpush1.bf16.msra.mxu0 %v9389_v23  ;;  %7453 = vmatpush1.bf16.msra.mxu1 %v9517_v24  ;;  %v1235_v8 = vld [vmem:[%s10680_s13 + $0x1bb0] sm:$0xff]  ;;  %v496_v55 = vld [vmem:[%s10680_s13 + $0x498] sm:$0xff] }
 0x37c   : > { %7413 = vmatprep.subr.bf16.mxu0 %v9398_v25  ;;  %7454 = vmatprep.subr.bf16.mxu1 %v9526_v26  ;;  %v1359_v9 = vld [vmem:[%s10680_s13 + $0x1f90] sm:$0xff]  ;;  %v9438_v13 = vcombine.high %v1231_v6, %v1235_v8  ;;  %v9437_v23 = vcombine.low %v1231_v6, %v1235_v8  ;;  %v500_v56 = vld [vmem:[%s10680_s13 + $0x4b8] sm:$0xff] }
 0x37d   : > { %v1363_v10 = vld [vmem:[%s10680_s13 + $0x1fb0] sm:$0xff]  ;;  %v376_v54 = vld [vmem:[%s10680_s13 + $0xd8] sm:$0xff] }
 0x37e   : > { %v9566_v14 = vcombine.high %v1359_v9, %v1363_v10  ;;  %v1239_v16 = vld [vmem:[%s10680_s13 + $0x1bd0] sm:$0xff]  ;;  %v9565_v24 = vcombine.low %v1359_v9, %v1363_v10  ;;  %v380_v62 = vld [vmem:[%s10680_s13 + $0xf8] sm:$0xff] }
 0x37f   : > { %7414 = vmatpush1.bf16.msra.mxu0 %v9397_v33  ;;  %7455 = vmatpush1.bf16.msra.mxu1 %v9525_v34  ;;  %v1243_v18 = vld [vmem:[%s10680_s13 + $0x1bf0] sm:$0xff]  ;;  %v504_v1 = vld [vmem:[%s10680_s13 + $0x4d8] sm:$0xff]  ;;  %v8583_v10 = vcombine.low %v376_v54, %v380_v62 }
 0x380   : > { %7415 = vmatprep.subr.bf16.mxu0 %v9406_v35  ;;  %7456 = vmatprep.subr.bf16.mxu1 %v9534_v36  ;;  %v1367_v20 = vld [vmem:[%s10680_s13 + $0x1fd0] sm:$0xff]  ;;  %v9446_v25 = vcombine.high %v1239_v16, %v1243_v18  ;;  %v9445_v33 = vcombine.low %v1239_v16, %v1243_v18  ;;  %v8560_v35 = vcombine.high %v352_v27, %v356_v28  ;;  %v508_v2 = vld [vmem:[%s10680_s13 + $0x4f8] sm:$0xff] }
 0x381   : > { %v1371_v22 = vld [vmem:[%s10680_s13 + $0x1ff0] sm:$0xff]  ;;  %v8688_v36 = vcombine.high %v480_v30, %v484_v31  ;;  %v384_v6 = vld [vmem:[%s10680_s13 + $0x118] sm:$0xff] }
 0x382   : > { %v9574_v26 = vcombine.high %v1367_v20, %v1371_v22  ;;  %v9573_v34 = vcombine.low %v1367_v20, %v1371_v22  ;;  %v388_v8 = vld [vmem:[%s10680_s13 + $0x138] sm:$0xff] }
 0x383   : > { %7416 = vmatpush1.bf16.msra.mxu0 %v9405_v43  ;;  %7457 = vmatpush1.bf16.msra.mxu1 %v9533_v44  ;;  %v8559_v43 = vcombine.low %v352_v27, %v356_v28  ;;  %v8687_v44 = vcombine.low %v480_v30, %v484_v31  ;;  %v512_v9 = vld [vmem:[%s10680_s13 + $0x518] sm:$0xff]  ;;  %v8591_v20 = vcombine.low %v384_v6, %v388_v8 }
 0x384   : > { %7417 = vmatprep.subr.bf16.mxu0 %v9414_v46  ;;  %7458 = vmatprep.subr.bf16.mxu1 %v9542_v47  ;;  %v8568_v46 = vcombine.high %v360_v38, %v364_v39  ;;  %v8696_v47 = vcombine.high %v488_v40, %v492_v42  ;;  %v520_v16 = vld [vmem:[%s10680_s13 + $0x558] sm:$0xff] }
 0x385   : > { %v524_v18 = vld [vmem:[%s10680_s13 + $0x578] sm:$0xff] }
 0x386   : > { %v528_v27 = vld [vmem:[%s10680_s13 + $0x598] sm:$0xff]  ;;  %v8727_v31 = vcombine.low %v520_v16, %v524_v18 }
 0x387   : > { %7418 = vmatpush1.bf16.msra.mxu0 %v9413_v61  ;;  %7459 = vmatpush1.bf16.msra.mxu1 %v9541_v51  ;;  %v8567_v61 = vcombine.low %v360_v38, %v364_v39  ;;  %v8695_v51 = vcombine.low %v488_v40, %v492_v42  ;;  %v532_v28 = vld [vmem:[%s10680_s13 + $0x5b8] sm:$0xff] }
 0x388   : > { %7419 = vmatprep.subr.bf16.mxu0 %v9422_v63  ;;  %7460 = vmatprep.subr.bf16.mxu1 %v9550_v0  ;;  %v8576_v63 = vcombine.high %v368_v50, %v372_v53  ;;  %v8704_v0 = vcombine.high %v496_v55, %v500_v56  ;;  %v412_v38 = vld [vmem:[%s10680_s13 + $0x1f8] sm:$0xff] }
 0x389   : > { %v536_v42 = vld [vmem:[%s10680_s13 + $0x5d8] sm:$0xff] }
 0x38b   : > { %7420 = vmatpush1.bf16.msra.mxu0 %v9421_v4  ;;  %7461 = vmatpush1.bf16.msra.mxu1 %v9549_v57  ;;  %v8575_v4 = vcombine.low %v368_v50, %v372_v53  ;;  %v8703_v57 = vcombine.low %v496_v55, %v500_v56 }
 0x38c   : > { %7421 = vmatprep.subr.bf16.mxu0 %v9430_v5  ;;  %7462 = vmatprep.subr.bf16.mxu1 %v9558_v58  ;;  %v8584_v5 = vcombine.high %v376_v54, %v380_v62  ;;  %v8712_v58 = vcombine.high %v504_v1, %v508_v2  ;;  %v416_v54 = vld [vmem:[%s10680_s13 + $0x218] sm:$0xff] }
 0x38d   : > { %v420_v62 = vld [vmem:[%s10680_s13 + $0x238] sm:$0xff] }
 0x38f   : > { %7422 = vmatpush1.bf16.msra.mxu0 %v9429_v11  ;;  %7463 = vmatpush1.bf16.msra.mxu1 %v9557_v12  ;;  %v8592_v11 = vcombine.high %v384_v6, %v388_v8  ;;  %v424_v6 = vld [vmem:[%s10680_s13 + $0x258] sm:$0xff] }
 0x390   : > { %7423 = vmatprep.subr.bf16.mxu0 %v9438_v13  ;;  %7464 = vmatprep.subr.bf16.mxu1 %v9566_v14  ;;  %v392_v13 = vld [vmem:[%s10680_s13 + $0x158] sm:$0xff] }
 0x391   : > { %v396_v14 = vld [vmem:[%s10680_s13 + $0x178] sm:$0xff] }
 0x392   : > { %v8599_v30 = vcombine.low %v392_v13, %v396_v14  ;;  %v428_v8 = vld [vmem:[%s10680_s13 + $0x278] sm:$0xff] }
 0x393   : > { %7424 = vmatpush1.bf16.msra.mxu0 %v9437_v23  ;;  %7465 = vmatpush1.bf16.msra.mxu1 %v9565_v24  ;;  %v8600_v23 = vcombine.high %v392_v13, %v396_v14  ;;  %v8728_v24 = vcombine.high %v520_v16, %v524_v18  ;;  %v432_v13 = vld [vmem:[%s10680_s13 + $0x298] sm:$0xff] }
 0x394   : > { %7425 = vmatprep.subr.bf16.mxu0 %v9446_v25  ;;  %7466 = vmatprep.subr.bf16.mxu1 %v9574_v26  ;;  %v400_v25 = vld [vmem:[%s10680_s13 + $0x198] sm:$0xff] }
 0x395   : > { %v404_v26 = vld [vmem:[%s10680_s13 + $0x1b8] sm:$0xff] }
 0x396   : > { %v8607_v50 = vcombine.low %v400_v25, %v404_v26  ;;  %v436_v14 = vld [vmem:[%s10680_s13 + $0x2b8] sm:$0xff] }
 0x397   : > { %7426 = vmatpush1.bf16.msra.mxu0 %v9445_v33  ;;  %7467 = vmatpush1.bf16.msra.mxu1 %v9573_v34  ;;  %v8608_v33 = vcombine.high %v400_v25, %v404_v26  ;;  %v560_v16 = vld [vmem:[%s10680_s13 + $0x698] sm:$0xff] }
 0x398   : > { %7477 = vmatprep.subr.bf16.mxu0 %v8560_v35  ;;  %7518 = vmatprep.subr.bf16.mxu1 %v8688_v36  ;;  %v8736_v35 = vcombine.high %v528_v27, %v532_v28  ;;  %v408_v36 = vld [vmem:[%s10680_s13 + $0x1d8] sm:$0xff] }
 0x399   : > { %v564_v18 = vld [vmem:[%s10680_s13 + $0x6b8] sm:$0xff] }
 0x39a   : > { %7428 = vmatmul.mubr.bf16.vlgmr.msra.gmra.mrb[44].mxu0 %v11016_v45  ;;  %7469 = vmatmul.mubr.bf16.vlgmr.msra.gmra.mrb[44].mxu1 %v11020_v48  ;;  %v440_v25 = vld [vmem:[%s10680_s13 + $0x2d8] sm:$0xff] }
 0x39b   : > { %7478 = vmatpush1.bf16.msra.mxu0 %v8559_v43  ;;  %7519 = vmatpush1.bf16.msra.mxu1 %v8687_v44  ;;  %v540_v43 = vld [vmem:[%s10680_s13 + $0x5f8] sm:$0xff] }
 0x39c   : > { %7479 = vmatprep.subr.bf16.mxu0 %v8568_v46  ;;  %7520 = vmatprep.subr.bf16.mxu1 %v8696_v47  ;;  %v444_v26 = vld [vmem:[%s10680_s13 + $0x2f8] sm:$0xff] }
 0x39d   : > { %7509 = vmatprep.mubr.bf16.mxu0 %v10728_v59  ;;  %7550 = vmatprep.mubr.bf16.mxu1 %v10730_v60  ;;  %v516_v59 = vld [vmem:[%s10680_s13 + $0x538] sm:$0xff]  ;;  %v8711_v60 = vcombine.low %v504_v1, %v508_v2 }
 0x39e   : > { %v8720_v12 = vcombine.high %v512_v9, %v516_v59  ;;  %v8719_v22 = vcombine.low %v512_v9, %v516_v59  ;;  %v544_v1 = vld [vmem:[%s10680_s13 + $0x618] sm:$0xff] }
 0x39f   : > { %7480 = vmatpush1.bf16.msra.mxu0 %v8567_v61  ;;  %7521 = vmatpush1.bf16.msra.mxu1 %v8695_v51  ;;  %v8735_v61 = vcombine.low %v528_v27, %v532_v28  ;;  %v8616_v51 = vcombine.high %v408_v36, %v412_v38  ;;  %v548_v2 = vld [vmem:[%s10680_s13 + $0x638] sm:$0xff] }
 0x3a0   : > { %7481 = vmatprep.subr.bf16.mxu0 %v8576_v63  ;;  %7522 = vmatprep.subr.bf16.mxu1 %v8704_v0  ;;  %v8744_v0 = vcombine.high %v536_v42, %v540_v43  ;;  %v552_v9 = vld [vmem:[%s10680_s13 + $0x658] sm:$0xff] }
 0x3a1   : > { %v556_v59 = vld [vmem:[%s10680_s13 + $0x678] sm:$0xff] }
 0x3a2   : > { %v568_v27 = vld [vmem:[%s10680_s13 + $0x6d8] sm:$0xff] }
 0x3a3   : > { %7482 = vmatpush1.bf16.msra.mxu0 %v8575_v4  ;;  %7523 = vmatpush1.bf16.msra.mxu1 %v8703_v57  ;;  %v8615_v4 = vcombine.low %v408_v36, %v412_v38  ;;  %v8743_v57 = vcombine.low %v536_v42, %v540_v43  ;;  %v572_v28 = vld [vmem:[%s10680_s13 + $0x6f8] sm:$0xff] }
 0x3a4   : > { %7483 = vmatprep.subr.bf16.mxu0 %v8584_v5  ;;  %7524 = vmatprep.subr.bf16.mxu1 %v8712_v58  ;;  %v8624_v5 = vcombine.high %v416_v54, %v420_v62  ;;  %v8752_v58 = vcombine.high %v544_v1, %v548_v2  ;;  %v452_v36 = vld [vmem:[%s10680_s13 + $0x338] sm:$0xff]  ;;  %v8775_v42 = vcombine.low %v568_v27, %v572_v28 }
 0x3a5   : > { %v576_v38 = vld [vmem:[%s10680_s13 + $0x718] sm:$0xff] }
 0x3a7   : > { %7484 = vmatpush1.bf16.msra.mxu0 %v8583_v10  ;;  %7525 = vmatpush1.bf16.msra.mxu1 %v8711_v60  ;;  %v8623_v10 = vcombine.low %v416_v54, %v420_v62  ;;  %v8751_v60 = vcombine.low %v544_v1, %v548_v2  ;;  %v464_v54 = vld [vmem:[%s10680_s13 + $0x398] sm:$0xff] }
 0x3a8   : > { %7485 = vmatprep.subr.bf16.mxu0 %v8592_v11  ;;  %7526 = vmatprep.subr.bf16.mxu1 %v8720_v12  ;;  %v8632_v11 = vcombine.high %v424_v6, %v428_v8  ;;  %v8760_v12 = vcombine.high %v552_v9, %v556_v59  ;;  %v468_v62 = vld [vmem:[%s10680_s13 + $0x3b8] sm:$0xff] }
 0x3a9   : > { %v592_v1 = vld [vmem:[%s10680_s13 + $0x798] sm:$0xff] }
 0x3aa   : > { %v596_v2 = vld [vmem:[%s10680_s13 + $0x7b8] sm:$0xff] }
 0x3ab   : > { %7486 = vmatpush1.bf16.msra.mxu0 %v8591_v20  ;;  %7527 = vmatpush1.bf16.msra.mxu1 %v8719_v22  ;;  %v8631_v20 = vcombine.low %v424_v6, %v428_v8  ;;  %v8759_v22 = vcombine.low %v552_v9, %v556_v59  ;;  %v472_v6 = vld [vmem:[%s10680_s13 + $0x3d8] sm:$0xff] }
 0x3ac   : > { %7487 = vmatprep.subr.bf16.mxu0 %v8600_v23  ;;  %7528 = vmatprep.subr.bf16.mxu1 %v8728_v24  ;;  %v8640_v23 = vcombine.high %v432_v13, %v436_v14  ;;  %v8768_v24 = vcombine.high %v560_v16, %v564_v18  ;;  %v476_v8 = vld [vmem:[%s10680_s13 + $0x3f8] sm:$0xff] }
 0x3ad   : > { %v7183_v34 = vpop.f32.mrb[32].mxu0  ;;  %v7224_v39 = vpop.f32.mrb[32].mxu1  ;;  %v600_v9 = vld [vmem:[%s10680_s13 + $0x7d8] sm:$0xff] }
 0x3ae   : > { %v7185_v40 = vpop.f32.mrb[33].mxu0  ;;  %v11630_v44 = vadd.f32 %v7224_v39, %v7183_v34  ;;  %v7226_v46 = vpop.f32.mrb[33].mxu1  ;;  %v8776_v34 = vcombine.high %v568_v27, %v572_v28  ;;  %v580_v39 = vld [vmem:[%s10680_s13 + $0x738] sm:$0xff] }
 0x3af   : > { %v7187_v47 = vpop.f32.mrb[34].mxu0  ;;  %7488 = vmatpush1.bf16.msra.mxu0 %v8599_v30  ;;  %v11632_v53 = vadd.f32 %v7226_v46, %v7185_v40  ;;  %v7228_v55 = vpop.f32.mrb[34].mxu1  ;;  %7529 = vmatpush1.bf16.msra.mxu1 %v8727_v31  ;;  %v8639_v30 = vcombine.low %v432_v13, %v436_v14  ;;  %v8767_v31 = vcombine.low %v560_v16, %v564_v18  ;;  %v604_v59 = vld [vmem:[%s10680_s13 + $0x7f8] sm:$0xff] }
 0x3b0   : > { %v7188_v56 = vpop.f32.mrb[35].mxu0  ;;  %7489 = vmatprep.subr.bf16.mxu0 %v8608_v33  ;;  %v7229_v63 = vpop.f32.mrb[35].mxu1  ;;  %7530 = vmatprep.subr.bf16.mxu1 %v8736_v35  ;;  %v8648_v33 = vcombine.high %v440_v25, %v444_v26  ;;  %v448_v35 = vld [vmem:[%s10680_s13 + $0x318] sm:$0xff]  ;;  %v8647_v40 = vcombine.low %v440_v25, %v444_v26  ;;  %v8784_v46 = vcombine.high %v576_v38, %v580_v39 }
 0x3b1   : > { %v8656_v43 = vcombine.high %v448_v35, %v452_v36  ;;  %v456_v47 = vld [vmem:[%s10680_s13 + $0x358] sm:$0xff] }
 0x3b2   : > { %v584_v55 = vld [vmem:[%s10680_s13 + $0x758] sm:$0xff] }
 0x3b3   : > { %7490 = vmatpush1.bf16.msra.mxu0 %v8607_v50  ;;  %7531 = vmatpush1.bf16.msra.mxu1 %v8735_v61  ;;  %v460_v50 = vld [vmem:[%s10680_s13 + $0x378] sm:$0xff]  ;;  %v8655_v61 = vcombine.low %v448_v35, %v452_v36 }
 0x3b4   : > { %7491 = vmatprep.subr.bf16.mxu0 %v8616_v51  ;;  %7532 = vmatprep.subr.bf16.mxu1 %v8744_v0  ;;  %v588_v56 = vld [vmem:[%s10680_s13 + $0x778] sm:$0xff]  ;;  %v8783_v51 = vcombine.low %v576_v38, %v580_v39  ;;  %v8664_v63 = vcombine.high %v456_v47, %v460_v50 }
 0x3b5   : > { %v8792_v0 = vcombine.high %v584_v55, %v588_v56  ;;  %v608_v13 = vld [vmem:[%s10680_s13 + $0x818] sm:$0xff] }
 0x3b6   : > { %v612_v14 = vld [vmem:[%s10680_s13 + $0x838] sm:$0xff] }
 0x3b7   : > { %7492 = vmatpush1.bf16.msra.mxu0 %v8615_v4  ;;  %7533 = vmatpush1.bf16.msra.mxu1 %v8743_v57  ;;  %v8663_v4 = vcombine.low %v456_v47, %v460_v50  ;;  %v8791_v57 = vcombine.low %v584_v55, %v588_v56  ;;  %v736_v16 = vld [vmem:[%s10680_s13 + $0xc18] sm:$0xff] }
 0x3b8   : > { %7493 = vmatprep.subr.bf16.mxu0 %v8624_v5  ;;  %7534 = vmatprep.subr.bf16.mxu1 %v8752_v58  ;;  %v8672_v5 = vcombine.high %v464_v54, %v468_v62  ;;  %v8800_v58 = vcombine.high %v592_v1, %v596_v2  ;;  %v740_v18 = vld [vmem:[%s10680_s13 + $0xc38] sm:$0xff] }
 0x3b9   : > { %v616_v25 = vld [vmem:[%s10680_s13 + $0x858] sm:$0xff] }
 0x3ba   : > { %v620_v26 = vld [vmem:[%s10680_s13 + $0x878] sm:$0xff] }
 0x3bb   : > { %7494 = vmatpush1.bf16.msra.mxu0 %v8623_v10  ;;  %7535 = vmatpush1.bf16.msra.mxu1 %v8751_v60  ;;  %v8671_v10 = vcombine.low %v464_v54, %v468_v62  ;;  %v8799_v60 = vcombine.low %v592_v1, %v596_v2  ;;  %v744_v27 = vld [vmem:[%s10680_s13 + $0xc58] sm:$0xff] }
 0x3bc   : > { %7495 = vmatprep.subr.bf16.mxu0 %v8632_v11  ;;  %7536 = vmatprep.subr.bf16.mxu1 %v8760_v12  ;;  %v8680_v11 = vcombine.high %v472_v6, %v476_v8  ;;  %v8808_v12 = vcombine.high %v600_v9, %v604_v59  ;;  %v748_v28 = vld [vmem:[%s10680_s13 + $0xc78] sm:$0xff] }
 0x3bd   : > { %v624_v35 = vld [vmem:[%s10680_s13 + $0x898] sm:$0xff] }
 0x3be   : > { %v628_v36 = vld [vmem:[%s10680_s13 + $0x8b8] sm:$0xff] }
 0x3bf   : > { %7496 = vmatpush1.bf16.msra.mxu0 %v8631_v20  ;;  %7537 = vmatpush1.bf16.msra.mxu1 %v8759_v22  ;;  %v8679_v20 = vcombine.low %v472_v6, %v476_v8  ;;  %v8807_v22 = vcombine.low %v600_v9, %v604_v59  ;;  %v752_v38 = vld [vmem:[%s10680_s13 + $0xc98] sm:$0xff] }
 0x3c0   : > { %7497 = vmatprep.subr.bf16.mxu0 %v8640_v23  ;;  %7538 = vmatprep.subr.bf16.mxu1 %v8768_v24  ;;  %v8816_v23 = vcombine.high %v608_v13, %v612_v14  ;;  %v8944_v24 = vcombine.high %v736_v16, %v740_v18  ;;  %v756_v39 = vld [vmem:[%s10680_s13 + $0xcb8] sm:$0xff] }
 0x3c1   : > { %v632_v47 = vld [vmem:[%s10680_s13 + $0x8d8] sm:$0xff]  ;;  %v8959_v56 = vcombine.low %v752_v38, %v756_v39 }
 0x3c2   : > { %v636_v50 = vld [vmem:[%s10680_s13 + $0x8f8] sm:$0xff] }
 0x3c3   : > { %7498 = vmatpush1.bf16.msra.mxu0 %v8639_v30  ;;  %7539 = vmatpush1.bf16.msra.mxu1 %v8767_v31  ;;  %v8815_v30 = vcombine.low %v608_v13, %v612_v14  ;;  %v8943_v31 = vcombine.low %v736_v16, %v740_v18  ;;  %v764_v55 = vld [vmem:[%s10680_s13 + $0xcf8] sm:$0xff]  ;;  %v8839_v62 = vcombine.low %v632_v47, %v636_v50 }
 0x3c4   : > { %7499 = vmatprep.subr.bf16.mxu0 %v8648_v33  ;;  %7540 = vmatprep.subr.bf16.mxu1 %v8776_v34  ;;  %v8824_v33 = vcombine.high %v616_v25, %v620_v26  ;;  %v8952_v34 = vcombine.high %v744_v27, %v748_v28  ;;  %v768_v54 = vld [vmem:[%s10680_s13 + $0xd18] sm:$0xff] }
 0x3c7   : > { %7500 = vmatpush1.bf16.msra.mxu0 %v8647_v40  ;;  %7541 = vmatpush1.bf16.msra.mxu1 %v8775_v42  ;;  %v8823_v40 = vcombine.low %v616_v25, %v620_v26  ;;  %v8951_v42 = vcombine.low %v744_v27, %v748_v28  ;;  %v792_v27 = vld [vmem:[%s10680_s13 + $0xdd8] sm:$0xff] }
 0x3c8   : > { %7501 = vmatprep.subr.bf16.mxu0 %v8656_v43  ;;  %7542 = vmatprep.subr.bf16.mxu1 %v8784_v46  ;;  %v8832_v43 = vcombine.high %v624_v35, %v628_v36  ;;  %v8960_v46 = vcombine.high %v752_v38, %v756_v39  ;;  %v796_v28 = vld [vmem:[%s10680_s13 + $0xdf8] sm:$0xff] }
 0x3cb   : > { %7502 = vmatpush1.bf16.msra.mxu0 %v8655_v61  ;;  %7543 = vmatpush1.bf16.msra.mxu1 %v8783_v51  ;;  %v8840_v61 = vcombine.high %v632_v47, %v636_v50  ;;  %v800_v47 = vld [vmem:[%s10680_s13 + $0xe18] sm:$0xff] }
 0x3cc   : > { %7503 = vmatprep.subr.bf16.mxu0 %v8664_v63  ;;  %7544 = vmatprep.subr.bf16.mxu1 %v8792_v0  ;;  %v640_v63 = vld [vmem:[%s10680_s13 + $0x918] sm:$0xff] }
 0x3cd   : > { %v644_v0 = vld [vmem:[%s10680_s13 + $0x938] sm:$0xff] }
 0x3ce   : > { %v8848_v1 = vcombine.high %v640_v63, %v644_v0  ;;  %v8847_v6 = vcombine.low %v640_v63, %v644_v0  ;;  %v804_v50 = vld [vmem:[%s10680_s13 + $0xe38] sm:$0xff] }
 0x3cf   : > { %7504 = vmatpush1.bf16.msra.mxu0 %v8663_v4  ;;  %7545 = vmatpush1.bf16.msra.mxu1 %v8791_v57  ;;  %v648_v4 = vld [vmem:[%s10680_s13 + $0x958] sm:$0xff] }
 0x3d0   : > { %7505 = vmatprep.subr.bf16.mxu0 %v8672_v5  ;;  %7546 = vmatprep.subr.bf16.mxu1 %v8800_v58  ;;  %v652_v57 = vld [vmem:[%s10680_s13 + $0x978] sm:$0xff] }
 0x3d1   : > { %v776_v5 = vld [vmem:[%s10680_s13 + $0xd58] sm:$0xff]  ;;  %v8856_v9 = vcombine.high %v648_v4, %v652_v57  ;;  %v8855_v13 = vcombine.low %v648_v4, %v652_v57 }
 0x3d2   : > { %v780_v58 = vld [vmem:[%s10680_s13 + $0xd78] sm:$0xff] }
 0x3d3   : > { %7506 = vmatpush1.bf16.msra.mxu0 %v8671_v10  ;;  %7547 = vmatpush1.bf16.msra.mxu1 %v8799_v60  ;;  %v8984_v59 = vcombine.high %v776_v5, %v780_v58  ;;  %v656_v10 = vld [vmem:[%s10680_s13 + $0x998] sm:$0xff]  ;;  %v8983_v14 = vcombine.low %v776_v5, %v780_v58 }
 0x3d4   : > { %7507 = vmatprep.subr.bf16.mxu0 %v8680_v11  ;;  %7548 = vmatprep.subr.bf16.mxu1 %v8808_v12  ;;  %v660_v60 = vld [vmem:[%s10680_s13 + $0x9b8] sm:$0xff] }
 0x3d5   : > { %v784_v11 = vld [vmem:[%s10680_s13 + $0xd98] sm:$0xff]  ;;  %v8864_v16 = vcombine.high %v656_v10, %v660_v60 }
 0x3d6   : > { %v788_v12 = vld [vmem:[%s10680_s13 + $0xdb8] sm:$0xff] }
 0x3d7   : > { %7508 = vmatpush1.bf16.msra.mxu0 %v8679_v20  ;;  %7549 = vmatpush1.bf16.msra.mxu1 %v8807_v22  ;;  %v8992_v20 = vcombine.high %v784_v11, %v788_v12  ;;  %v664_v22 = vld [vmem:[%s10680_s13 + $0x9d8] sm:$0xff] }
 0x3d8   : > { %7559 = vmatprep.subr.bf16.mxu0 %v8816_v23  ;;  %7600 = vmatprep.subr.bf16.mxu1 %v8944_v24  ;;  %v668_v23 = vld [vmem:[%s10680_s13 + $0x9f8] sm:$0xff] }
 0x3d9   : > { %v8872_v39 = vcombine.high %v664_v22, %v668_v23  ;;  %v808_v63 = vld [vmem:[%s10680_s13 + $0xe58] sm:$0xff] }
 0x3da   : > { %7510 = vmatmul.mubr.bf16.vlgmr.msra.gmra.mrb[48].mxu0 %v10776_v17  ;;  %7551 = vmatmul.mubr.bf16.vlgmr.msra.gmra.mrb[48].mxu1 %v10781_v21  ;;  %v760_v17 = vld [vmem:[%s10680_s13 + $0xcd8] sm:$0xff]  ;;  %v8831_v21 = vcombine.low %v624_v35, %v628_v36 }
 0x3db   : > { %7560 = vmatpush1.bf16.msra.mxu0 %v8815_v30  ;;  %7601 = vmatpush1.bf16.msra.mxu1 %v8943_v31  ;;  %v8968_v51 = vcombine.high %v760_v17, %v764_v55  ;;  %v812_v0 = vld [vmem:[%s10680_s13 + $0xe78] sm:$0xff] }
 0x3dc   : > { %7561 = vmatprep.subr.bf16.mxu0 %v8824_v33  ;;  %7602 = vmatprep.subr.bf16.mxu1 %v8952_v34  ;;  %v8863_v34 = vcombine.low %v656_v10, %v660_v60  ;;  %v816_v4 = vld [vmem:[%s10680_s13 + $0xe98] sm:$0xff]  ;;  %v9015_v58 = vcombine.low %v808_v63, %v812_v0 }
 0x3dd   : > { %7591 = vmatprep.mubr.bf16.mxu0 %v10786_v29  ;;  %7632 = vmatprep.mubr.bf16.mxu1 %v10791_v32  ;;  %v772_v29 = vld [vmem:[%s10680_s13 + $0xd38] sm:$0xff]  ;;  %v8967_v32 = vcombine.low %v760_v17, %v764_v55  ;;  %v8871_v17 = vcombine.low %v664_v22, %v668_v23  ;;  %v8999_v55 = vcombine.low %v792_v27, %v796_v28 }
 0x3de   : > { %v8976_v2 = vcombine.high %v768_v54, %v772_v29  ;;  %v8975_v8 = vcombine.low %v768_v54, %v772_v29  ;;  %v9007_v29 = vcombine.low %v800_v47, %v804_v50  ;;  %v820_v57 = vld [vmem:[%s10680_s13 + $0xeb8] sm:$0xff] }
 0x3df   : > { %7562 = vmatpush1.bf16.msra.mxu0 %v8823_v40  ;;  %7603 = vmatpush1.bf16.msra.mxu1 %v8951_v42  ;;  %v9000_v42 = vcombine.high %v792_v27, %v796_v28  ;;  %v824_v10 = vld [vmem:[%s10680_s13 + $0xed8] sm:$0xff] }
 0x3e0   : > { %7563 = vmatprep.subr.bf16.mxu0 %v8832_v43  ;;  %7604 = vmatprep.subr.bf16.mxu1 %v8960_v46  ;;  %v672_v43 = vld [vmem:[%s10680_s13 + $0xa18] sm:$0xff] }
 0x3e1   : > { %v676_v46 = vld [vmem:[%s10680_s13 + $0xa38] sm:$0xff] }
 0x3e2   : > { %v8879_v54 = vcombine.low %v672_v43, %v676_v46  ;;  %v828_v60 = vld [vmem:[%s10680_s13 + $0xef8] sm:$0xff] }
 0x3e3   : > { %7564 = vmatpush1.bf16.msra.mxu0 %v8831_v21  ;;  %7605 = vmatpush1.bf16.msra.mxu1 %v8959_v56  ;;  %v8880_v21 = vcombine.high %v672_v43, %v676_v46  ;;  %v9008_v56 = vcombine.high %v800_v47, %v804_v50  ;;  %v836_v22 = vld [vmem:[%s10680_s13 + $0xf38] sm:$0xff] }
 0x3e4   : > { %7565 = vmatprep.subr.bf16.mxu0 %v8840_v61  ;;  %7606 = vmatprep.subr.bf16.mxu1 %v8968_v51  ;;  %v680_v61 = vld [vmem:[%s10680_s13 + $0xa58] sm:$0xff] }
 0x3e5   : > { %v684_v51 = vld [vmem:[%s10680_s13 + $0xa78] sm:$0xff] }
 0x3e6   : > { %v8887_v5 = vcombine.low %v680_v61, %v684_v51  ;;  %v712_v27 = vld [vmem:[%s10680_s13 + $0xb58] sm:$0xff] }
 0x3e7   : > { %7566 = vmatpush1.bf16.msra.mxu0 %v8839_v62  ;;  %7607 = vmatpush1.bf16.msra.mxu1 %v8967_v32  ;;  %v8888_v62 = vcombine.high %v680_v61, %v684_v51  ;;  %v9016_v32 = vcombine.high %v808_v63, %v812_v0  ;;  %v716_v28 = vld [vmem:[%s10680_s13 + $0xb78] sm:$0xff] }
 0x3e8   : > { %7567 = vmatprep.subr.bf16.mxu0 %v8848_v1  ;;  %7608 = vmatprep.subr.bf16.mxu1 %v8976_v2  ;;  %v688_v1 = vld [vmem:[%s10680_s13 + $0xa98] sm:$0xff]  ;;  %v8919_v43 = vcombine.low %v712_v27, %v716_v28 }
 0x3e9   : > { %v692_v2 = vld [vmem:[%s10680_s13 + $0xab8] sm:$0xff] }
 0x3eb   : > { %7568 = vmatpush1.bf16.msra.mxu0 %v8847_v6  ;;  %7609 = vmatpush1.bf16.msra.mxu1 %v8975_v8  ;;  %v8896_v6 = vcombine.high %v688_v1, %v692_v2  ;;  %v9024_v8 = vcombine.high %v816_v4, %v820_v57 }
 0x3ec   : > { %7569 = vmatprep.subr.bf16.mxu0 %v8856_v9  ;;  %7610 = vmatprep.subr.bf16.mxu1 %v8984_v59  ;;  %v696_v9 = vld [vmem:[%s10680_s13 + $0xad8] sm:$0xff] }
 0x3ed   : > { %v7265_v18 = vpop.f32.mrb[36].mxu0  ;;  %v7306_v25 = vpop.f32.mrb[36].mxu1  ;;  %v700_v59 = vld [vmem:[%s10680_s13 + $0xaf8] sm:$0xff] }
 0x3ee   : > { %v7266_v24 = vadd.f32 %v7265_v18, %v11630_v44  ;;  %v7267_v26 = vpop.f32.mrb[37].mxu0  ;;  %v7308_v31 = vpop.f32.mrb[37].mxu1  ;;  %v8991_v44 = vcombine.low %v784_v11, %v788_v12  ;;  %v8895_v11 = vcombine.low %v688_v1, %v692_v2  ;;  %v9023_v12 = vcombine.low %v816_v4, %v820_v57  ;;  %v708_v18 = vld [vmem:[%s10680_s13 + $0xb38] sm:$0xff] }
 0x3ef   : > { %v7268_v30 = vadd.f32 %v7267_v26, %v11632_v53  ;;  %v7269_v33 = vpop.f32.mrb[38].mxu0  ;;  %7570 = vmatpush1.bf16.msra.mxu0 %v8855_v13  ;;  %v7310_v36 = vpop.f32.mrb[38].mxu1  ;;  %7611 = vmatpush1.bf16.msra.mxu1 %v8983_v14  ;;  %v8904_v13 = vcombine.high %v696_v9, %v700_v59  ;;  %v9032_v14 = vcombine.high %v824_v10, %v828_v60 }
 0x3f0   : > { %v11704_v35 = vadd.f32 %v7306_v25, %v7266_v24  ;;  %v7270_v38 = vpop.f32.mrb[39].mxu0  ;;  %7571 = vmatprep.subr.bf16.mxu0 %v8864_v16  ;;  %v7311_v53 = vpop.f32.mrb[39].mxu1  ;;  %7612 = vmatprep.subr.bf16.mxu1 %v8992_v20  ;;  %v704_v16 = vld [vmem:[%s10680_s13 + $0xb18] sm:$0xff]  ;;  %v8903_v23 = vcombine.low %v696_v9, %v700_v59  ;;  %v9031_v24 = vcombine.low %v824_v10, %v828_v60 }
 0x3f1   : > { %v11706_v40 = vadd.f32 %v7308_v31, %v7268_v30  ;;  %v832_v20 = vld [vmem:[%s10680_s13 + $0xf18] sm:$0xff]  ;;  %v8912_v25 = vcombine.high %v704_v16, %v708_v18  ;;  %v8911_v33 = vcombine.low %v704_v16, %v708_v18  ;;  %v8920_v36 = vcombine.high %v712_v27, %v716_v28 }
 0x3f2   : > { %v9040_v26 = vcombine.high %v832_v20, %v836_v22  ;;  %v840_v30 = vld [vmem:[%s10680_s13 + $0xf58] sm:$0xff] }
 0x3f3   : > { %7572 = vmatpush1.bf16.msra.mxu0 %v8863_v34  ;;  %7613 = vmatpush1.bf16.msra.mxu1 %v8991_v44  ;;  %v844_v31 = vld [vmem:[%s10680_s13 + $0xf78] sm:$0xff]  ;;  %v9039_v34 = vcombine.low %v832_v20, %v836_v22 }
 0x3f4   : > { %7573 = vmatprep.subr.bf16.mxu0 %v8872_v39  ;;  %7614 = vmatprep.subr.bf16.mxu1 %v9000_v42  ;;  %v9048_v38 = vcombine.high %v840_v30, %v844_v31  ;;  %v720_v44 = vld [vmem:[%s10680_s13 + $0xb98] sm:$0xff]  ;;  %v9047_v46 = vcombine.low %v840_v30, %v844_v31 }
 0x3f5   : > { %v724_v39 = vld [vmem:[%s10680_s13 + $0xbb8] sm:$0xff] }
 0x3f6   : > { %v848_v53 = vld [vmem:[%s10680_s13 + $0xf98] sm:$0xff]  ;;  %v8928_v47 = vcombine.high %v720_v44, %v724_v39  ;;  %v8927_v61 = vcombine.low %v720_v44, %v724_v39 }
 0x3f7   : > { %7574 = vmatpush1.bf16.msra.mxu0 %v8871_v17  ;;  %7615 = vmatpush1.bf16.msra.mxu1 %v8999_v55  ;;  %v852_v42 = vld [vmem:[%s10680_s13 + $0xfb8] sm:$0xff] }
 0x3f8   : > { %7575 = vmatprep.subr.bf16.mxu0 %v8880_v21  ;;  %7616 = vmatprep.subr.bf16.mxu1 %v9008_v56  ;;  %v9056_v50 = vcombine.high %v848_v53, %v852_v42  ;;  %v728_v17 = vld [vmem:[%s10680_s13 + $0xbd8] sm:$0xff]  ;;  %v9055_v51 = vcombine.low %v848_v53, %v852_v42 }
 0x3f9   : > { %v732_v55 = vld [vmem:[%s10680_s13 + $0xbf8] sm:$0xff] }
 0x3fa   : > { %v856_v21 = vld [vmem:[%s10680_s13 + $0xfd8] sm:$0xff]  ;;  %v8936_v63 = vcombine.high %v728_v17, %v732_v55  ;;  %v8935_v1 = vcombine.low %v728_v17, %v732_v55 }
 0x3fb   : > { %7576 = vmatpush1.bf16.msra.mxu0 %v8879_v54  ;;  %7617 = vmatpush1.bf16.msra.mxu1 %v9007_v29  ;;  %v860_v56 = vld [vmem:[%s10680_s13 + $0xff8] sm:$0xff] }
 0x3fc   : > { %7577 = vmatprep.subr.bf16.mxu0 %v8888_v62  ;;  %7618 = vmatprep.subr.bf16.mxu1 %v9016_v32  ;;  %v9064_v0 = vcombine.high %v856_v21, %v860_v56  ;;  %v864_v54 = vld [vmem:[%s10680_s13 + $0x1018] sm:$0xff]  ;;  %v9063_v2 = vcombine.low %v856_v21, %v860_v56 }
 0x3fd   : > { %v868_v29 = vld [vmem:[%s10680_s13 + $0x1038] sm:$0xff] }
 0x3fe   : > { %v992_v62 = vld [vmem:[%s10680_s13 + $0x1418] sm:$0xff]  ;;  %v9072_v4 = vcombine.high %v864_v54, %v868_v29  ;;  %v9071_v9 = vcombine.low %v864_v54, %v868_v29 }
 0x3ff   : > { %7578 = vmatpush1.bf16.msra.mxu0 %v8887_v5  ;;  %7619 = vmatpush1.bf16.msra.mxu1 %v9015_v58  ;;  %v996_v32 = vld [vmem:[%s10680_s13 + $0x1438] sm:$0xff] }
 0x400   : > { %7579 = vmatprep.subr.bf16.mxu0 %v8896_v6  ;;  %7620 = vmatprep.subr.bf16.mxu1 %v9024_v8  ;;  %v9200_v57 = vcombine.high %v992_v62, %v996_v32  ;;  %v872_v5 = vld [vmem:[%s10680_s13 + $0x1058] sm:$0xff]  ;;  %v9199_v59 = vcombine.low %v992_v62, %v996_v32 }
 0x401   : > { %v876_v58 = vld [vmem:[%s10680_s13 + $0x1078] sm:$0xff] }
 0x402   : > { %v1000_v6 = vld [vmem:[%s10680_s13 + $0x1458] sm:$0xff]  ;;  %v9080_v10 = vcombine.high %v872_v5, %v876_v58  ;;  %v9079_v16 = vcombine.low %v872_v5, %v876_v58 }
 0x403   : > { %7580 = vmatpush1.bf16.msra.mxu0 %v8895_v11  ;;  %7621 = vmatpush1.bf16.msra.mxu1 %v9023_v12  ;;  %v1004_v8 = vld [vmem:[%s10680_s13 + $0x1478] sm:$0xff] }
 0x404   : > { %7581 = vmatprep.subr.bf16.mxu0 %v8904_v13  ;;  %7622 = vmatprep.subr.bf16.mxu1 %v9032_v14  ;;  %v9208_v60 = vcombine.high %v1000_v6, %v1004_v8  ;;  %v880_v11 = vld [vmem:[%s10680_s13 + $0x1098] sm:$0xff]  ;;  %v9207_v18 = vcombine.low %v1000_v6, %v1004_v8 }
 0x405   : > { %v884_v12 = vld [vmem:[%s10680_s13 + $0x10b8] sm:$0xff] }
 0x406   : > { %v1008_v13 = vld [vmem:[%s10680_s13 + $0x1498] sm:$0xff]  ;;  %v9088_v20 = vcombine.high %v880_v11, %v884_v12 }
 0x407   : > { %7582 = vmatpush1.bf16.msra.mxu0 %v8903_v23  ;;  %7623 = vmatpush1.bf16.msra.mxu1 %v9031_v24  ;;  %v1012_v14 = vld [vmem:[%s10680_s13 + $0x14b8] sm:$0xff] }
 0x408   : > { %7583 = vmatprep.subr.bf16.mxu0 %v8912_v25  ;;  %7624 = vmatprep.subr.bf16.mxu1 %v9040_v26  ;;  %v9216_v22 = vcombine.high %v1008_v13, %v1012_v14  ;;  %v888_v23 = vld [vmem:[%s10680_s13 + $0x10d8] sm:$0xff]  ;;  %v9215_v26 = vcombine.low %v1008_v13, %v1012_v14 }
 0x409   : > { %v892_v24 = vld [vmem:[%s10680_s13 + $0x10f8] sm:$0xff] }
 0x40a   : > { %v1020_v25 = vld [vmem:[%s10680_s13 + $0x14f8] sm:$0xff]  ;;  %v9096_v27 = vcombine.high %v888_v23, %v892_v24 }
 0x40b   : > { %7584 = vmatpush1.bf16.msra.mxu0 %v8911_v33  ;;  %7625 = vmatpush1.bf16.msra.mxu1 %v9039_v34  ;;  %v896_v30 = vld [vmem:[%s10680_s13 + $0x1118] sm:$0xff]  ;;  %v9095_v34 = vcombine.low %v888_v23, %v892_v24 }
 0x40c   : > { %7585 = vmatprep.subr.bf16.mxu0 %v8920_v36  ;;  %7626 = vmatprep.subr.bf16.mxu1 %v9048_v38  ;;  %v900_v31 = vld [vmem:[%s10680_s13 + $0x1138] sm:$0xff] }
 0x40d   : > { %v1024_v33 = vld [vmem:[%s10680_s13 + $0x1518] sm:$0xff]  ;;  %v9104_v36 = vcombine.high %v896_v30, %v900_v31 }
 0x40e   : > { %v904_v44 = vld [vmem:[%s10680_s13 + $0x1158] sm:$0xff] }
 0x40f   : > { %7586 = vmatpush1.bf16.msra.mxu0 %v8919_v43  ;;  %7627 = vmatpush1.bf16.msra.mxu1 %v9047_v46  ;;  %v908_v39 = vld [vmem:[%s10680_s13 + $0x1178] sm:$0xff]  ;;  %v9103_v43 = vcombine.low %v896_v30, %v900_v31 }
 0x410   : > { %7587 = vmatprep.subr.bf16.mxu0 %v8928_v47  ;;  %7628 = vmatprep.subr.bf16.mxu1 %v9056_v50  ;;  %v1032_v53 = vld [vmem:[%s10680_s13 + $0x1558] sm:$0xff]  ;;  %v9112_v47 = vcombine.high %v904_v44, %v908_v39 }
 0x411   : > { %v1036_v42 = vld [vmem:[%s10680_s13 + $0x1578] sm:$0xff] }
 0x412   : > { %v9240_v50 = vcombine.high %v1032_v53, %v1036_v42  ;;  %v912_v17 = vld [vmem:[%s10680_s13 + $0x1198] sm:$0xff] }
 0x413   : > { %7588 = vmatpush1.bf16.msra.mxu0 %v8927_v61  ;;  %7629 = vmatpush1.bf16.msra.mxu1 %v9055_v51  ;;  %v916_v55 = vld [vmem:[%s10680_s13 + $0x11b8] sm:$0xff]  ;;  %v9111_v61 = vcombine.low %v904_v44, %v908_v39  ;;  %v9239_v51 = vcombine.low %v1032_v53, %v1036_v42 }
 0x414   : > { %7589 = vmatprep.subr.bf16.mxu0 %v8936_v63  ;;  %7630 = vmatprep.subr.bf16.mxu1 %v9064_v0  ;;  %v1040_v21 = vld [vmem:[%s10680_s13 + $0x1598] sm:$0xff]  ;;  %v9120_v63 = vcombine.high %v912_v17, %v916_v55  ;;  %v9119_v8 = vcombine.low %v912_v17, %v916_v55 }
 0x415   : > { %v1044_v56 = vld [vmem:[%s10680_s13 + $0x15b8] sm:$0xff] }
 0x416   : > { %v9248_v54 = vcombine.high %v1040_v21, %v1044_v56  ;;  %v920_v29 = vld [vmem:[%s10680_s13 + $0x11d8] sm:$0xff] }
 0x417   : > { %7590 = vmatpush1.bf16.msra.mxu0 %v8935_v1  ;;  %7631 = vmatpush1.bf16.msra.mxu1 %v9063_v2  ;;  %v924_v62 = vld [vmem:[%s10680_s13 + $0x11f8] sm:$0xff] }
 0x418   : > { %7641 = vmatprep.subr.bf16.mxu0 %v9072_v4  ;;  %7682 = vmatprep.subr.bf16.mxu1 %v9200_v57  ;;  %v1048_v4 = vld [vmem:[%s10680_s13 + $0x15d8] sm:$0xff] }
 0x419   : > { %v1052_v57 = vld [vmem:[%s10680_s13 + $0x15f8] sm:$0xff] }
 0x41a   : > { %7592 = vmatmul.mubr.bf16.vlgmr.msra.gmra.mrb[52].mxu0 %v10856_v37  ;;  %7633 = vmatmul.mubr.bf16.vlgmr.msra.gmra.mrb[52].mxu1 %v10861_v41  ;;  %v1016_v37 = vld [vmem:[%s10680_s13 + $0x14d8] sm:$0xff]  ;;  %v9087_v41 = vcombine.low %v880_v11, %v884_v12  ;;  %v9256_v12 = vcombine.high %v1048_v4, %v1052_v57 }
 0x41b   : > { %7642 = vmatpush1.bf16.msra.mxu0 %v9071_v9  ;;  %7683 = vmatpush1.bf16.msra.mxu1 %v9199_v59  ;;  %v9224_v28 = vcombine.high %v1016_v37, %v1020_v25  ;;  %v928_v13 = vld [vmem:[%s10680_s13 + $0x1218] sm:$0xff] }
 0x41c   : > { %7643 = vmatprep.subr.bf16.mxu0 %v9080_v10  ;;  %7684 = vmatprep.subr.bf16.mxu1 %v9208_v60  ;;  %v9128_v60 = vcombine.high %v920_v29, %v924_v62  ;;  %v932_v14 = vld [vmem:[%s10680_s13 + $0x1238] sm:$0xff] }
 0x41d   : > { %7673 = vmatprep.mubr.bf16.mxu0 %v10866_v49  ;;  %7714 = vmatprep.mubr.bf16.mxu1 %v10871_v52  ;;  %v1028_v49 = vld [vmem:[%s10680_s13 + $0x1538] sm:$0xff]  ;;  %v9223_v52 = vcombine.low %v1016_v37, %v1020_v25  ;;  %v9136_v23 = vcombine.high %v928_v13, %v932_v14 }
 0x41e   : > { %v9232_v38 = vcombine.high %v1024_v33, %v1028_v49  ;;  %v9231_v46 = vcombine.low %v1024_v33, %v1028_v49  ;;  %v936_v37 = vld [vmem:[%s10680_s13 + $0x1258] sm:$0xff] }
 0x41f   : > { %7644 = vmatpush1.bf16.msra.mxu0 %v9079_v16  ;;  %7685 = vmatpush1.bf16.msra.mxu1 %v9207_v18  ;;  %v1056_v16 = vld [vmem:[%s10680_s13 + $0x1618] sm:$0xff] }
 0x420   : > { %7645 = vmatprep.subr.bf16.mxu0 %v9088_v20  ;;  %7686 = vmatprep.subr.bf16.mxu1 %v9216_v22  ;;  %v1060_v18 = vld [vmem:[%s10680_s13 + $0x1638] sm:$0xff]  ;;  %v9127_v20 = vcombine.low %v920_v29, %v924_v62  ;;  %v9255_v22 = vcombine.low %v1048_v4, %v1052_v57 }
 0x421   : > { %v9264_v24 = vcombine.high %v1056_v16, %v1060_v18  ;;  %v940_v25 = vld [vmem:[%s10680_s13 + $0x1278] sm:$0xff] }
 0x422   : > { %v9144_v30 = vcombine.high %v936_v37, %v940_v25  ;;  %v944_v33 = vld [vmem:[%s10680_s13 + $0x1298] sm:$0xff] }
 0x423   : > { %7646 = vmatpush1.bf16.msra.mxu0 %v9087_v41  ;;  %7687 = vmatpush1.bf16.msra.mxu1 %v9215_v26  ;;  %v1064_v41 = vld [vmem:[%s10680_s13 + $0x1658] sm:$0xff] }
 0x424   : > { %7647 = vmatprep.subr.bf16.mxu0 %v9096_v27  ;;  %7688 = vmatprep.subr.bf16.mxu1 %v9224_v28  ;;  %v1068_v26 = vld [vmem:[%s10680_s13 + $0x1678] sm:$0xff]  ;;  %v9135_v27 = vcombine.low %v928_v13, %v932_v14  ;;  %v9263_v28 = vcombine.low %v1056_v16, %v1060_v18 }
 0x425   : > { %v9272_v31 = vcombine.high %v1064_v41, %v1068_v26  ;;  %v948_v49 = vld [vmem:[%s10680_s13 + $0x12b8] sm:$0xff] }
 0x426   : > { %v9152_v44 = vcombine.high %v944_v33, %v948_v49  ;;  %v952_v53 = vld [vmem:[%s10680_s13 + $0x12d8] sm:$0xff] }
 0x427   : > { %7648 = vmatpush1.bf16.msra.mxu0 %v9095_v34  ;;  %7689 = vmatpush1.bf16.msra.mxu1 %v9223_v52  ;;  %v1072_v34 = vld [vmem:[%s10680_s13 + $0x1698] sm:$0xff] }
 0x428   : > { %7649 = vmatprep.subr.bf16.mxu0 %v9104_v36  ;;  %7690 = vmatprep.subr.bf16.mxu1 %v9232_v38  ;;  %v1076_v52 = vld [vmem:[%s10680_s13 + $0x16b8] sm:$0xff]  ;;  %v9143_v36 = vcombine.low %v936_v37, %v940_v25  ;;  %v9271_v38 = vcombine.low %v1064_v41, %v1068_v26 }
 0x429   : > { %v9280_v39 = vcombine.high %v1072_v34, %v1076_v52  ;;  %v956_v42 = vld [vmem:[%s10680_s13 + $0x12f8] sm:$0xff] }
 0x42a   : > { %v9160_v17 = vcombine.high %v952_v53, %v956_v42  ;;  %v968_v62 = vld [vmem:[%s10680_s13 + $0x1358] sm:$0xff] }
 0x42b   : > { %7650 = vmatpush1.bf16.msra.mxu0 %v9103_v43  ;;  %7691 = vmatpush1.bf16.msra.mxu1 %v9231_v46  ;;  %v1080_v43 = vld [vmem:[%s10680_s13 + $0x16d8] sm:$0xff] }
 0x42c   : > { %7651 = vmatprep.subr.bf16.mxu0 %v9112_v47  ;;  %7692 = vmatprep.subr.bf16.mxu1 %v9240_v50  ;;  %v1084_v46 = vld [vmem:[%s10680_s13 + $0x16f8] sm:$0xff]  ;;  %v9151_v47 = vcombine.low %v944_v33, %v948_v49  ;;  %v9279_v50 = vcombine.low %v1072_v34, %v1076_v52 }
 0x42d   : > { %v7347_v0 = vpop.f32.mrb[40].mxu0  ;;  %v7388_v1 = vpop.f32.mrb[40].mxu1  ;;  %v9288_v55 = vcombine.high %v1080_v43, %v1084_v46  ;;  %v984_v13 = vld [vmem:[%s10680_s13 + $0x13d8] sm:$0xff] }
 0x42e   : > { %v7348_v32 = vadd.f32 %v7347_v0, %v11704_v35  ;;  %v7349_v2 = vpop.f32.mrb[41].mxu0  ;;  %v7390_v58 = vpop.f32.mrb[41].mxu1  ;;  %v9247_v35 = vcombine.low %v1040_v21, %v1044_v56  ;;  %v960_v21 = vld [vmem:[%s10680_s13 + $0x1318] sm:$0xff]  ;;  %v9287_v0 = vcombine.low %v1080_v43, %v1084_v46 }
 0x42f   : > { %v7350_v5 = vadd.f32 %v7349_v2, %v11706_v40  ;;  %v7351_v6 = vpop.f32.mrb[42].mxu0  ;;  %7652 = vmatpush1.bf16.msra.mxu0 %v9111_v61  ;;  %v7392_v59 = vpop.f32.mrb[42].mxu1  ;;  %7693 = vmatpush1.bf16.msra.mxu1 %v9239_v51  ;;  %v964_v56 = vld [vmem:[%s10680_s13 + $0x1338] sm:$0xff] }
 0x430   : > { %v11778_v9 = vadd.f32 %v7388_v1, %v7348_v32  ;;  %v7352_v10 = vpop.f32.mrb[43].mxu0  ;;  %7653 = vmatprep.subr.bf16.mxu0 %v9120_v63  ;;  %v7393_v40 = vpop.f32.mrb[43].mxu1  ;;  %7694 = vmatprep.subr.bf16.mxu1 %v9248_v54  ;;  %v1088_v61 = vld [vmem:[%s10680_s13 + $0x1718] sm:$0xff]  ;;  %v9159_v63 = vcombine.low %v952_v53, %v956_v42  ;;  %v9168_v54 = vcombine.high %v960_v21, %v964_v56 }
 0x431   : > { %v11780_v11 = vadd.f32 %v7390_v58, %v7350_v5  ;;  %v1092_v51 = vld [vmem:[%s10680_s13 + $0x1738] sm:$0xff]  ;;  %v9167_v4 = vcombine.low %v960_v21, %v964_v56 }
 0x432   : > { %v9296_v29 = vcombine.high %v1088_v61, %v1092_v51  ;;  %v972_v32 = vld [vmem:[%s10680_s13 + $0x1378] sm:$0xff]  ;;  %v9295_v57 = vcombine.low %v1088_v61, %v1092_v51 }
 0x433   : > { %7654 = vmatpush1.bf16.msra.mxu0 %v9119_v8  ;;  %7695 = vmatpush1.bf16.msra.mxu1 %v9247_v35  ;;  %v1096_v1 = vld [vmem:[%s10680_s13 + $0x1758] sm:$0xff]  ;;  %v9176_v5 = vcombine.high %v968_v62, %v972_v32  ;;  %v9175_v35 = vcombine.low %v968_v62, %v972_v32 }
 0x434   : > { %7655 = vmatprep.subr.bf16.mxu0 %v9128_v60  ;;  %7696 = vmatprep.subr.bf16.mxu1 %v9256_v12  ;;  %v1100_v2 = vld [vmem:[%s10680_s13 + $0x1778] sm:$0xff] }
 0x435   : > { %v9304_v58 = vcombine.high %v1096_v1, %v1100_v2  ;;  %v976_v6 = vld [vmem:[%s10680_s13 + $0x1398] sm:$0xff]  ;;  %v9303_v60 = vcombine.low %v1096_v1, %v1100_v2 }
 0x436   : > { %v980_v8 = vld [vmem:[%s10680_s13 + $0x13b8] sm:$0xff] }
 0x437   : > { %7656 = vmatpush1.bf16.msra.mxu0 %v9127_v20  ;;  %7697 = vmatpush1.bf16.msra.mxu1 %v9255_v22  ;;  %v1104_v59 = vld [vmem:[%s10680_s13 + $0x1798] sm:$0xff]  ;;  %v9184_v40 = vcombine.high %v976_v6, %v980_v8  ;;  %v9183_v20 = vcombine.low %v976_v6, %v980_v8 }
 0x438   : > { %7657 = vmatprep.subr.bf16.mxu0 %v9136_v23  ;;  %7698 = vmatprep.subr.bf16.mxu1 %v9264_v24  ;;  %v1108_v10 = vld [vmem:[%s10680_s13 + $0x17b8] sm:$0xff] }
 0x439   : > { %v9312_v12 = vcombine.high %v1104_v59, %v1108_v10  ;;  %v988_v14 = vld [vmem:[%s10680_s13 + $0x13f8] sm:$0xff]  ;;  %v9311_v22 = vcombine.low %v1104_v59, %v1108_v10 }
 0x43a   : > { %v1112_v16 = vld [vmem:[%s10680_s13 + $0x17d8] sm:$0xff]  ;;  %v9192_v23 = vcombine.high %v984_v13, %v988_v14 }
 0x43b   : > { %7658 = vmatpush1.bf16.msra.mxu0 %v9135_v27  ;;  %7699 = vmatpush1.bf16.msra.mxu1 %v9263_v28  ;;  %v1116_v18 = vld [vmem:[%s10680_s13 + $0x17f8] sm:$0xff]  ;;  %v9191_v27 = vcombine.low %v984_v13, %v988_v14 }
 0x43c   : > { %7659 = vmatprep.subr.bf16.mxu0 %v9144_v30  ;;  %7700 = vmatprep.subr.bf16.mxu1 %v9272_v31  ;;  %v9320_v24 = vcombine.high %v1112_v16, %v1116_v18  ;;  %v1120_v37 = vld [vmem:[%s10680_s13 + $0x1818] sm:$0xff]  ;;  %v9319_v28 = vcombine.low %v1112_v16, %v1116_v18 }
 0x43d   : > { %v1124_v25 = vld [vmem:[%s10680_s13 + $0x1838] sm:$0xff] }
 0x43e   : > { %v1248_v41 = vld [vmem:[%s10680_s13 + $0x1c18] sm:$0xff]  ;;  %v9328_v30 = vcombine.high %v1120_v37, %v1124_v25 }
 0x43f   : > { %7660 = vmatpush1.bf16.msra.mxu0 %v9143_v36  ;;  %7701 = vmatpush1.bf16.msra.mxu1 %v9271_v38  ;;  %v1252_v26 = vld [vmem:[%s10680_s13 + $0x1c38] sm:$0xff]  ;;  %v9327_v36 = vcombine.low %v1120_v37, %v1124_v25 }
 0x440   : > { %7661 = vmatprep.subr.bf16.mxu0 %v9152_v44  ;;  %7702 = vmatprep.subr.bf16.mxu1 %v9280_v39  ;;  %v9456_v31 = vcombine.high %v1248_v41, %v1252_v26  ;;  %v1128_v33 = vld [vmem:[%s10680_s13 + $0x1858] sm:$0xff]  ;;  %v9455_v38 = vcombine.low %v1248_v41, %v1252_v26 }
 0x441   : > { %v1132_v49 = vld [vmem:[%s10680_s13 + $0x1878] sm:$0xff] }
 0x442   : > { %v1256_v34 = vld [vmem:[%s10680_s13 + $0x1c58] sm:$0xff]  ;;  %v9336_v44 = vcombine.high %v1128_v33, %v1132_v49 }
 0x443   : > { %7662 = vmatpush1.bf16.msra.mxu0 %v9151_v47  ;;  %7703 = vmatpush1.bf16.msra.mxu1 %v9279_v50  ;;  %v1260_v52 = vld [vmem:[%s10680_s13 + $0x1c78] sm:$0xff]  ;;  %v9335_v47 = vcombine.low %v1128_v33, %v1132_v49 }
 0x444   : > { %7663 = vmatprep.subr.bf16.mxu0 %v9160_v17  ;;  %7704 = vmatprep.subr.bf16.mxu1 %v9288_v55  ;;  %v9464_v39 = vcombine.high %v1256_v34, %v1260_v52  ;;  %v1136_v53 = vld [vmem:[%s10680_s13 + $0x1898] sm:$0xff]  ;;  %v9463_v50 = vcombine.low %v1256_v34, %v1260_v52  ;;  %v314_v34 = vld [vmem:[#allocation2 + $0x28] sm:$0xff] }
 0x445   : > { %v1140_v42 = vld [vmem:[%s10680_s13 + $0x18b8] sm:$0xff] }
 0x446   : > { %v1264_v43 = vld [vmem:[%s10680_s13 + $0x1c98] sm:$0xff]  ;;  %v9344_v17 = vcombine.high %v1136_v53, %v1140_v42 }
 0x447   : > { %7664 = vmatpush1.bf16.msra.mxu0 %v9159_v63  ;;  %7705 = vmatpush1.bf16.msra.mxu1 %v9287_v0  ;;  %v1268_v46 = vld [vmem:[%s10680_s13 + $0x1cb8] sm:$0xff] }
 0x448   : > { %7665 = vmatprep.subr.bf16.mxu0 %v9168_v54  ;;  %7706 = vmatprep.subr.bf16.mxu1 %v9296_v29  ;;  %v9472_v55 = vcombine.high %v1264_v43, %v1268_v46  ;;  %v1144_v21 = vld [vmem:[%s10680_s13 + $0x18d8] sm:$0xff]  ;;  %v9471_v51 = vcombine.low %v1264_v43, %v1268_v46 }
 0x449   : > { %v1148_v56 = vld [vmem:[%s10680_s13 + $0x18f8] sm:$0xff] }
 0x44a   : > { %v1276_v61 = vld [vmem:[%s10680_s13 + $0x1cf8] sm:$0xff]  ;;  %v9352_v63 = vcombine.high %v1144_v21, %v1148_v56  ;;  %v9351_v32 = vcombine.low %v1144_v21, %v1148_v56 }
 0x44b   : > { %7666 = vmatpush1.bf16.msra.mxu0 %v9167_v4  ;;  %7707 = vmatpush1.bf16.msra.mxu1 %v9295_v57  ;;  %v1152_v54 = vld [vmem:[%s10680_s13 + $0x1918] sm:$0xff] }
 0x44c   : > { %7667 = vmatprep.subr.bf16.mxu0 %v9176_v5  ;;  %7708 = vmatprep.subr.bf16.mxu1 %v9304_v58  ;;  %v1156_v29 = vld [vmem:[%s10680_s13 + $0x1938] sm:$0xff] }
 0x44d   : > { %v1280_v62 = vld [vmem:[%s10680_s13 + $0x1d18] sm:$0xff]  ;;  %v9360_v1 = vcombine.high %v1152_v54, %v1156_v29  ;;  %v9359_v6 = vcombine.low %v1152_v54, %v1156_v29 }
 0x44e   : > { %v1160_v4 = vld [vmem:[%s10680_s13 + $0x1958] sm:$0xff] }
 0x44f   : > { %7668 = vmatpush1.bf16.msra.mxu0 %v9175_v35  ;;  %7709 = vmatpush1.bf16.msra.mxu1 %v9303_v60  ;;  %v1164_v57 = vld [vmem:[%s10680_s13 + $0x1978] sm:$0xff] }
 0x450   : > { %7669 = vmatprep.subr.bf16.mxu0 %v9184_v40  ;;  %7710 = vmatprep.subr.bf16.mxu1 %v9312_v12  ;;  %v1288_v5 = vld [vmem:[%s10680_s13 + $0x1d58] sm:$0xff]  ;;  %v9368_v59 = vcombine.high %v1160_v4, %v1164_v57  ;;  %v9367_v13 = vcombine.low %v1160_v4, %v1164_v57 }
 0x451   : > { %v1292_v58 = vld [vmem:[%s10680_s13 + $0x1d78] sm:$0xff] }
 0x452   : > { %v9496_v10 = vcombine.high %v1288_v5, %v1292_v58  ;;  %v1168_v35 = vld [vmem:[%s10680_s13 + $0x1998] sm:$0xff]  ;;  %v9495_v14 = vcombine.low %v1288_v5, %v1292_v58 }
 0x453   : > { %7670 = vmatpush1.bf16.msra.mxu0 %v9183_v20  ;;  %7711 = vmatpush1.bf16.msra.mxu1 %v9311_v22  ;;  %v1172_v60 = vld [vmem:[%s10680_s13 + $0x19b8] sm:$0xff] }
 0x454   : > { %7671 = vmatprep.subr.bf16.mxu0 %v9192_v23  ;;  %7712 = vmatprep.subr.bf16.mxu1 %v9320_v24  ;;  %v1296_v40 = vld [vmem:[%s10680_s13 + $0x1d98] sm:$0xff]  ;;  %v9376_v16 = vcombine.high %v1168_v35, %v1172_v60  ;;  %v9375_v33 = vcombine.low %v1168_v35, %v1172_v60 }
 0x455   : > { %v1300_v12 = vld [vmem:[%s10680_s13 + $0x1db8] sm:$0xff] }
 0x456   : > { %v9504_v20 = vcombine.high %v1296_v40, %v1300_v12  ;;  %v1176_v22 = vld [vmem:[%s10680_s13 + $0x19d8] sm:$0xff] }
 0x457   : > { %7672 = vmatpush1.bf16.msra.mxu0 %v9191_v27  ;;  %7713 = vmatpush1.bf16.msra.mxu1 %v9319_v28  ;;  %v1180_v23 = vld [vmem:[%s10680_s13 + $0x19f8] sm:$0xff]  ;;  %v313_v27 = vld [vmem:[#allocation2 + $0x20] sm:$0xff] }
 0x458   : > { %7723 = vmatprep.subr.bf16.mxu0 %v9328_v30  ;;  %7764 = vmatprep.subr.bf16.mxu1 %v9456_v31  ;;  %v1304_v41 = vld [vmem:[%s10680_s13 + $0x1dd8] sm:$0xff] }
 0x459   : > { %v1308_v26 = vld [vmem:[%s10680_s13 + $0x1df8] sm:$0xff] }
 0x45a   : > { %7674 = vmatmul.mubr.bf16.vlgmr.msra.gmra.mrb[56].mxu0 %v10936_v3  ;;  %7715 = vmatmul.mubr.bf16.vlgmr.msra.gmra.mrb[56].mxu1 %v10941_v7  ;;  %v1272_v3 = vld [vmem:[%s10680_s13 + $0x1cd8] sm:$0xff]  ;;  %v9343_v7 = vcombine.low %v1136_v53, %v1140_v42 }
 0x45b   : > { %7724 = vmatpush1.bf16.msra.mxu0 %v9327_v36  ;;  %7765 = vmatpush1.bf16.msra.mxu1 %v9455_v38  ;;  %v9480_v0 = vcombine.high %v1272_v3, %v1276_v61  ;;  %v9503_v36 = vcombine.low %v1296_v40, %v1300_v12  ;;  %v9384_v38 = vcombine.high %v1176_v22, %v1180_v23  ;;  %v1184_v53 = vld [vmem:[%s10680_s13 + $0x1a18] sm:$0xff] }
 0x45c   : > { %7725 = vmatprep.subr.bf16.mxu0 %v9336_v44  ;;  %7766 = vmatprep.subr.bf16.mxu1 %v9464_v39  ;;  %v1188_v42 = vld [vmem:[%s10680_s13 + $0x1a38] sm:$0xff] }
 0x45d   : > { %7755 = vmatprep.mubr.bf16.mxu0 %v10946_v15  ;;  %7796 = vmatprep.mubr.bf16.mxu1 %v10951_v19  ;;  %v1284_v15 = vld [vmem:[%s10680_s13 + $0x1d38] sm:$0xff]  ;;  %v9479_v19 = vcombine.low %v1272_v3, %v1276_v61  ;;  %v9392_v21 = vcombine.high %v1184_v53, %v1188_v42 }
 0x45e   : > { %v9488_v2 = vcombine.high %v1280_v62, %v1284_v15  ;;  %v9487_v8 = vcombine.low %v1280_v62, %v1284_v15  ;;  %v1312_v46 = vld [vmem:[%s10680_s13 + $0x1e18] sm:$0xff] }
 0x45f   : > { %7726 = vmatpush1.bf16.msra.mxu0 %v9335_v47  ;;  %7767 = vmatpush1.bf16.msra.mxu1 %v9463_v50  ;;  %v1316_v47 = vld [vmem:[%s10680_s13 + $0x1e38] sm:$0xff] }
 0x460   : > { %7727 = vmatprep.subr.bf16.mxu0 %v9344_v17  ;;  %7768 = vmatprep.subr.bf16.mxu1 %v9472_v55  ;;  %v9383_v17 = vcombine.low %v1176_v22, %v1180_v23  ;;  %v9511_v55 = vcombine.low %v1304_v41, %v1308_v26  ;;  %v9520_v56 = vcombine.high %v1312_v46, %v1316_v47  ;;  %v1192_v3 = vld [vmem:[%s10680_s13 + $0x1a58] sm:$0xff] }
 0x461   : > { %v1196_v61 = vld [vmem:[%s10680_s13 + $0x1a78] sm:$0xff] }
 0x462   : > { %v9400_v54 = vcombine.high %v1192_v3, %v1196_v61  ;;  %v1200_v62 = vld [vmem:[%s10680_s13 + $0x1a98] sm:$0xff] }
 0x463   : > { %7728 = vmatpush1.bf16.msra.mxu0 %v9343_v7  ;;  %7769 = vmatpush1.bf16.msra.mxu1 %v9471_v51  ;;  %v1320_v7 = vld [vmem:[%s10680_s13 + $0x1e58] sm:$0xff] }
 0x464   : > { %7729 = vmatprep.subr.bf16.mxu0 %v9352_v63  ;;  %7770 = vmatprep.subr.bf16.mxu1 %v9480_v0  ;;  %v1324_v51 = vld [vmem:[%s10680_s13 + $0x1e78] sm:$0xff]  ;;  %v9391_v63 = vcombine.low %v1184_v53, %v1188_v42  ;;  %v9519_v0 = vcombine.low %v1312_v46, %v1316_v47 }
 0x465   : > { %v9528_v29 = vcombine.high %v1320_v7, %v1324_v51  ;;  %v1204_v15 = vld [vmem:[%s10680_s13 + $0x1ab8] sm:$0xff] }
 0x466   : > { %v9408_v4 = vcombine.high %v1200_v62, %v1204_v15  ;;  %v1208_v5 = vld [vmem:[%s10680_s13 + $0x1ad8] sm:$0xff] }
 0x467   : > { %7730 = vmatpush1.bf16.msra.mxu0 %v9351_v32  ;;  %7771 = vmatpush1.bf16.msra.mxu1 %v9479_v19  ;;  %v1328_v32 = vld [vmem:[%s10680_s13 + $0x1e98] sm:$0xff] }
 0x468   : > { %7731 = vmatprep.subr.bf16.mxu0 %v9360_v1  ;;  %7772 = vmatprep.subr.bf16.mxu1 %v9488_v2  ;;  %v1332_v19 = vld [vmem:[%s10680_s13 + $0x1eb8] sm:$0xff]  ;;  %v9399_v1 = vcombine.low %v1192_v3, %v1196_v61  ;;  %v9527_v2 = vcombine.low %v1320_v7, %v1324_v51 }
 0x469   : > { %v9536_v57 = vcombine.high %v1328_v32, %v1332_v19  ;;  %v1212_v58 = vld [vmem:[%s10680_s13 + $0x1af8] sm:$0xff] }
 0x46a   : > { %v9416_v35 = vcombine.high %v1208_v5, %v1212_v58  ;;  %v1216_v40 = vld [vmem:[%s10680_s13 + $0x1b18] sm:$0xff] }
 0x46b   : > { %7732 = vmatpush1.bf16.msra.mxu0 %v9359_v6  ;;  %7773 = vmatpush1.bf16.msra.mxu1 %v9487_v8  ;;  %v1336_v6 = vld [vmem:[%s10680_s13 + $0x1ed8] sm:$0xff] }
 0x46c   : > { %7733 = vmatprep.subr.bf16.mxu0 %v9368_v59  ;;  %7774 = vmatprep.subr.bf16.mxu1 %v9496_v10  ;;  %v1340_v8 = vld [vmem:[%s10680_s13 + $0x1ef8] sm:$0xff]  ;;  %v9407_v59 = vcombine.low %v1200_v62, %v1204_v15  ;;  %v9535_v10 = vcombine.low %v1328_v32, %v1332_v19 }
 0x46d   : > { %v7429_v18 = vpop.f32.mrb[44].mxu0  ;;  %v7470_v37 = vpop.f32.mrb[44].mxu1  ;;  %v9544_v60 = vcombine.high %v1336_v6, %v1340_v8  ;;  %v1220_v12 = vld [vmem:[%s10680_s13 + $0x1b38] sm:$0xff] }
 0x46e   : > { %v7430_v24 = vadd.f32 %v7429_v18, %v11778_v9  ;;  %v7431_v25 = vpop.f32.mrb[45].mxu0  ;;  %v7472_v30 = vpop.f32.mrb[45].mxu1  ;;  %v9543_v18 = vcombine.low %v1336_v6, %v1340_v8  ;;  %v1224_v23 = vld [vmem:[%s10680_s13 + $0x1b58] sm:$0xff] }
 0x46f   : > { %v7432_v28 = vadd.f32 %v7431_v25, %v11780_v11  ;;  %v7433_v31 = vpop.f32.mrb[46].mxu0  ;;  %7734 = vmatpush1.bf16.msra.mxu0 %v9367_v13  ;;  %v7474_v52 = vpop.f32.mrb[46].mxu1  ;;  %7775 = vmatpush1.bf16.msra.mxu1 %v9495_v14  ;;  %v9512_v11 = vcombine.high %v1304_v41, %v1308_v26  ;;  %v1344_v13 = vld [vmem:[%s10680_s13 + $0x1f18] sm:$0xff]  ;;  %v9423_v41 = vcombine.low %v1216_v40, %v1220_v12 }
 0x470   : > { %v7471_v49 = vadd.f32 %v7470_v37, %v7430_v24  ;;  %v7434_v9 = vpop.f32.mrb[47].mxu0  ;;  %7735 = vmatprep.subr.bf16.mxu0 %v9376_v16  ;;  %v7475_v39 = vpop.f32.mrb[47].mxu1  ;;  %7776 = vmatprep.subr.bf16.mxu1 %v9504_v20  ;;  %v1348_v14 = vld [vmem:[%s10680_s13 + $0x1f38] sm:$0xff]  ;;  %v9415_v16 = vcombine.low %v1208_v5, %v1212_v58  ;;  %v9424_v20 = vcombine.high %v1216_v40, %v1220_v12 }
 0x471   : > { %v7473_v44 = vadd.f32 %v7472_v30, %v7432_v28  ;;  %v9552_v22 = vcombine.high %v1344_v13, %v1348_v14  ;;  %v1228_v24 = vld [vmem:[%s10680_s13 + $0x1b78] sm:$0xff]  ;;  %v9551_v26 = vcombine.low %v1344_v13, %v1348_v14 }
 0x472   : > { %v7809_v43 = vadd.f32 %v7471_v49, %v313_v27  ;;  %v1352_v37 = vld [vmem:[%s10680_s13 + $0x1f58] sm:$0xff]  ;;  %v9432_v27 = vcombine.high %v1224_v23, %v1228_v24 }
 0x473   : > { %v7810_v50 = vadd.f32 %v7473_v44, %v314_v34  ;;  %7736 = vmatpush1.bf16.msra.mxu0 %v9375_v33  ;;  %7777 = vmatpush1.bf16.msra.mxu1 %v9503_v36  ;;  %v1356_v25 = vld [vmem:[%s10680_s13 + $0x1f78] sm:$0xff]  ;;  %v9431_v34 = vcombine.low %v1224_v23, %v1228_v24  ;;  %v315_v23 = vld [vmem:[#allocation2 + $0x30] sm:$0xff] }
 0x474   : > { %7817 = vst [vmem:[#allocation2 + $0x20] sm:$0xff] %v7809_v43  ;;  %7737 = vmatprep.subr.bf16.mxu0 %v9384_v38  ;;  %7778 = vmatprep.subr.bf16.mxu1 %v9512_v11  ;;  %v9560_v28 = vcombine.high %v1352_v37, %v1356_v25  ;;  %v1232_v30 = vld [vmem:[%s10680_s13 + $0x1b98] sm:$0xff]  ;;  %v9559_v52 = vcombine.low %v1352_v37, %v1356_v25 }
 0x475   : > { %7818 = vst [vmem:[#allocation2 + $0x28] sm:$0xff] %v7810_v50  ;;  %v1236_v31 = vld [vmem:[%s10680_s13 + $0x1bb8] sm:$0xff] }
 0x476   : > { %v1360_v33 = vld [vmem:[%s10680_s13 + $0x1f98] sm:$0xff]  ;;  %v9440_v9 = vcombine.high %v1232_v30, %v1236_v31  ;;  %v9439_v53 = vcombine.low %v1232_v30, %v1236_v31 }
 0x477   : > { %7738 = vmatpush1.bf16.msra.mxu0 %v9383_v17  ;;  %7779 = vmatpush1.bf16.msra.mxu1 %v9511_v55  ;;  %v1364_v49 = vld [vmem:[%s10680_s13 + $0x1fb8] sm:$0xff] }
 0x478   : > { %7739 = vmatprep.subr.bf16.mxu0 %v9392_v21  ;;  %7780 = vmatprep.subr.bf16.mxu1 %v9520_v56  ;;  %v9568_v36 = vcombine.high %v1360_v33, %v1364_v49  ;;  %v1240_v38 = vld [vmem:[%s10680_s13 + $0x1bd8] sm:$0xff]  ;;  %v9567_v42 = vcombine.low %v1360_v33, %v1364_v49 }
 0x479   : > { %v1244_v44 = vld [vmem:[%s10680_s13 + $0x1bf8] sm:$0xff] }
 0x47a   : > { %v1368_v39 = vld [vmem:[%s10680_s13 + $0x1fd8] sm:$0xff]  ;;  %v9448_v43 = vcombine.high %v1240_v38, %v1244_v44  ;;  %v9447_v47 = vcombine.low %v1240_v38, %v1244_v44  ;;  %v9857_v38 = vld [vmem:[%s12138_s3 + $0x80] sm:$0xff] (!%p9577_p12)   ;;  %v9850_v44 = vld [vmem:[%s12138_s3 + $0x48] sm:$0xff] (!%p9577_p12)  }
 0x47b   : > { %7740 = vmatpush1.bf16.msra.mxu0 %v9391_v63  ;;  %7781 = vmatpush1.bf16.msra.mxu1 %v9519_v0  ;;  %v1372_v11 = vld [vmem:[%s10680_s13 + $0x1ff8] sm:$0xff] }
 0x47c   : > { %7741 = vmatprep.subr.bf16.mxu0 %v9400_v54  ;;  %7782 = vmatprep.subr.bf16.mxu1 %v9528_v29  ;;  %v9576_v46 = vcombine.high %v1368_v39, %v1372_v11  ;;  %v9575_v50 = vcombine.low %v1368_v39, %v1372_v11  ;;  %v9866_v39 = vld [vmem:[%s12138_s3 + $0xc8] sm:$0xff] (!%p9577_p12)  }
 0x47d   : > { %v9842_v11 = vld [vmem:[%s12138_s3 + $0x8] sm:$0xff] (!%p9577_p12)  }
 0x47f   : > { %7742 = vmatpush1.bf16.msra.mxu0 %v9399_v1  ;;  %7783 = vmatpush1.bf16.msra.mxu1 %v9527_v2 }
 0x480   : > { %7743 = vmatprep.subr.bf16.mxu0 %v9408_v4  ;;  %7784 = vmatprep.subr.bf16.mxu1 %v9536_v57 }
 0x483   : > { %7744 = vmatpush1.bf16.msra.mxu0 %v9407_v59  ;;  %7785 = vmatpush1.bf16.msra.mxu1 %v9535_v10 }
 0x484   : > { %7745 = vmatprep.subr.bf16.mxu0 %v9416_v35  ;;  %7786 = vmatprep.subr.bf16.mxu1 %v9544_v60 }
 0x487   : > { %7746 = vmatpush1.bf16.msra.mxu0 %v9415_v16  ;;  %7787 = vmatpush1.bf16.msra.mxu1 %v9543_v18 }
 0x488   : > { %7747 = vmatprep.subr.bf16.mxu0 %v9424_v20  ;;  %7788 = vmatprep.subr.bf16.mxu1 %v9552_v22 }
 0x48b   : > { %7748 = vmatpush1.bf16.msra.mxu0 %v9423_v41  ;;  %7789 = vmatpush1.bf16.msra.mxu1 %v9551_v26  ;;  %v316_v26 = vld [vmem:[#allocation2 + $0x38] sm:$0xff] }
 0x48c   : > { %7749 = vmatprep.subr.bf16.mxu0 %v9432_v27  ;;  %7790 = vmatprep.subr.bf16.mxu1 %v9560_v28 }
 0x48f   : > { %7750 = vmatpush1.bf16.msra.mxu0 %v9431_v34  ;;  %7791 = vmatpush1.bf16.msra.mxu1 %v9559_v52  ;;  %v9849_v34 = vld [vmem:[%s12138_s3 + $0x40] sm:$0xff] (!%p9577_p12)  }
 0x490   : > { %7751 = vmatprep.subr.bf16.mxu0 %v9440_v9  ;;  %7792 = vmatprep.subr.bf16.mxu1 %v9568_v36  ;;  %v9587_v52 = vld [vmem:[%s12138_s3] sm:$0xff] (!%p9577_p12)   ;;  %v7835_v36 = vlaneseq (!%p9577_p12) }
 0x491   : > { %v9865_v9 = vld [vmem:[%s12138_s3 + $0xc0] sm:$0xff] (!%p9577_p12)  }
 0x493   : > { %7752 = vmatpush1.bf16.msra.mxu0 %v9439_v53  ;;  %7793 = vmatpush1.bf16.msra.mxu1 %v9567_v42  ;;  %v9858_v53 = vld [vmem:[%s12138_s3 + $0x88] sm:$0xff] (!%p9577_p12)   ;;  %v9851_v42 = vld [vmem:[%s12138_s3 + $0x50] sm:$0xff] (!%p9577_p12)  }
 0x494   : > { %7753 = vmatprep.subr.bf16.mxu0 %v9448_v43  ;;  %7794 = vmatprep.subr.bf16.mxu1 %v9576_v46  ;;  %v9867_v43 = vld [vmem:[%s12138_s3 + $0xd0] sm:$0xff] (!%p9577_p12)   ;;  %v11917_v46 = vshrl.u32 (!%p9577_p12), %v7835_v36, 7  ;;  %v9882_v36 = vld [vmem:[%s12138_s3 + $0x148] sm:$0xff] (!%p9577_p12)  }
 0x497   : > { %7754 = vmatpush1.bf16.msra.mxu0 %v9447_v47  ;;  %7795 = vmatpush1.bf16.msra.mxu1 %v9575_v50  ;;  %v9843_v47 = vld [vmem:[%s12138_s3 + $0x10] sm:$0xff] (!%p9577_p12)  }
 0x498   : > { %10046 = vmatprep.subr.bf16.mxu0 (!%p9577_p12), %v9849_v34  ;;  %10078 = vmatprep.subr.bf16.mxu1 (!%p9577_p12), %v9865_v9  ;;  %v9859_v50 = vld [vmem:[%s12138_s3 + $0x90] sm:$0xff] (!%p9577_p12)   ;;  %v9889_v9 = vld [vmem:[%s12138_s3 + $0x180] sm:$0xff] (!%p9577_p12)  }
 0x49a   : > { %7756 = vmatmul.mubr.bf16.vlgmr.msra.gmra.mrb[60].mxu0 %v11016_v45  ;;  %7797 = vmatmul.mubr.bf16.vlgmr.msra.gmra.mrb[60].mxu1 %v11020_v48 }
 0x49b   : > { %10048 = vmatpush3.bf16.msra.mxu0 (!%p9577_p12), %v9587_v52  ;;  %10080 = vmatpush3.bf16.msra.mxu1 (!%p9577_p12), %v9857_v38  ;;  %v9873_v52 = vld [vmem:[%s12138_s3 + $0x100] sm:$0xff] (!%p9577_p12)   ;;  %v9898_v38 = vld [vmem:[%s12138_s3 + $0x1c8] sm:$0xff] (!%p9577_p12)  }
 0x49c   : > { %10050 = vmatprep.subr.bf16.mxu0 (!%p9577_p12), %v9850_v44  ;;  %10082 = vmatprep.subr.bf16.mxu1 (!%p9577_p12), %v9866_v39 }
 0x49f   : > { %10052 = vmatpush3.bf16.msra.mxu0 (!%p9577_p12), %v9842_v11  ;;  %10084 = vmatpush3.bf16.msra.mxu1 (!%p9577_p12), %v9858_v53  ;;  %v9874_v11 = vld [vmem:[%s12138_s3 + $0x108] sm:$0xff] (!%p9577_p12)  }
 0x4a0   : > { %10054 = vmatprep.subr.bf16.mxu0 (!%p9577_p12), %v9851_v42  ;;  %10086 = vmatprep.subr.bf16.mxu1 (!%p9577_p12), %v9867_v43  ;;  %v9890_v53 = vld [vmem:[%s12138_s3 + $0x188] sm:$0xff] (!%p9577_p12)   ;;  %v9883_v42 = vld [vmem:[%s12138_s3 + $0x150] sm:$0xff] (!%p9577_p12)  }
 0x4a1   : > { %v9899_v43 = vld [vmem:[%s12138_s3 + $0x1d0] sm:$0xff] (!%p9577_p12)  }
 0x4a3   : > { %10056 = vmatpush3.bf16.msra.mxu0 (!%p9577_p12), %v9843_v47  ;;  %10088 = vmatpush3.bf16.msra.mxu1 (!%p9577_p12), %v9859_v50  ;;  %v9875_v47 = vld [vmem:[%s12138_s3 + $0x110] sm:$0xff] (!%p9577_p12)  }
 0x4a4   : > { %v9891_v50 = vld [vmem:[%s12138_s3 + $0x190] sm:$0xff] (!%p9577_p12)  }
 0x4ad   : > { %v7511_v17 = vpop.f32.mrb[48].mxu0  ;;  %v7552_v55 = vpop.f32.mrb[48].mxu1 }
 0x4ae   : > { %v7513_v21 = vpop.f32.mrb[49].mxu0  ;;  %v7553_v56 = vadd.f32 %v7552_v55, %v7511_v17  ;;  %v7554_v3 = vpop.f32.mrb[49].mxu1  ;;  %v9852_v17 = vld [vmem:[%s12138_s3 + $0x58] sm:$0xff] (!%p9577_p12)  }
 0x4af   : > { %v7515_v61 = vpop.f32.mrb[50].mxu0  ;;  %v7555_v7 = vadd.f32 %v7554_v3, %v7513_v21  ;;  %v7556_v51 = vpop.f32.mrb[50].mxu1  ;;  %v9868_v55 = vld [vmem:[%s12138_s3 + $0xd8] sm:$0xff] (!%p9577_p12)   ;;  %v7841_v21 = vsub.s32 (!%p9577_p12), 1, %v11917_v46  ;;  %10058 = vmatprep.subr.bf16.mxu0 (!%p9577_p12), %v9852_v17 }
 0x4b0   : > { %v7516_v63 = vpop.f32.mrb[51].mxu0  ;;  %v7557_v0 = vpop.f32.mrb[51].mxu1  ;;  %v9844_v3 = vld [vmem:[%s12138_s3 + $0x18] sm:$0xff] (!%p9577_p12)   ;;  %10090 = vmatprep.subr.bf16.mxu1 (!%p9577_p12), %v9868_v55  ;;  %v11939_v51 = vld [vmem:[#allocation8] sm:$0xff] (!%p9577_p12) }
 0x4b1   : > { %v9860_v61 = vld [vmem:[%s12138_s3 + $0x98] sm:$0xff] (!%p9577_p12)   ;;  %v9853_v63 = vld [vmem:[%s12138_s3 + $0x60] sm:$0xff] (!%p9577_p12)   ;;  %10060 = vmatpush3.bf16.msra.mxu0 (!%p9577_p12), %v9844_v3 }
 0x4b2   : > { %v9869_v0 = vld [vmem:[%s12138_s3 + $0xe0] sm:$0xff] (!%p9577_p12)   ;;  %10092 = vmatpush3.bf16.msra.mxu1 (!%p9577_p12), %v9860_v61  ;;  %10062 = vmatprep.subr.bf16.mxu0 (!%p9577_p12), %v9853_v63  ;;  %v9884_v17 = vld [vmem:[%s12138_s3 + $0x158] sm:$0xff] (!%p9577_p12)  }
 0x4b3   : > { %10094 = vmatprep.subr.bf16.mxu1 (!%p9577_p12), %v9869_v0  ;;  %v9900_v55 = vld [vmem:[%s12138_s3 + $0x1d8] sm:$0xff] (!%p9577_p12)   ;;  %v9885_v3 = vld [vmem:[%s12138_s3 + $0x160] sm:$0xff] (!%p9577_p12)   ;;  %v9886_v0 = vld [vmem:[%s12138_s3 + $0x168] sm:$0xff] (!%p9577_p12)  }
 0x4b4   : > { %v9901_v61 = vld [vmem:[%s12138_s3 + $0x1e0] sm:$0xff] (!%p9577_p12)  }
 0x4b5   : > { %v9893_v63 = vld [vmem:[%s12138_s3 + $0x1a0] sm:$0xff] (!%p9577_p12)  }
 0x4ed   : > { %v7593_v54 = vpop.f32.mrb[52].mxu0  ;;  %v7634_v62 = vpop.f32.mrb[52].mxu1 }
 0x4ee   : > { %v7594_v29 = vadd.f32 %v7593_v54, %v7553_v56  ;;  %v7595_v15 = vpop.f32.mrb[53].mxu0  ;;  %v7636_v19 = vpop.f32.mrb[53].mxu1  ;;  %v7849_v56 = vsub.s32 (!%p9577_p12), 3, %v11917_v46  ;;  %v7842_v54 = vrot.slane (!%p9577_p12), %v11939_v51, %v7841_v21  ;;  %v9876_v21 = vld [vmem:[%s12138_s3 + $0x118] sm:$0xff] (!%p9577_p12)  }
 0x4ef   : > { %v7596_v32 = vadd.f32 %v7595_v15, %v7555_v7  ;;  %v7597_v1 = vpop.f32.mrb[54].mxu0  ;;  %v7638_v2 = vpop.f32.mrb[54].mxu1  ;;  %v7826_v7 = vld [vmem:[#allocation2 + $0x8] sm:$0xff] (!%p9577_p12) }
 0x4f0   : > { %v7635_v45 = vadd.f32 %v7634_v62, %v7594_v29  ;;  %v7598_v48 = vpop.f32.mrb[55].mxu0  ;;  %v7639_v57 = vpop.f32.mrb[55].mxu1  ;;  %v7828_v29 = vld [vmem:[#allocation2 + $0x18] sm:$0xff] (!%p9577_p12)  ;;  %v7850_v62 = vrot.slane (!%p9577_p12), %v11939_v51, %v7849_v56  ;;  %v7876_v15 = vadd.f32 (!%p9577_p12), %v7842_v54, %v7826_v7  ;;  %v9861_v1 = vld [vmem:[%s12138_s3 + $0xa0] sm:$0xff] (!%p9577_p12)   ;;  %v9870_v2 = vld [vmem:[%s12138_s3 + $0xe8] sm:$0xff] (!%p9577_p12)  }
 0x4f1   : > { %v7637_v4 = vadd.f32 %v7636_v19, %v7596_v32  ;;  %v9845_v19 = vld [vmem:[%s12138_s3 + $0x20] sm:$0xff] (!%p9577_p12)   ;;  %v7837_v57 = vsub.s32 (!%p9577_p12), 0, %v11917_v46  ;;  %10096 = vmatpush3.bf16.msra.mxu1 (!%p9577_p12), %v9861_v1  ;;  %v9892_v56 = vld [vmem:[%s12138_s3 + $0x198] sm:$0xff] (!%p9577_p12)   ;;  %v9902_v54 = vld [vmem:[%s12138_s3 + $0x1e8] sm:$0xff] (!%p9577_p12)  }
 0x4f2   : > { %v7878_v32 = vadd.f32 (!%p9577_p12), %v7850_v62, %v7828_v29  ;;  %v7884_v48 = vmax.f32 (!%p9577_p12), %v7876_v15, 0.0  ;;  %10064 = vmatpush3.bf16.msra.mxu0 (!%p9577_p12), %v9845_v19  ;;  %10098 = vmatprep.subr.bf16.mxu1 (!%p9577_p12), %v9870_v2  ;;  %v9877_v7 = vld [vmem:[%s12138_s3 + $0x120] sm:$0xff] (!%p9577_p12)   ;;  %v7853_v29 = vsub.s32 (!%p9577_p12), 4, %v11917_v46  ;;  %v7861_v62 = vsub.s32 (!%p9577_p12), 6, %v11917_v46  ;;  %v9878_v15 = vld [vmem:[%s12138_s3 + $0x128] sm:$0xff] (!%p9577_p12)   ;;  %v9887_v19 = vld [vmem:[%s12138_s3 + $0x170] sm:$0xff] (!%p9577_p12)  }
 0x4f3   : > { %v7829_v2 = vld [vmem:[#allocation2 + $0x20] sm:$0xff] (!%p9577_p12) }
 0x4f4   : > { %8218 = vmatprep.mubr.f32.mxu0 (!%p9577_p12), %v7884_v48  ;;  %v7854_v1 = vrot.slane (!%p9577_p12), %v11939_v51, %v7853_v29 }
 0x52d   : > { %v7675_v5 = vpop.f32.mrb[56].mxu0  ;;  %v7716_v6 = vpop.f32.mrb[56].mxu1 }
 0x52e   : > { %v7676_v58 = vadd.f32 %v7675_v5, %v7635_v45  ;;  %v7677_v8 = vpop.f32.mrb[57].mxu0  ;;  %v7718_v10 = vpop.f32.mrb[57].mxu1  ;;  %v9854_v45 = vld [vmem:[%s12138_s3 + $0x68] sm:$0xff] (!%p9577_p12)   ;;  %v7845_v5 = vsub.s32 (!%p9577_p12), 2, %v11917_v46 }
 0x52f   : > { %v7678_v59 = vadd.f32 %v7677_v8, %v7637_v4  ;;  %v7679_v35 = vpop.f32.mrb[58].mxu0  ;;  %v7720_v40 = vpop.f32.mrb[58].mxu1  ;;  %v7886_v4 = vmax.f32 (!%p9577_p12), %v7878_v32, 0.0  ;;  %10066 = vmatprep.subr.bf16.mxu0 (!%p9577_p12), %v9854_v45  ;;  %v9855_v8 = vld [vmem:[%s12138_s3 + $0x70] sm:$0xff] (!%p9577_p12)   ;;  %v9894_v32 = vld [vmem:[%s12138_s3 + $0x1a8] sm:$0xff] (!%p9577_p12)   ;;  %v7862_v45 = vrot.slane (!%p9577_p12), %v11939_v51, %v7861_v62 }
 0x530   : > { %v7717_v60 = vadd.f32 %v7716_v6, %v7676_v58  ;;  %v7680_v12 = vpop.f32.mrb[59].mxu0  ;;  %v7721_v14 = vpop.f32.mrb[59].mxu1  ;;  %v9846_v58 = vld [vmem:[%s12138_s3 + $0x28] sm:$0xff] (!%p9577_p12)   ;;  %v7865_v35 = vsub.s32 (!%p9577_p12), 7, %v11917_v46  ;;  %v7846_v40 = vrot.slane (!%p9577_p12), %v11939_v51, %v7845_v5  ;;  %v9888_v5 = vld [vmem:[%s12138_s3 + $0x178] sm:$0xff] (!%p9577_p12)  }
 0x531   : > { %v7719_v13 = vadd.f32 %v7718_v10, %v7678_v59  ;;  %v9862_v6 = vld [vmem:[%s12138_s3 + $0xa8] sm:$0xff] (!%p9577_p12)   ;;  %v9871_v59 = vld [vmem:[%s12138_s3 + $0xf0] sm:$0xff] (!%p9577_p12)   ;;  %8288 = vmatprep.mubr.f32.mxu1 (!%p9577_p12), %v7886_v4  ;;  %v7857_v10 = vsub.s32 (!%p9577_p12), 5, %v11917_v46  ;;  %10068 = vmatpush3.bf16.msra.mxu0 (!%p9577_p12), %v9846_v58  ;;  %v7825_v12 = vld [vmem:[#allocation2] sm:$0xff] (!%p9577_p12)  ;;  %v7879_v58 = vadd.f32 (!%p9577_p12), %v7854_v1, %v7829_v2 }
 0x532   : > { %10100 = vmatpush3.bf16.msra.mxu1 (!%p9577_p12), %v9862_v6  ;;  %10070 = vmatprep.subr.bf16.mxu0 (!%p9577_p12), %v9855_v8  ;;  %v9847_v14 = vld [vmem:[%s12138_s3 + $0x30] sm:$0xff] (!%p9577_p12)   ;;  %v9880_v8 = vld [vmem:[%s12138_s3 + $0x138] sm:$0xff] (!%p9577_p12)  }
 0x533   : > { %10102 = vmatprep.subr.bf16.mxu1 (!%p9577_p12), %v9871_v59  ;;  %v9903_v46 = vld [vmem:[%s12138_s3 + $0x1f0] sm:$0xff] (!%p9577_p12)   ;;  %v9896_v59 = vld [vmem:[%s12138_s3 + $0x1b8] sm:$0xff] (!%p9577_p12)  }
 0x534   : > { %v9879_v4 = vld [vmem:[%s12138_s3 + $0x130] sm:$0xff] (!%p9577_p12)  }
 0x535   : > { %10072 = vmatpush3.bf16.msra.mxu0 (!%p9577_p12), %v9847_v14 }
 0x56d   : > { %v7757_v16 = vpop.f32.mrb[60].mxu0  ;;  %v7798_v20 = vpop.f32.mrb[60].mxu1 }
 0x56e   : > { %v7758_v18 = vadd.f32 %v7757_v16, %v7717_v60  ;;  %v7759_v22 = vpop.f32.mrb[61].mxu0  ;;  %v7800_v37 = vpop.f32.mrb[61].mxu1  ;;  %v7838_v60 = vrot.slane (!%p9577_p12), %v11939_v51, %v7837_v57  ;;  %v9863_v16 = vld [vmem:[%s12138_s3 + $0xb0] sm:$0xff] (!%p9577_p12)  }
 0x56f   : > { %v7760_v24 = vadd.f32 %v7759_v22, %v7719_v13  ;;  %v7761_v25 = vpop.f32.mrb[62].mxu0  ;;  %v7802_v27 = vpop.f32.mrb[62].mxu1  ;;  %7824 = sbr.rel (%p9577_p12) target bundleno = 1651 (0x673), region = 64  ;;  %v7827_v13 = vld [vmem:[#allocation2 + $0x10] sm:$0xff] (!%p9577_p12)  ;;  %v7858_v22 = vrot.slane (!%p9577_p12), %v11939_v51, %v7857_v10  ;;  %10104 = vmatpush3.bf16.msra.mxu1 (!%p9577_p12), %v9863_v16  ;;  %v7887_v10 = vmax.f32 (!%p9577_p12), %v7879_v58, 0.0 }
 0x570   : > { %v7799_v41 = vadd.f32 %v7798_v20, %v7758_v18  ;;  %v7762_v28 = vpop.f32.mrb[63].mxu0  ;;  %v7803_v31 = vpop.f32.mrb[63].mxu1  ;;  %v9856_v18 = vld [vmem:[%s12138_s3 + $0x78] sm:$0xff] (!%p9577_p12)   ;;  %v7830_v25 = vld [vmem:[#allocation2 + $0x28] sm:$0xff] (!%p9577_p12)  ;;  %v9895_v57 = vld [vmem:[%s12138_s3 + $0x1b0] sm:$0xff] (!%p9577_p12)  }
 0x571   : > { %v7801_v30 = vadd.f32 %v7800_v37, %v7760_v24  ;;  %v9872_v20 = vld [vmem:[%s12138_s3 + $0xf8] sm:$0xff] (!%p9577_p12)   ;;  %v7875_v24 = vadd.f32 (!%p9577_p12), %v7838_v60, %v7825_v12  ;;  %v7877_v37 = vadd.f32 (!%p9577_p12), %v7846_v40, %v7827_v13  ;;  %10074 = vmatprep.subr.bf16.mxu0 (!%p9577_p12), %v9856_v18  ;;  %v9881_v28 = vld [vmem:[%s12138_s3 + $0x140] sm:$0xff] (!%p9577_p12)   ;;  %v7880_v31 = vadd.f32 (!%p9577_p12), %v7858_v22, %v7830_v25  ;;  %v9578_v12 = vld [vmem:[#allocation9] ss:$0 sm:$0xff] (!%p9577_p12) }
 0x572   : > { %v7811_v33 = vadd.f32 %v7799_v41, %v315_v23  ;;  %v7866_v23 = vrot.slane (!%p9577_p12), %v11939_v51, %v7865_v35  ;;  %10106 = vmatprep.subr.bf16.mxu1 (!%p9577_p12), %v9872_v20  ;;  %v9864_v27 = vld [vmem:[%s12138_s3 + $0xb8] sm:$0xff] (!%p9577_p12)  }
 0x573   : > { %v7812_v49 = vadd.f32 %v7801_v30, %v316_v26  ;;  %v9848_v26 = vld [vmem:[%s12138_s3 + $0x38] sm:$0xff] (!%p9577_p12)   ;;  %v9897_v30 = vld [vmem:[%s12138_s3 + $0x1c0] sm:$0xff] (!%p9577_p12)   ;;  %v7885_v34 = vmax.f32 (!%p9577_p12), %v7877_v37, 0.0  ;;  %10108 = vmatpush3.bf16.msra.mxu1 (!%p9577_p12), %v9864_v27  ;;  %v7888_v44 = vmax.f32 (!%p9577_p12), %v7880_v31, 0.0 }
 0x574   : > { %7819 = vst [vmem:[#allocation2 + $0x30] sm:$0xff] %v7811_v33  ;;  %10076 = vmatpush3.bf16.msra.mxu0 (!%p9577_p12), %v9848_v26  ;;  %10142 = vmatprep.subr.bf16.mxu1 (!%p9577_p12), %v9897_v30  ;;  %v9904_v51 = vld [vmem:[%s12138_s3 + $0x1f8] sm:$0xff] (!%p9577_p12)  }
 0x575   : > { %7820 = vst [vmem:[#allocation2 + $0x38] sm:$0xff] %v7812_v49  ;;  %v7883_v49 = vmax.f32 (!%p9577_p12), %v7875_v24, 0.0  ;;  %10110 = vmatprep.subr.bf16.mxu0 (!%p9577_p12), %v9881_v28 }
 0x576   : > { %8289 = vmatmul.mubr.f32.vlgmr.msra.gmra.mrb[0].mxu1 %v7885_v34 }
 0x577   : > { %8219 = vmatmul.mubr.f32.vlgmr.msra.gmra.mrb[0].mxu0 %v7883_v49  ;;  %10144 = vmatpush3.bf16.msra.mxu1 %v9889_v9 }
 0x578   : > { %10112 = vmatpush3.bf16.msra.mxu0 %v9873_v52  ;;  %10146 = vmatprep.subr.bf16.mxu1 %v9898_v38 }
 0x579   : > { %10114 = vmatprep.subr.bf16.mxu0 %v9882_v36  ;;  %8358 = vmatprep.mubr.f32.mxu0 %v7888_v44 }
 0x57b   : > { %10148 = vmatpush3.bf16.msra.mxu1 %v9890_v53  ;;  %v7831_v48 = vld [vmem:[#allocation2 + $0x30] sm:$0xff] }
 0x57c   : > { %v7832_v41 = vld [vmem:[#allocation2 + $0x38] sm:$0xff]  ;;  %10116 = vmatpush3.bf16.msra.mxu0 %v9874_v11  ;;  %10150 = vmatprep.subr.bf16.mxu1 %v9899_v43  ;;  %v7881_v6 = vadd.f32 %v7862_v45, %v7831_v48 }
 0x57d   : > { %v7882_v33 = vadd.f32 %v7866_v23, %v7832_v41  ;;  %10118 = vmatprep.subr.bf16.mxu0 %v9883_v42 }
 0x57e   : > { %v7889_v35 = vmax.f32 %v7881_v6, 0.0 }
 0x57f   : > { %v7890_v39 = vmax.f32 %v7882_v33, 0.0  ;;  %10152 = vmatpush3.bf16.msra.mxu1 %v9891_v50 }
 0x580   : > { %10120 = vmatpush3.bf16.msra.mxu0 %v9875_v47  ;;  %10154 = vmatprep.subr.bf16.mxu1 %v9900_v55 }
 0x581   : > { %8428 = vmatprep.mubr.f32.mxu1 %v7890_v39  ;;  %10122 = vmatprep.subr.bf16.mxu0 %v9884_v17 }
 0x583   : > { %10156 = vmatpush3.bf16.msra.mxu1 %v9892_v56 }
 0x584   : > { %10124 = vmatpush3.bf16.msra.mxu0 %v9876_v21  ;;  %10158 = vmatprep.subr.bf16.mxu1 %v9901_v61 }
 0x585   : > { %10126 = vmatprep.subr.bf16.mxu0 %v9885_v3 }
 0x587   : > { %10160 = vmatpush3.bf16.msra.mxu1 %v9893_v63 }
 0x588   : > { %10128 = vmatpush3.bf16.msra.mxu0 %v9877_v7  ;;  %10162 = vmatprep.subr.bf16.mxu1 %v9902_v54 }
 0x589   : > { %10130 = vmatprep.subr.bf16.mxu0 %v9886_v0 }
 0x58b   : > { %10164 = vmatpush3.bf16.msra.mxu1 %v9894_v32 }
 0x58c   : > { %10132 = vmatpush3.bf16.msra.mxu0 %v9878_v15  ;;  %10166 = vmatprep.subr.bf16.mxu1 %v9903_v46 }
 0x58d   : > { %10134 = vmatprep.subr.bf16.mxu0 %v9887_v19 }
 0x58f   : > { %10168 = vmatpush3.bf16.msra.mxu1 %v9895_v57 }
 0x590   : > { %10136 = vmatpush3.bf16.msra.mxu0 %v9879_v4  ;;  %10170 = vmatprep.subr.bf16.mxu1 %v9904_v51 }
 0x591   : > { %10138 = vmatprep.subr.bf16.mxu0 %v9888_v5 }
 0x593   : > { %10172 = vmatpush3.bf16.msra.mxu1 %v9896_v59 }
 0x594   : > { %10140 = vmatpush3.bf16.msra.mxu0 %v9880_v8 }
 0x596   : > { %8429 = vmatmul.mubr.f32.vlgmr.msra.gmra.mrb[2].mxu1 %v7889_v35 }
 0x597   : > { %8359 = vmatmul.mubr.f32.vlgmr.msra.gmra.mrb[2].mxu0 %v7887_v10 }
 0x649   : > { %v9972_v40 = vpop.f32.mrb[0].mxu1 }
 0x64a   : > { %v9937_v60 = vpop.f32.mrb[0].mxu0  ;;  %v9973_v14 = vpop.f32.mrb[1].mxu1 }
 0x64b   : > { %v9938_v13 = vpop.f32.mrb[1].mxu0  ;;  %v9974_v18 = vadd.f32 %v9973_v14, %v9972_v40 }
 0x64c   : > { %v9939_v16 = vadd.f32 %v9938_v13, %v9937_v60 }
 0x64e   : > { %v8221_v20 = vadd.f32 %v9939_v16, %v9578_v12 }
 0x650   : > { %v8291_v22 = vadd.f32 %v9974_v18, %v8221_v20 }
 0x669   : > { %v10042_v24 = vpop.f32.mrb[2].mxu1 }
 0x66a   : > { %v10007_v23 = vpop.f32.mrb[2].mxu0  ;;  %v10043_v25 = vpop.f32.mrb[3].mxu1 }
 0x66b   : > { %v10008_v37 = vpop.f32.mrb[3].mxu0  ;;  %v10044_v26 = vadd.f32 %v10043_v25, %v10042_v24 }
 0x66c   : > { %v10009_v41 = vadd.f32 %v10008_v37, %v10007_v23 }
 0x66e   : > { %v8361_v27 = vadd.f32 %v10009_v41, %v8291_v22 }
 0x670   : > { %v8431_v28 = vadd.f32 %v10044_v26, %v8361_v27 }
 0x672   : > { %8435 = vst.msk [vmem:[#allocation11] sm:$0xff] %vm8434_vm0, %v8431_v28 }
 0x673 PF: > { %p10208_p0 = scmp.eq.s32.totalorder %s10499_s22, 1  ;;  %s10449_s18 = smov [#allocation11]  }
 0x674   : > { %s8443_s6 = sshll.u32 %s10449_s18, 4  ;;  %s8444_s6 = int_to_ptr.vmem [resolvable:$true] %s8443_s6 }
 0x675   : > { %s10364_s26 = scalar_lea.vmem %s8444_s6, 128  ;;  %p10371_p10 = scmp.lt.s32.totalorder %s8444_s6, %s8444_s6 }
 0x676   : > { %p10365_p2 = scmp.ne.s32.totalorder %s8444_s6, %s10364_s26  ;;  %p10372_p9 = scmp.lt.s32.totalorder %s10364_s26, %s10364_s26 }
 0x678   : > { %p10366_p13 = pnand %p10365_p2, %p10208_p0  ;;  %p10373_p11 = por %p10372_p9, %p10371_p10 }
 0x67a   : > { %p10367_p3 = pneg %p10366_p13 }
 0x67c   : > { %p10374_p7 = pnand %p10373_p11, %p10367_p3 }
 0x67e   : > { %10377 = shalt.err (!%p10374_p7)
}
 0x67f   : > { %s10378_s12 = scalar_lea.hbm %s12140_s5, 128 }
 0x680   : > { %p10379_p8 = scmp.ne.s32.totalorder %s12140_s5, %s10378_s12  ;;  %p10384_p5 = scmp.lt.u32.totalorder %s10378_s12, %s12140_s5 }
 0x682   : > { %p10380_p1 = pnand %p10379_p8, %p10208_p0 }
 0x684   : > { %p10381_p4 = pneg %p10380_p1 }
 0x686   : > { %p10386_p6 = pnand %p10384_p5, %p10381_p4 }
 0x688   : > { %10389 = shalt.err (!%p10386_p6)
}
 0x689   : > { %10186 = dma.vmem_to_hbm [thread:$0]  (%p10208_p0), %s8444_s6, 128, %s12140_s5, [#allocation5]  }
 0x68a   : > { %10423 = dma.done.wait (%p10208_p0), [#allocation5], 128  }
 0x68b   : > { %10425 = vsyncadd (%p10208_p0), [#allocation5], 4294967168 }
 0x68c PF: > { %p20_p12 = scmp.ge.s32.totalorder %s10527_s30, 4   ;;  %s12155_s18 = smov %s10432_s19 }
 0x68d   : > { %s12156_s19 = smov %s10436_s20  ;;  %s12157_s20 = smov %s10587_s29 }
 0x68e   : > { %s12158_s21 = smov %s10527_s30  ;;  %22 = sbr.rel (!%p20_p12) target bundleno = 7 (0x7), region = 106 }
 0x695   :  { %8456 = vsyncpa [#allocation4], 1 }
 0x696   :  { %8458 = vsyncpa [#allocation4 + $0x1], 1 }
 0x697   :  { %8459 = vsyncpa [#allocation7], 1 }
 0x698   :  { %8461 = vsyncpa [#allocation7 + $0x1], 1 }
 0x699   :  { %8462 = vsyncpa [#allocation10], 1 }
 0x69a   :  { %8463 = vsyncpa [#allocation5], 1 }
 0x69b   :  { %8465 = vsyncpa [#allocation5 + $0x1], 1 }

</bundles_post_ra>
